<compile_context>
chip_gen: v5e
topology: v5e:2x2
jax: 0.10.0
libtpu: 0.0.40
codegen_flags: <defaults>
</compile_context>

<pallas_src>
import functools
import math

import numpy as np

import jax
import jax.numpy as jnp
from jax.experimental import pallas as pl
from jax.experimental.pallas import tpu as pltpu


def _round_up(v, m):
    return ((v + m - 1) // m) * m


def _pick_vmem_limit():
    # Generation-aware scoped-VMEM cap: ~half of physical (v7x: 32 MiB,
    # v5e/v6e: 64 MiB).  Per-step working sets here are < 1 MiB anyway.
    try:
        info = pltpu.get_tpu_info()
        cap = int(getattr(info, "vmem_capacity_bytes"))
        return int(min(cap // 2, 96 * 1024 * 1024))
    except Exception:
        return 32 * 1024 * 1024


_VMEM_LIMIT = _pick_vmem_limit()


# ----------------------------------------------------------------------------
# Pallas kernels
# ----------------------------------------------------------------------------
def _matmul_bias_act_kernel(a_ref, w_ref, bias_ref, o_ref, *, act):
    acc = jnp.dot(a_ref[...], w_ref[...], preferred_element_type=jnp.float32)
    acc = acc + bias_ref[...]
    if act == "relu":
        acc = jnp.maximum(acc, 0.0)
    elif act == "sigmoid":
        acc = jax.nn.sigmoid(acc)
    o_ref[...] = acc.astype(o_ref.dtype)


def _choose_tm(m):
    # >= 2 "parallel" grid steps whenever the row count allows it (v7x: 2 TCs).
    if m >= 512:
        return 256
    if m >= 16:
        return _round_up((m + 1) // 2, 8)
    return 8


def matmul_bias_act(a, w, bias, *, act="none", out_dtype=jnp.float32):
    """(M, K) @ (K, N) + bias -> activation.  M-tiled parallel grid."""
    M, K = a.shape
    K2, N = w.shape
    assert K == K2
    assert bias.shape == (1, N)
    if a.dtype != w.dtype:
        a = a.astype(w.dtype)
    TM = _choose_tm(M)
    Mp = _round_up(M, TM)
    if Mp != M:
        a = jnp.pad(a, ((0, Mp - M), (0, 0)))
    out = pl.pallas_call(
        functools.partial(_matmul_bias_act_kernel, act=act),
        out_shape=jax.ShapeDtypeStruct((Mp, N), out_dtype),
        grid=(Mp // TM,),
        in_specs=[
            pl.BlockSpec((TM, K), lambda i: (i, 0)),
            pl.BlockSpec((K, N), lambda i: (0, 0)),
            pl.BlockSpec((1, N), lambda i: (0, 0)),
        ],
        out_specs=pl.BlockSpec((TM, N), lambda i: (i, 0)),
        compiler_params=pltpu.CompilerParams(
            dimension_semantics=("parallel",),
            vmem_limit_bytes=_VMEM_LIMIT,
        ),
    )(a, w, bias)
    return out[:M] if Mp != M else out


def _latent_kernel(hxy_ref, hyz_ref, eps_ref,
                   wh_ref, bh_ref, wd_ref, bd_ref,
                   wyf_ref, bjy_ref, wuf_ref, bju_ref,
                   wzcy_ref, wzcu_ref, bzc_ref,
                   stats_ref, samp_ref, dec_ref, zc_ref, *, L):
    # 1) fused gaussian heads for z and u: lane-dense (M, 4L) stats store.
    stats = jnp.dot(hxy_ref[...], wh_ref[...],
                    preferred_element_type=jnp.float32) + bh_ref[...]
    stats_ref[...] = stats
    mu = stats[:, :2 * L]
    logv = stats[:, 2 * L:]
    # 2) reparameterization of both latents in the epilogue.
    samp = mu + eps_ref[...] * jnp.exp(0.5 * logv)
    samp_ref[...] = samp
    # 3) fused fc_decode_x / fc_decode_y (block-diagonal, 640-lane output).
    dec_ref[...] = jnp.dot(samp, wd_ref[...],
                           preferred_element_type=jnp.float32) + bd_ref[...]
    # 4) z_cond chain: (y_to_z fc | u_to_z) then mu/logvar_u_y_to_z, no
    #    nonlinearity in between (matches the PyTorch module).
    u = samp[:, L:]
    jy = jnp.dot(hyz_ref[...], wyf_ref[...],
                 preferred_element_type=jnp.float32) + bjy_ref[...]
    ju = jnp.dot(u, wuf_ref[...],
                 preferred_element_type=jnp.float32) + bju_ref[...]
    zc_ref[...] = (jnp.dot(jy, wzcy_ref[...], preferred_element_type=jnp.float32)
                   + jnp.dot(ju, wzcu_ref[...], preferred_element_type=jnp.float32)
                   + bzc_ref[...])


def latent_block(pp, h_x, h_y, h_yz, eps_z, eps_u, L):
    M = h_x.shape[0]
    Mp = _round_up(max(M, 8), 8)

    def pad_rows(a):
        return jnp.pad(a, ((0, Mp - M), (0, 0))) if Mp != M else a

    hxy = pad_rows(jnp.concatenate([h_x, h_y], axis=1))
    hyz = pad_rows(h_yz)
    eps = pad_rows(jnp.concatenate([eps_z, eps_u], axis=1))
    n_dec = pp["W_dec"].shape[1]

    ins = (hxy, hyz, eps,
           pp["W_head"], pp["b_head"], pp["W_dec"], pp["b_dec"],
           pp["W_yf"], pp["b_jy"], pp["W_uf"], pp["b_ju"],
           pp["W_zc_y"], pp["W_zc_u"], pp["b_zc"])
    out_shape = (
        jax.ShapeDtypeStruct((Mp, 4 * L), jnp.float32),   # [mu_z|mu_u|lv_z|lv_u]
        jax.ShapeDtypeStruct((Mp, 2 * L), jnp.float32),   # [z | u]
        jax.ShapeDtypeStruct((Mp, n_dec), jnp.float32),   # [hx_dec | hy_dec]
        jax.ShapeDtypeStruct((Mp, 2 * L), jnp.float32),   # [mu_z_uy | logvar_z_uy]
    )
    stats, samp, dec, zc = pl.pallas_call(
        functools.partial(_latent_kernel, L=L),
        out_shape=out_shape,
        grid=(1,),
        in_specs=[pl.BlockSpec(a.shape, lambda i: (0, 0)) for a in ins],
        out_specs=tuple(pl.BlockSpec(s.shape, lambda i: (0, 0)) for s in out_shape),
        compiler_params=pltpu.CompilerParams(
            dimension_semantics=("arbitrary",),
            vmem_limit_bytes=_VMEM_LIMIT,
        ),
    )(*ins)
    return stats[:M], samp[:M], dec[:M], zc[:M]


# ----------------------------------------------------------------------------
# Conv layers (NHWC; patch assembly in plain JAX, compute inside Pallas)
# ----------------------------------------------------------------------------
def _im2col_nhwc(x, k, stride, padding):
    B, H, W, C = x.shape
    Ho = (H + 2 * padding - k) // stride + 1
    Wo = (W + 2 * padding - k) // stride + 1
    if padding:
        x = jnp.pad(x, ((0, 0), (padding, padding), (padding, padding), (0, 0)))
    cols = []
    for i in range(k):
        for j in range(k):
            cols.append(x[:, i:i + stride * Ho:stride, j:j + stride * Wo:stride, :])
    patches = jnp.stack(cols, axis=3)                    # (B, Ho, Wo, k*k, C)
    return patches.reshape(B * Ho * Wo, k * k * C), Ho, Wo


def conv_layer(x_nhwc, wmat, bias, *, k, stride, padding, act, out_dtype):
    B = x_nhwc.shape[0]
    patches, Ho, Wo = _im2col_nhwc(x_nhwc, k, stride, padding)
    out = matmul_bias_act(patches, wmat, bias, act=act, out_dtype=out_dtype)
    return out.reshape(B, Ho, Wo, wmat.shape[1])


def _convT_phase_offsets(k, p):
    # Union (over the 2 output phases) of input offsets contributing to a
    # stride-2 ConvTranspose output row/column.
    return [o for o in range(-k, k + 1)
            if any(0 <= (r + p - 2 * o) < k for r in (0, 1))]


def conv_transpose_layer(x_nhwc, wmat, bias, *, k, cout, act, out_dtype,
                         stride=2, padding=1):
    """Sub-pixel ConvTranspose2d: one dense matmul, 4 phases packed on lanes."""
    assert stride == 2 and padding == 1  # holds for this model
    B, H, W, _ = x_nhwc.shape
    Ho = (H - 1) * stride - 2 * padding + k
    Wo = (W - 1) * stride - 2 * padding + k
    Qh, Qw = (Ho + 1) // 2, (Wo + 1) // 2
    offs = _convT_phase_offsets(k, padding)
    U = len(offs)
    pad_t = max(0, -offs[0])
    pad_l = pad_t
    pad_b = max(0, Qh + offs[-1] - H)
    pad_r = max(0, Qw + offs[-1] - W)
    xp = jnp.pad(x_nhwc, ((0, 0), (pad_t, pad_b), (pad_l, pad_r), (0, 0)))
    assert xp.shape[1] - U + 1 == Qh and xp.shape[2] - U + 1 == Qw
    patches, _, _ = _im2col_nhwc(xp, U, stride=1, padding=0)  # (B*Qh*Qw, U*U*Cin)
    out = matmul_bias_act(patches, wmat, bias, act=act, out_dtype=out_dtype)
    out = out.reshape(B, Qh, Qw, 2, 2, cout)
    out = jnp.transpose(out, (0, 1, 3, 2, 4, 5)).reshape(B, 2 * Qh, 2 * Qw, cout)
    return out[:, :Ho, :Wo, :]


_DEC_SPECS = ((3, 64, "relu"), (4, 32, "relu"), (8, 4, "sigmoid"))


def _decoder_stack(packed_layers, a):
    n = len(_DEC_SPECS)
    for idx, ((k, cout, act), (wmat, bias)) in enumerate(zip(_DEC_SPECS, packed_layers)):
        out_dtype = jnp.float32 if idx == n - 1 else jnp.bfloat16
        a = conv_transpose_layer(a, wmat, bias, k=k, cout=cout, act=act,
                                 out_dtype=out_dtype)
    return a


def _flatten_nchw(a_nhwc):
    # PyTorch .view(B, -1) flattens NCHW in (C, H, W) order.
    B = a_nhwc.shape[0]
    return jnp.transpose(a_nhwc, (0, 3, 1, 2)).reshape(B, -1)


# ----------------------------------------------------------------------------
# Parameter init (deterministic, PyTorch-like uniform fan-in scaling)
# ----------------------------------------------------------------------------
def _uinit(key, shape, fan_in):
    bound = 1.0 / math.sqrt(fan_in)
    return jax.random.uniform(key, shape, jnp.float32, -bound, bound)


def _init_conv(key, cout, cin, k):
    kw_, kb_ = jax.random.split(key)
    fan = cin * k * k
    return _uinit(kw_, (cout, cin, k, k), fan), _uinit(kb_, (cout,), fan)


def _init_convT(key, cin, cout, k):
    kw_, kb_ = jax.random.split(key)
    fan = cout * k * k
    return _uinit(kw_, (cin, cout, k, k), fan), _uinit(kb_, (cout,), fan)


def _init_linear(key, out_f, in_f):
    kw_, kb_ = jax.random.split(key)
    return _uinit(kw_, (out_f, in_f), in_f), _uinit(kb_, (out_f,), in_f)


def init_params(key, latent_size, patch_size):
    ks = jax.random.split(key, 32)
    it = iter(ks)
    enc_shapes = [(32, 4, 3), (64, 32, 3), (128, 64, 3)]
    dec_shapes = [(128, 64, 3), (64, 32, 4), (32, 4, 8)]
    p = {}
    p["enc1"] = [_init_conv(next(it), co, ci, k) for co, ci, k in enc_shapes]
    p["enc2"] = [_init_conv(next(it), co, ci, k) for co, ci, k in enc_shapes]
    p["y2z_conv"] = [_init_conv(next(it), co, ci, k) for co, ci, k in enc_shapes]
    half = patch_size ** 2 // 2
    full = 2 * patch_size ** 2
    p["fc_mu_1"] = _init_linear(next(it), latent_size, half)
    p["fc_logvar_1"] = _init_linear(next(it), latent_size, half)
    p["fc_decode_y"] = _init_linear(next(it), half, latent_size)
    p["fc_mu_2"] = _init_linear(next(it), latent_size, full)
    p["fc_logvar_2"] = _init_linear(next(it), latent_size, full)
    p["fc_decode_x"] = _init_linear(next(it), full, latent_size)
    p["dec1"] = [_init_convT(next(it), ci, co, k) for ci, co, k in dec_shapes]
    p["dec2"] = [_init_convT(next(it), ci, co, k) for ci, co, k in dec_shapes]
    p["y2z_fc"] = _init_linear(next(it), latent_size // 2, half)
    p["u_to_z"] = _init_linear(next(it), latent_size // 2, latent_size)
    p["mu_u_y_to_z"] = _init_linear(next(it), latent_size, latent_size)
    p["logvar_u_y_to_z"] = _init_linear(next(it), latent_size, latent_size)
    return p


# ----------------------------------------------------------------------------
# One-time weight packing (outside jit): transposes, fusions, bf16 casts.
# ----------------------------------------------------------------------------
def _conv_wmat(w):
    cout, cin, kh, kw = w.shape
    return jnp.transpose(w, (2, 3, 1, 0)).reshape(kh * kw * cin, cout)


def _conv_wmat_blockdiag(wa, wb):
    cout_a, c, k, _ = wa.shape
    cout_b = wb.shape[0]
    W = jnp.zeros((k, k, 2 * c, cout_a + cout_b), jnp.float32)
    W = W.at[:, :, :c, :cout_a].set(jnp.transpose(wa, (2, 3, 1, 0)))
    W = W.at[:, :, c:, cout_a:].set(jnp.transpose(wb, (2, 3, 1, 0)))
    return W.reshape(k * k * 2 * c, cout_a + cout_b)


def _pack_convT(w_t, b, comp_dtype, padding=1):
    """Per-phase ConvTranspose packing: (U*U*Cin, 4*Cout) common-window weight."""
    w_np = np.asarray(w_t, dtype=np.float32)
    cin, cout, kh, kw = w_np.shape
    assert kh == kw, "square ConvTranspose kernels only"
    k = kh
    offs = _convT_phase_offsets(k, padding)
    U = len(offs)
    W = np.zeros((U, U, cin, 2, 2, cout), np.float32)
    for rh in range(2):
        for ih, oh in enumerate(offs):
            th = rh + padding - 2 * oh
            if not (0 <= th < k):
                continue
            for rw in range(2):
                for iw, ow in enumerate(offs):
                    tw = rw + padding - 2 * ow
                    if not (0 <= tw < k):
                        continue
                    W[ih, iw, :, rh, rw, :] = w_np[:, :, th, tw]
    wmat = jnp.asarray(W.reshape(U * U * cin, 4 * cout), dtype=comp_dtype)
    bias = jnp.asarray(np.tile(np.asarray(b, np.float32), 4).reshape(1, -1))
    return (wmat, bias)


def prepare_params(p, latent_size, patch_size):
    f32, bf = jnp.float32, jnp.bfloat16
    L = latent_size
    pp = {}

    # --- y branch: encoder1 + y_to_z convs fused along Cout ---
    yb = []
    (wa, ba), (wb, bb) = p["enc1"][0], p["y2z_conv"][0]
    yb.append((jnp.concatenate([_conv_wmat(wa), _conv_wmat(wb)], axis=1).astype(bf),
               jnp.concatenate([ba, bb]).astype(f32).reshape(1, -1)))
    for li in (1, 2):
        (wa, ba), (wb, bb) = p["enc1"][li], p["y2z_conv"][li]
        yb.append((_conv_wmat_blockdiag(wa, wb).astype(bf),
                   jnp.concatenate([ba, bb]).astype(f32).reshape(1, -1)))
    pp["ybranch"] = yb
    pp["enc2"] = [(_conv_wmat(w).astype(bf), b.astype(f32).reshape(1, -1))
                  for (w, b) in p["enc2"]]

    # --- decoders: per-phase ConvTranspose packing ---
    pp["dec1"] = [_pack_convT(w, b, bf) for (w, b) in p["dec1"]]
    pp["dec2"] = [_pack_convT(w, b, bf) for (w, b) in p["dec2"]]

    # --- fused gaussian heads (block-diagonal over [h_x | h_y]) ---
    K1 = 2 * patch_size ** 2
    K2 = patch_size ** 2 // 2
    w_mu2, b_mu2 = p["fc_mu_2"]
    w_lv2, b_lv2 = p["fc_logvar_2"]
    w_mu1, b_mu1 = p["fc_mu_1"]
    w_lv1, b_lv1 = p["fc_logvar_1"]
    Wh = jnp.zeros((K1 + K2, 4 * L), f32)
    Wh = Wh.at[:K1, 0:L].set(w_mu2.T)
    Wh = Wh.at[:K1, 2 * L:3 * L].set(w_lv2.T)
    Wh = Wh.at[K1:, L:2 * L].set(w_mu1.T)
    Wh = Wh.at[K1:, 3 * L:4 * L].set(w_lv1.T)
    pp["W_head"] = Wh
    pp["b_head"] = jnp.concatenate([b_mu2, b_mu1, b_lv2, b_lv1]).reshape(1, -1)

    # --- fused fc_decode_x / fc_decode_y (block-diagonal over [z | u]) ---
    w_dx, b_dx = p["fc_decode_x"]
    w_dy, b_dy = p["fc_decode_y"]
    Nx, Ny = w_dx.shape[0], w_dy.shape[0]
    Wd = jnp.zeros((2 * L, Nx + Ny), f32)
    Wd = Wd.at[:L, :Nx].set(w_dx.T)
    Wd = Wd.at[L:, Nx:].set(w_dy.T)
    pp["W_dec"] = Wd
    pp["b_dec"] = jnp.concatenate([b_dx, b_dy]).reshape(1, -1)

    # --- z_cond chain ---
    Lh = L // 2
    w_yf, b_yf = p["y2z_fc"]
    w_uf, b_uf = p["u_to_z"]
    pp["W_yf"] = w_yf.T                                    # (patch^2/2, L/2)
    pp["b_jy"] = b_yf.reshape(1, -1)
    pp["W_uf"] = w_uf.T                                    # (L, L/2)
    pp["b_ju"] = b_uf.reshape(1, -1)
    w_muc, b_muc = p["mu_u_y_to_z"]
    w_lvc, b_lvc = p["logvar_u_y_to_z"]
    Wzc = jnp.concatenate([w_muc.T, w_lvc.T], axis=1)      # (L, 2L)
    pp["W_zc_y"] = Wzc[:Lh]
    pp["W_zc_u"] = Wzc[Lh:]
    pp["b_zc"] = jnp.concatenate([b_muc, b_lvc]).reshape(1, -1)
    return pp


# ----------------------------------------------------------------------------
# Model forward (mirrors Cond_SRVAE.forward; eps_* replace torch.randn_like)
# ----------------------------------------------------------------------------
def forward(pp, x, y, eps_u, eps_z, *, patch_size):
    B = x.shape[0]
    L = eps_u.shape[1]
    bf = jnp.bfloat16

    x_nhwc = jnp.transpose(x, (0, 2, 3, 1)).astype(bf)
    y_nhwc = jnp.transpose(y, (0, 2, 3, 1)).astype(bf)

    # encoder1 + y_to_z conv trunk, fused along Cout (3 pallas_calls total).
    a = y_nhwc
    for wmat, bias in pp["ybranch"]:
        a = conv_layer(a, wmat, bias, k=3, stride=2, padding=1,
                       act="relu", out_dtype=bf)
    n1 = a.shape[-1] // 2
    h_y = _flatten_nchw(a[..., :n1]).astype(jnp.float32)
    h_yz = _flatten_nchw(a[..., n1:]).astype(jnp.float32)

    # encoder2 (x) trunk.
    a = x_nhwc
    for wmat, bias in pp["enc2"]:
        a = conv_layer(a, wmat, bias, k=3, stride=2, padding=1,
                       act="relu", out_dtype=bf)
    h_x = _flatten_nchw(a).astype(jnp.float32)

    # fused latent block: heads + reparameterization + decode fcs + z_cond.
    stats, samples, dec, zc = latent_block(pp, h_x, h_y, h_yz, eps_z, eps_u, L)
    mu_z, mu_u = stats[:, :L], stats[:, L:2 * L]
    logvar_z, logvar_u = stats[:, 2 * L:3 * L], stats[:, 3 * L:]
    mu_z_uy, logvar_z_uy = zc[:, :L], zc[:, L:]

    Nx = 2 * patch_size ** 2
    hz, hu = dec[:, :Nx], dec[:, Nx:]
    hz_img = jnp.transpose(
        hz.reshape(B, 128, patch_size // 8, patch_size // 8), (0, 2, 3, 1)).astype(bf)
    hu_img = jnp.transpose(
        hu.reshape(B, 128, patch_size // 16, patch_size // 16), (0, 2, 3, 1)).astype(bf)

    x_hat = jnp.transpose(_decoder_stack(pp["dec2"], hz_img), (0, 3, 1, 2))
    y_hat = jnp.transpose(_decoder_stack(pp["dec1"], hu_img), (0, 3, 1, 2))

    return x_hat, y_hat, mu_z, logvar_z, mu_u, logvar_u, mu_z_uy, logvar_z_uy


# ----------------------------------------------------------------------------
# Pure-JAX f32 reference (mirrors the PyTorch module) for validation
# ----------------------------------------------------------------------------
def _ref_conv(x, w, b, stride, padding):
    out = jax.lax.conv_general_dilated(
        x, w, window_strides=(stride, stride),
        padding=[(padding, padding), (padding, padding)],
        dimension_numbers=("NCHW", "OIHW", "NCHW"))
    return out + b.reshape(1, -1, 1, 1)


def _ref_convT(x, w_t, b, stride, padding):
    k = w_t.shape[2]
    w_conv = jnp.transpose(jnp.flip(w_t, (2, 3)), (1, 0, 2, 3))
    out = jax.lax.conv_general_dilated(
        x, w_conv, window_strides=(1, 1),
        padding=[(k - 1 - padding, k - 1 - padding)] * 2,
        lhs_dilation=(stride, stride),
        dimension_numbers=("NCHW", "OIHW", "NCHW"))
    return out + b.reshape(1, -1, 1, 1)


def reference_forward(p, x, y, eps_u, eps_z, *, patch_size):
    B = x.shape[0]
    relu = lambda t: jnp.maximum(t, 0.0)

    def enc(a, layers):
        for w, b in layers:
            a = relu(_ref_conv(a, w, b, 2, 1))
        return a.reshape(B, -1)

    def lin(a, wb):
        w, b = wb
        return a @ w.T + b

    h_y = enc(y, p["enc1"])
    mu_u, logvar_u = lin(h_y, p["fc_mu_1"]), lin(h_y, p["fc_logvar_1"])
    u = mu_u + eps_u * jnp.exp(0.5 * logvar_u)

    h_x = enc(x, p["enc2"])
    mu_z, logvar_z = lin(h_x, p["fc_mu_2"]), lin(h_x, p["fc_logvar_2"])
    z = mu_z + eps_z * jnp.exp(0.5 * logvar_z)

    h_yz = enc(y, p["y2z_conv"])
    joint = jnp.concatenate([lin(h_yz, p["y2z_fc"]), lin(u, p["u_to_z"])], axis=1)
    mu_z_uy = lin(joint, p["mu_u_y_to_z"])
    logvar_z_uy = lin(joint, p["logvar_u_y_to_z"])

    def dec(h, layers, hw):
        a = h.reshape(B, 128, hw, hw)
        (w1, b1), (w2, b2), (w3, b3) = layers
        a = relu(_ref_convT(a, w1, b1, 2, 1))
        a = relu(_ref_convT(a, w2, b2, 2, 1))
        return jax.nn.sigmoid(_ref_convT(a, w3, b3, 2, 1))

    x_hat = dec(lin(z, p["fc_decode_x"]), p["dec2"], patch_size // 8)
    y_hat = dec(lin(u, p["fc_decode_y"]), p["dec1"], patch_size // 16)
    return x_hat, y_hat, mu_z, logvar_z, mu_u, logvar_u, mu_z_uy, logvar_z_uy


# ----------------------------------------------------------------------------
if __name__ == "__main__":
    latent_size = 32
    patch_size = 16          # x: (B,4,16,16), y: (B,4,8,8)
    B = 2

    key = jax.random.PRNGKey(0)
    kp, kx, ky, ke1, ke2 = jax.random.split(key, 5)

    raw_params = init_params(kp, latent_size, patch_size)
    packed_params = prepare_params(raw_params, latent_size, patch_size)

    x = jax.random.normal(kx, (B, 4, patch_size, patch_size), jnp.float32)
    y = jax.random.normal(ky, (B, 4, patch_size // 2, patch_size // 2), jnp.float32)
    eps_u = jax.random.normal(ke1, (B, latent_size), jnp.float32)
    eps_z = jax.random.normal(ke2, (B, latent_size), jnp.float32)

    fwd = jax.jit(functools.partial(forward, patch_size=patch_size))
    outs = jax.block_until_ready(fwd(packed_params, x, y, eps_u, eps_z))

    x_hat, y_hat, mu_z, logvar_z, mu_u, logvar_u, mu_z_uy, logvar_z_uy = outs
    assert x_hat.shape == (B, 4, patch_size, patch_size)
    assert y_hat.shape == (B, 4, patch_size // 2, patch_size // 2)
    for t in (mu_z, logvar_z, mu_u, logvar_u, mu_z_uy, logvar_z_uy):
        assert t.shape == (B, latent_size)
    assert jnp.all(jnp.isfinite(x_hat)) and jnp.all(jnp.isfinite(y_hat))
    assert jnp.all((x_hat >= 0.0) & (x_hat <= 1.0))   # sigmoid output
    assert jnp.all((y_hat >= 0.0) & (y_hat <= 1.0))

    # Validate against the pure-JAX f32 reference (bf16 conv path -> loose tol).
    ref_fn = jax.jit(functools.partial(reference_forward, patch_size=patch_size))
    refs = jax.block_until_ready(ref_fn(raw_params, x, y, eps_u, eps_z))
    names = ("x_hat", "y_hat", "mu_z", "logvar_z", "mu_u", "logvar_u",
             "mu_z_uy", "logvar_z_uy")
    for name, o, r in zip(names, outs, refs):
        assert o.shape == r.shape, name
        err = float(jnp.max(jnp.abs(o.astype(jnp.float32) - r)))
        assert err < 5e-2, f"{name} mismatch vs reference: max abs err {err}"

    print("KERNEL_OK")
</pallas_src>

<mosaic_0001>
module attributes {stable_mosaic.version = 11 : i64} {
  func.func @_matmul_bias_act_kernel(%arg0: i32, %arg1: memref<16x36xbf16, #tpu.memory_space<vmem>>, %arg2: memref<36x64xbf16, #tpu.memory_space<vmem>>, %arg3: memref<1x64xf32, #tpu.memory_space<vmem>>, %arg4: memref<16x64xbf16, #tpu.memory_space<vmem>>) attributes {dimension_semantics = [#tpu.dimension_semantics<parallel>], iteration_bounds = array<i64: 2>, scalar_prefetch = 0 : i64, scratch_operands = 0 : i64, tpu.core_type = #tpu.core_type<tc>, window_params = [{transform_indices = @transform_0, window_bounds = array<i64: 16, 36>}, {pipeline_mode = #tpu.pipeline_mode<synchronous>, transform_indices = @transform_1, window_bounds = array<i64: 36, 64>}, {pipeline_mode = #tpu.pipeline_mode<synchronous>, transform_indices = @transform_2, window_bounds = array<i64: 1, 64>}, {transform_indices = @transform_3, window_bounds = array<i64: 16, 64>}]} {
    %c0 = arith.constant 0 : index
    %c0_0 = arith.constant 0 : index
    %0 = vector.load %arg1[%c0, %c0_0] : memref<16x36xbf16, #tpu.memory_space<vmem>>, vector<16x36xbf16>
    %c0_1 = arith.constant 0 : index
    %c0_2 = arith.constant 0 : index
    %1 = vector.load %arg2[%c0_1, %c0_2] : memref<36x64xbf16, #tpu.memory_space<vmem>>, vector<36x64xbf16>
    %cst = arith.constant dense<0.000000e+00> : vector<16x64xf32>
    %2 = tpu.matmul %0, %1, %cst {dimension_numbers = #tpu.dot_dimension_numbers<[1], [0], [0], [1], [0, 0, 1, 1], [], []>} : vector<16x36xbf16>, vector<36x64xbf16>, vector<16x64xf32> -> vector<16x64xf32>
    %c0_3 = arith.constant 0 : index
    %c0_4 = arith.constant 0 : index
    %3 = vector.load %arg3[%c0_3, %c0_4] : memref<1x64xf32, #tpu.memory_space<vmem>>, vector<1x64xf32>
    %4 = vector.broadcast %3 : vector<1x64xf32> to vector<16x64xf32>
    %5 = arith.addf %2, %4 : vector<16x64xf32>
    %cst_5 = arith.constant 0.000000e+00 : f32
    %6 = vector.broadcast %cst_5 : f32 to vector<16x64xf32>
    %7 = arith.maximumf %5, %6 : vector<16x64xf32>
    %8 = arith.truncf %7 : vector<16x64xf32> to vector<16x64xbf16>
    %c0_6 = arith.constant 0 : index
    %c0_7 = arith.constant 0 : index
    %9 = vector.load %arg4[%c0_6, %c0_7] : memref<16x64xbf16, #tpu.memory_space<vmem>>, vector<16x64xbf16>
    tpu.vector_store %arg4[%c0_6, %c0_7], %8 {strides = array<i32>} : memref<16x64xbf16, #tpu.memory_space<vmem>>, vector<16x64xbf16>,
    return
  }
  func.func @transform_0(%arg0: i32) -> (i32, i32) {
    %c0_i32 = arith.constant 0 : i32
    %c0_i32_0 = arith.constant 0 : i32
    return %arg0, %c0_i32 : i32, i32
  }
  func.func @transform_1(%arg0: i32) -> (i32, i32) {
    %c0_i32 = arith.constant 0 : i32
    %c0_i32_0 = arith.constant 0 : i32
    %c0_i32_1 = arith.constant 0 : i32
    return %c0_i32, %c0_i32_0 : i32, i32
  }
  func.func @transform_2(%arg0: i32) -> (i32, i32) {
    %c0_i32 = arith.constant 0 : i32
    %c0_i32_0 = arith.constant 0 : i32
    %c0_i32_1 = arith.constant 0 : i32
    return %c0_i32, %c0_i32_0 : i32, i32
  }
  func.func @transform_3(%arg0: i32) -> (i32, i32) {
    %c0_i32 = arith.constant 0 : i32
    %c0_i32_0 = arith.constant 0 : i32
    return %arg0, %c0_i32 : i32, i32
  }
}

module attributes {stable_mosaic.version = 11 : i64} {
  func.func @_matmul_bias_act_kernel(%arg0: i32, %arg1: memref<8x576xbf16, #tpu.memory_space<vmem>>, %arg2: memref<576x128xbf16, #tpu.memory_space<vmem>>, %arg3: memref<1x128xf32, #tpu.memory_space<vmem>>, %arg4: memref<8x128xbf16, #tpu.memory_space<vmem>>) attributes {dimension_semantics = [#tpu.dimension_semantics<parallel>], iteration_bounds = array<i64: 1>, scalar_prefetch = 0 : i64, scratch_operands = 0 : i64, tpu.core_type = #tpu.core_type<tc>, window_params = [{transform_indices = @transform_0, window_bounds = array<i64: 8, 576>}, {pipeline_mode = #tpu.pipeline_mode<synchronous>, transform_indices = @transform_1, window_bounds = array<i64: 576, 128>}, {pipeline_mode = #tpu.pipeline_mode<synchronous>, transform_indices = @transform_2, window_bounds = array<i64: 1, 128>}, {transform_indices = @transform_3, window_bounds = array<i64: 8, 128>}]} {
    %c0 = arith.constant 0 : index
    %c0_0 = arith.constant 0 : index
    %0 = vector.load %arg1[%c0, %c0_0] : memref<8x576xbf16, #tpu.memory_space<vmem>>, vector<8x576xbf16>
    %c0_1 = arith.constant 0 : index
    %c0_2 = arith.constant 0 : index
    %1 = vector.load %arg2[%c0_1, %c0_2] : memref<576x128xbf16, #tpu.memory_space<vmem>>, vector<576x128xbf16>
    %cst = arith.constant dense<0.000000e+00> : vector<8x128xf32>
    %2 = tpu.matmul %0, %1, %cst {dimension_numbers = #tpu.dot_dimension_numbers<[1], [0], [0], [1], [0, 0, 1, 1], [], []>} : vector<8x576xbf16>, vector<576x128xbf16>, vector<8x128xf32> -> vector<8x128xf32>
    %c0_3 = arith.constant 0 : index
    %c0_4 = arith.constant 0 : index
    %3 = vector.load %arg3[%c0_3, %c0_4] : memref<1x128xf32, #tpu.memory_space<vmem>>, vector<1x128xf32>
    %4 = vector.broadcast %3 : vector<1x128xf32> to vector<8x128xf32>
    %5 = arith.addf %2, %4 : vector<8x128xf32>
    %cst_5 = arith.constant 0.000000e+00 : f32
    %6 = vector.broadcast %cst_5 : f32 to vector<8x128xf32>
    %7 = arith.maximumf %5, %6 : vector<8x128xf32>
    %8 = arith.truncf %7 : vector<8x128xf32> to vector<8x128xbf16>
    %c0_6 = arith.constant 0 : index
    %c0_7 = arith.constant 0 : index
    %9 = vector.load %arg4[%c0_6, %c0_7] : memref<8x128xbf16, #tpu.memory_space<vmem>>, vector<8x128xbf16>
    tpu.vector_store %arg4[%c0_6, %c0_7], %8 {strides = array<i32>} : memref<8x128xbf16, #tpu.memory_space<vmem>>, vector<8x128xbf16>,
    return
  }
  func.func @transform_0(%arg0: i32) -> (i32, i32) {
    %c0_i32 = arith.constant 0 : i32
    %c0_i32_0 = arith.constant 0 : i32
    return %arg0, %c0_i32 : i32, i32
  }
  func.func @transform_1(%arg0: i32) -> (i32, i32) {
    %c0_i32 = arith.constant 0 : i32
    %c0_i32_0 = arith.constant 0 : i32
    %c0_i32_1 = arith.constant 0 : i32
    return %c0_i32, %c0_i32_0 : i32, i32
  }
  func.func @transform_2(%arg0: i32) -> (i32, i32) {
    %c0_i32 = arith.constant 0 : i32
    %c0_i32_0 = arith.constant 0 : i32
    %c0_i32_1 = arith.constant 0 : i32
    return %c0_i32, %c0_i32_0 : i32, i32
  }
  func.func @transform_3(%arg0: i32) -> (i32, i32) {
    %c0_i32 = arith.constant 0 : i32
    %c0_i32_0 = arith.constant 0 : i32
    return %arg0, %c0_i32 : i32, i32
  }
}

module attributes {stable_mosaic.version = 11 : i64} {
  func.func @_matmul_bias_act_kernel(%arg0: i32, %arg1: memref<8x1152xbf16, #tpu.memory_space<vmem>>, %arg2: memref<1152x256xbf16, #tpu.memory_space<vmem>>, %arg3: memref<1x256xf32, #tpu.memory_space<vmem>>, %arg4: memref<8x256xbf16, #tpu.memory_space<vmem>>) attributes {dimension_semantics = [#tpu.dimension_semantics<parallel>], iteration_bounds = array<i64: 1>, scalar_prefetch = 0 : i64, scratch_operands = 0 : i64, tpu.core_type = #tpu.core_type<tc>, window_params = [{transform_indices = @transform_0, window_bounds = array<i64: 8, 1152>}, {pipeline_mode = #tpu.pipeline_mode<synchronous>, transform_indices = @transform_1, window_bounds = array<i64: 1152, 256>}, {pipeline_mode = #tpu.pipeline_mode<synchronous>, transform_indices = @transform_2, window_bounds = array<i64: 1, 256>}, {transform_indices = @transform_3, window_bounds = array<i64: 8, 256>}]} {
    %c0 = arith.constant 0 : index
    %c0_0 = arith.constant 0 : index
    %0 = vector.load %arg1[%c0, %c0_0] : memref<8x1152xbf16, #tpu.memory_space<vmem>>, vector<8x1152xbf16>
    %c0_1 = arith.constant 0 : index
    %c0_2 = arith.constant 0 : index
    %1 = vector.load %arg2[%c0_1, %c0_2] : memref<1152x256xbf16, #tpu.memory_space<vmem>>, vector<1152x256xbf16>
    %cst = arith.constant dense<0.000000e+00> : vector<8x256xf32>
    %2 = tpu.matmul %0, %1, %cst {dimension_numbers = #tpu.dot_dimension_numbers<[1], [0], [0], [1], [0, 0, 1, 1], [], []>} : vector<8x1152xbf16>, vector<1152x256xbf16>, vector<8x256xf32> -> vector<8x256xf32>
    %c0_3 = arith.constant 0 : index
    %c0_4 = arith.constant 0 : index
    %3 = vector.load %arg3[%c0_3, %c0_4] : memref<1x256xf32, #tpu.memory_space<vmem>>, vector<1x256xf32>
    %4 = vector.broadcast %3 : vector<1x256xf32> to vector<8x256xf32>
    %5 = arith.addf %2, %4 : vector<8x256xf32>
    %cst_5 = arith.constant 0.000000e+00 : f32
    %6 = vector.broadcast %cst_5 : f32 to vector<8x256xf32>
    %7 = arith.maximumf %5, %6 : vector<8x256xf32>
    %8 = arith.truncf %7 : vector<8x256xf32> to vector<8x256xbf16>
    %c0_6 = arith.constant 0 : index
    %c0_7 = arith.constant 0 : index
    %9 = vector.load %arg4[%c0_6, %c0_7] : memref<8x256xbf16, #tpu.memory_space<vmem>>, vector<8x256xbf16>
    tpu.vector_store %arg4[%c0_6, %c0_7], %8 {strides = array<i32>} : memref<8x256xbf16, #tpu.memory_space<vmem>>, vector<8x256xbf16>,
    return
  }
  func.func @transform_0(%arg0: i32) -> (i32, i32) {
    %c0_i32 = arith.constant 0 : i32
    %c0_i32_0 = arith.constant 0 : i32
    return %arg0, %c0_i32 : i32, i32
  }
  func.func @transform_1(%arg0: i32) -> (i32, i32) {
    %c0_i32 = arith.constant 0 : i32
    %c0_i32_0 = arith.constant 0 : i32
    %c0_i32_1 = arith.constant 0 : i32
    return %c0_i32, %c0_i32_0 : i32, i32
  }
  func.func @transform_2(%arg0: i32) -> (i32, i32) {
    %c0_i32 = arith.constant 0 : i32
    %c0_i32_0 = arith.constant 0 : i32
    %c0_i32_1 = arith.constant 0 : i32
    return %c0_i32, %c0_i32_0 : i32, i32
  }
  func.func @transform_3(%arg0: i32) -> (i32, i32) {
    %c0_i32 = arith.constant 0 : i32
    %c0_i32_0 = arith.constant 0 : i32
    return %arg0, %c0_i32 : i32, i32
  }
}

module attributes {stable_mosaic.version = 11 : i64} {
  func.func @_matmul_bias_act_kernel(%arg0: i32, %arg1: memref<64x36xbf16, #tpu.memory_space<vmem>>, %arg2: memref<36x32xbf16, #tpu.memory_space<vmem>>, %arg3: memref<1x32xf32, #tpu.memory_space<vmem>>, %arg4: memref<64x32xbf16, #tpu.memory_space<vmem>>) attributes {dimension_semantics = [#tpu.dimension_semantics<parallel>], iteration_bounds = array<i64: 2>, scalar_prefetch = 0 : i64, scratch_operands = 0 : i64, tpu.core_type = #tpu.core_type<tc>, window_params = [{transform_indices = @transform_0, window_bounds = array<i64: 64, 36>}, {pipeline_mode = #tpu.pipeline_mode<synchronous>, transform_indices = @transform_1, window_bounds = array<i64: 36, 32>}, {pipeline_mode = #tpu.pipeline_mode<synchronous>, transform_indices = @transform_2, window_bounds = array<i64: 1, 32>}, {transform_indices = @transform_3, window_bounds = array<i64: 64, 32>}]} {
    %c0 = arith.constant 0 : index
    %c0_0 = arith.constant 0 : index
    %0 = vector.load %arg1[%c0, %c0_0] : memref<64x36xbf16, #tpu.memory_space<vmem>>, vector<64x36xbf16>
    %c0_1 = arith.constant 0 : index
    %c0_2 = arith.constant 0 : index
    %1 = vector.load %arg2[%c0_1, %c0_2] : memref<36x32xbf16, #tpu.memory_space<vmem>>, vector<36x32xbf16>
    %cst = arith.constant dense<0.000000e+00> : vector<64x32xf32>
    %2 = tpu.matmul %0, %1, %cst {dimension_numbers = #tpu.dot_dimension_numbers<[1], [0], [0], [1], [0, 0, 1, 1], [], []>} : vector<64x36xbf16>, vector<36x32xbf16>, vector<64x32xf32> -> vector<64x32xf32>
    %c0_3 = arith.constant 0 : index
    %c0_4 = arith.constant 0 : index
    %3 = vector.load %arg3[%c0_3, %c0_4] : memref<1x32xf32, #tpu.memory_space<vmem>>, vector<1x32xf32>
    %4 = vector.broadcast %3 : vector<1x32xf32> to vector<64x32xf32>
    %5 = arith.addf %2, %4 : vector<64x32xf32>
    %cst_5 = arith.constant 0.000000e+00 : f32
    %6 = vector.broadcast %cst_5 : f32 to vector<64x32xf32>
    %7 = arith.maximumf %5, %6 : vector<64x32xf32>
    %8 = arith.truncf %7 : vector<64x32xf32> to vector<64x32xbf16>
    %c0_6 = arith.constant 0 : index
    %c0_7 = arith.constant 0 : index
    %9 = vector.load %arg4[%c0_6, %c0_7] : memref<64x32xbf16, #tpu.memory_space<vmem>>, vector<64x32xbf16>
    tpu.vector_store %arg4[%c0_6, %c0_7], %8 {strides = array<i32>} : memref<64x32xbf16, #tpu.memory_space<vmem>>, vector<64x32xbf16>,
    return
  }
  func.func @transform_0(%arg0: i32) -> (i32, i32) {
    %c0_i32 = arith.constant 0 : i32
    %c0_i32_0 = arith.constant 0 : i32
    return %arg0, %c0_i32 : i32, i32
  }
  func.func @transform_1(%arg0: i32) -> (i32, i32) {
    %c0_i32 = arith.constant 0 : i32
    %c0_i32_0 = arith.constant 0 : i32
    %c0_i32_1 = arith.constant 0 : i32
    return %c0_i32, %c0_i32_0 : i32, i32
  }
  func.func @transform_2(%arg0: i32) -> (i32, i32) {
    %c0_i32 = arith.constant 0 : i32
    %c0_i32_0 = arith.constant 0 : i32
    %c0_i32_1 = arith.constant 0 : i32
    return %c0_i32, %c0_i32_0 : i32, i32
  }
  func.func @transform_3(%arg0: i32) -> (i32, i32) {
    %c0_i32 = arith.constant 0 : i32
    %c0_i32_0 = arith.constant 0 : i32
    return %arg0, %c0_i32 : i32, i32
  }
}

module attributes {stable_mosaic.version = 11 : i64} {
  func.func @_matmul_bias_act_kernel(%arg0: i32, %arg1: memref<16x288xbf16, #tpu.memory_space<vmem>>, %arg2: memref<288x64xbf16, #tpu.memory_space<vmem>>, %arg3: memref<1x64xf32, #tpu.memory_space<vmem>>, %arg4: memref<16x64xbf16, #tpu.memory_space<vmem>>) attributes {dimension_semantics = [#tpu.dimension_semantics<parallel>], iteration_bounds = array<i64: 2>, scalar_prefetch = 0 : i64, scratch_operands = 0 : i64, tpu.core_type = #tpu.core_type<tc>, window_params = [{transform_indices = @transform_0, window_bounds = array<i64: 16, 288>}, {pipeline_mode = #tpu.pipeline_mode<synchronous>, transform_indices = @transform_1, window_bounds = array<i64: 288, 64>}, {pipeline_mode = #tpu.pipeline_mode<synchronous>, transform_indices = @transform_2, window_bounds = array<i64: 1, 64>}, {transform_indices = @transform_3, window_bounds = array<i64: 16, 64>}]} {
    %c0 = arith.constant 0 : index
    %c0_0 = arith.constant 0 : index
    %0 = vector.load %arg1[%c0, %c0_0] : memref<16x288xbf16, #tpu.memory_space<vmem>>, vector<16x288xbf16>
    %c0_1 = arith.constant 0 : index
    %c0_2 = arith.constant 0 : index
    %1 = vector.load %arg2[%c0_1, %c0_2] : memref<288x64xbf16, #tpu.memory_space<vmem>>, vector<288x64xbf16>
    %cst = arith.constant dense<0.000000e+00> : vector<16x64xf32>
    %2 = tpu.matmul %0, %1, %cst {dimension_numbers = #tpu.dot_dimension_numbers<[1], [0], [0], [1], [0, 0, 1, 1], [], []>} : vector<16x288xbf16>, vector<288x64xbf16>, vector<16x64xf32> -> vector<16x64xf32>
    %c0_3 = arith.constant 0 : index
    %c0_4 = arith.constant 0 : index
    %3 = vector.load %arg3[%c0_3, %c0_4] : memref<1x64xf32, #tpu.memory_space<vmem>>, vector<1x64xf32>
    %4 = vector.broadcast %3 : vector<1x64xf32> to vector<16x64xf32>
    %5 = arith.addf %2, %4 : vector<16x64xf32>
    %cst_5 = arith.constant 0.000000e+00 : f32
    %6 = vector.broadcast %cst_5 : f32 to vector<16x64xf32>
    %7 = arith.maximumf %5, %6 : vector<16x64xf32>
    %8 = arith.truncf %7 : vector<16x64xf32> to vector<16x64xbf16>
    %c0_6 = arith.constant 0 : index
    %c0_7 = arith.constant 0 : index
    %9 = vector.load %arg4[%c0_6, %c0_7] : memref<16x64xbf16, #tpu.memory_space<vmem>>, vector<16x64xbf16>
    tpu.vector_store %arg4[%c0_6, %c0_7], %8 {strides = array<i32>} : memref<16x64xbf16, #tpu.memory_space<vmem>>, vector<16x64xbf16>,
    return
  }
  func.func @transform_0(%arg0: i32) -> (i32, i32) {
    %c0_i32 = arith.constant 0 : i32
    %c0_i32_0 = arith.constant 0 : i32
    return %arg0, %c0_i32 : i32, i32
  }
  func.func @transform_1(%arg0: i32) -> (i32, i32) {
    %c0_i32 = arith.constant 0 : i32
    %c0_i32_0 = arith.constant 0 : i32
    %c0_i32_1 = arith.constant 0 : i32
    return %c0_i32, %c0_i32_0 : i32, i32
  }
  func.func @transform_2(%arg0: i32) -> (i32, i32) {
    %c0_i32 = arith.constant 0 : i32
    %c0_i32_0 = arith.constant 0 : i32
    %c0_i32_1 = arith.constant 0 : i32
    return %c0_i32, %c0_i32_0 : i32, i32
  }
  func.func @transform_3(%arg0: i32) -> (i32, i32) {
    %c0_i32 = arith.constant 0 : i32
    %c0_i32_0 = arith.constant 0 : i32
    return %arg0, %c0_i32 : i32, i32
  }
}

module attributes {stable_mosaic.version = 11 : i64} {
  func.func @_latent_kernel(%arg0: i32, %arg1: memref<8x640xf32, #tpu.memory_space<vmem>>, %arg2: memref<8x128xf32, #tpu.memory_space<vmem>>, %arg3: memref<8x64xf32, #tpu.memory_space<vmem>>, %arg4: memref<640x128xf32, #tpu.memory_space<vmem>>, %arg5: memref<1x128xf32, #tpu.memory_space<vmem>>, %arg6: memref<64x640xf32, #tpu.memory_space<vmem>>, %arg7: memref<1x640xf32, #tpu.memory_space<vmem>>, %arg8: memref<128x16xf32, #tpu.memory_space<vmem>>, %arg9: memref<1x16xf32, #tpu.memory_space<vmem>>, %arg10: memref<32x16xf32, #tpu.memory_space<vmem>>, %arg11: memref<1x16xf32, #tpu.memory_space<vmem>>, %arg12: memref<16x64xf32, #tpu.memory_space<vmem>>, %arg13: memref<16x64xf32, #tpu.memory_space<vmem>>, %arg14: memref<1x64xf32, #tpu.memory_space<vmem>>, %arg15: memref<8x128xf32, #tpu.memory_space<vmem>>, %arg16: memref<8x64xf32, #tpu.memory_space<vmem>>, %arg17: memref<8x640xf32, #tpu.memory_space<vmem>>, %arg18: memref<8x64xf32, #tpu.memory_space<vmem>>) attributes {dimension_semantics = [#tpu.dimension_semantics<arbitrary>], iteration_bounds = array<i64: 1>, scalar_prefetch = 0 : i64, scratch_operands = 0 : i64, tpu.core_type = #tpu.core_type<tc>, window_params = [{pipeline_mode = #tpu.pipeline_mode<synchronous>, transform_indices = @transform_0, window_bounds = array<i64: 8, 640>}, {pipeline_mode = #tpu.pipeline_mode<synchronous>, transform_indices = @transform_1, window_bounds = array<i64: 8, 128>}, {pipeline_mode = #tpu.pipeline_mode<synchronous>, transform_indices = @transform_2, window_bounds = array<i64: 8, 64>}, {pipeline_mode = #tpu.pipeline_mode<synchronous>, transform_indices = @transform_3, window_bounds = array<i64: 640, 128>}, {pipeline_mode = #tpu.pipeline_mode<synchronous>, transform_indices = @transform_4, window_bounds = array<i64: 1, 128>}, {pipeline_mode = #tpu.pipeline_mode<synchronous>, transform_indices = @transform_5, window_bounds = array<i64: 64, 640>}, {pipeline_mode = #tpu.pipeline_mode<synchronous>, transform_indices = @transform_6, window_bounds = array<i64: 1, 640>}, {pipeline_mode = #tpu.pipeline_mode<synchronous>, transform_indices = @transform_7, window_bounds = array<i64: 128, 16>}, {pipeline_mode = #tpu.pipeline_mode<synchronous>, transform_indices = @transform_8, window_bounds = array<i64: 1, 16>}, {pipeline_mode = #tpu.pipeline_mode<synchronous>, transform_indices = @transform_9, window_bounds = array<i64: 32, 16>}, {pipeline_mode = #tpu.pipeline_mode<synchronous>, transform_indices = @transform_10, window_bounds = array<i64: 1, 16>}, {pipeline_mode = #tpu.pipeline_mode<synchronous>, transform_indices = @transform_11, window_bounds = array<i64: 16, 64>}, {pipeline_mode = #tpu.pipeline_mode<synchronous>, transform_indices = @transform_12, window_bounds = array<i64: 16, 64>}, {pipeline_mode = #tpu.pipeline_mode<synchronous>, transform_indices = @transform_13, window_bounds = array<i64: 1, 64>}, {pipeline_mode = #tpu.pipeline_mode<synchronous>, transform_indices = @transform_14, window_bounds = array<i64: 8, 128>}, {pipeline_mode = #tpu.pipeline_mode<synchronous>, transform_indices = @transform_15, window_bounds = array<i64: 8, 64>}, {pipeline_mode = #tpu.pipeline_mode<synchronous>, transform_indices = @transform_16, window_bounds = array<i64: 8, 640>}, {pipeline_mode = #tpu.pipeline_mode<synchronous>, transform_indices = @transform_17, window_bounds = array<i64: 8, 64>}]} {
    %c0 = arith.constant 0 : index
    %c0_0 = arith.constant 0 : index
    %0 = vector.load %arg1[%c0, %c0_0] : memref<8x640xf32, #tpu.memory_space<vmem>>, vector<8x640xf32>
    %c0_1 = arith.constant 0 : index
    %c0_2 = arith.constant 0 : index
    %1 = vector.load %arg4[%c0_1, %c0_2] : memref<640x128xf32, #tpu.memory_space<vmem>>, vector<640x128xf32>
    %cst = arith.constant dense<0.000000e+00> : vector<8x128xf32>
    %2 = tpu.matmul %0, %1, %cst {dimension_numbers = #tpu.dot_dimension_numbers<[1], [0], [0], [1], [0, 0, 1, 1], [], []>} : vector<8x640xf32>, vector<640x128xf32>, vector<8x128xf32> -> vector<8x128xf32>
    %c0_3 = arith.constant 0 : index
    %c0_4 = arith.constant 0 : index
    %3 = vector.load %arg5[%c0_3, %c0_4] : memref<1x128xf32, #tpu.memory_space<vmem>>, vector<1x128xf32>
    %4 = vector.broadcast %3 : vector<1x128xf32> to vector<8x128xf32>
    %5 = arith.addf %2, %4 : vector<8x128xf32>
    %c0_5 = arith.constant 0 : index
    %c0_6 = arith.constant 0 : index
    %6 = vector.load %arg15[%c0_5, %c0_6] : memref<8x128xf32, #tpu.memory_space<vmem>>, vector<8x128xf32>
    tpu.vector_store %arg15[%c0_5, %c0_6], %5 {strides = array<i32>} : memref<8x128xf32, #tpu.memory_space<vmem>>, vector<8x128xf32>,
    %7 = vector.extract_strided_slice %5 {offsets = [0, 0], sizes = [8, 64], strides = [1, 1]} : vector<8x128xf32> to vector<8x64xf32>
    %8 = vector.extract_strided_slice %5 {offsets = [0, 64], sizes = [8, 64], strides = [1, 1]} : vector<8x128xf32> to vector<8x64xf32>
    %c0_7 = arith.constant 0 : index
    %c0_8 = arith.constant 0 : index
    %9 = vector.load %arg3[%c0_7, %c0_8] : memref<8x64xf32, #tpu.memory_space<vmem>>, vector<8x64xf32>
    %cst_9 = arith.constant 5.000000e-01 : f32
    %10 = vector.broadcast %cst_9 : f32 to vector<8x64xf32>
    %11 = arith.mulf %10, %8 : vector<8x64xf32>
    %12 = math.exp %11 : vector<8x64xf32>
    %13 = arith.mulf %9, %12 : vector<8x64xf32>
    %14 = arith.addf %7, %13 : vector<8x64xf32>
    %c0_10 = arith.constant 0 : index
    %c0_11 = arith.constant 0 : index
    %15 = vector.load %arg16[%c0_10, %c0_11] : memref<8x64xf32, #tpu.memory_space<vmem>>, vector<8x64xf32>
    tpu.vector_store %arg16[%c0_10, %c0_11], %14 {strides = array<i32>} : memref<8x64xf32, #tpu.memory_space<vmem>>, vector<8x64xf32>,
    %c0_12 = arith.constant 0 : index
    %c0_13 = arith.constant 0 : index
    %16 = vector.load %arg6[%c0_12, %c0_13] : memref<64x640xf32, #tpu.memory_space<vmem>>, vector<64x640xf32>
    %cst_14 = arith.constant dense<0.000000e+00> : vector<8x640xf32>
    %17 = tpu.matmul %14, %16, %cst_14 {dimension_numbers = #tpu.dot_dimension_numbers<[1], [0], [0], [1], [0, 0, 1, 1], [], []>} : vector<8x64xf32>, vector<64x640xf32>, vector<8x640xf32> -> vector<8x640xf32>
    %c0_15 = arith.constant 0 : index
    %c0_16 = arith.constant 0 : index
    %18 = vector.load %arg7[%c0_15, %c0_16] : memref<1x640xf32, #tpu.memory_space<vmem>>, vector<1x640xf32>
    %19 = vector.broadcast %18 : vector<1x640xf32> to vector<8x640xf32>
    %20 = arith.addf %17, %19 : vector<8x640xf32>
    %c0_17 = arith.constant 0 : index
    %c0_18 = arith.constant 0 : index
    %21 = vector.load %arg17[%c0_17, %c0_18] : memref<8x640xf32, #tpu.memory_space<vmem>>, vector<8x640xf32>
    tpu.vector_store %arg17[%c0_17, %c0_18], %20 {strides = array<i32>} : memref<8x640xf32, #tpu.memory_space<vmem>>, vector<8x640xf32>,
    %22 = vector.extract_strided_slice %14 {offsets = [0, 32], sizes = [8, 32], strides = [1, 1]} : vector<8x64xf32> to vector<8x32xf32>
    %c0_19 = arith.constant 0 : index
    %c0_20 = arith.constant 0 : index
    %23 = vector.load %arg2[%c0_19, %c0_20] : memref<8x128xf32, #tpu.memory_space<vmem>>, vector<8x128xf32>
    %c0_21 = arith.constant 0 : index
    %c0_22 = arith.constant 0 : index
    %24 = vector.load %arg8[%c0_21, %c0_22] : memref<128x16xf32, #tpu.memory_space<vmem>>, vector<128x16xf32>
    %cst_23 = arith.constant dense<0.000000e+00> : vector<8x16xf32>
    %25 = tpu.matmul %23, %24, %cst_23 {dimension_numbers = #tpu.dot_dimension_numbers<[1], [0], [0], [1], [0, 0, 1, 1], [], []>} : vector<8x128xf32>, vector<128x16xf32>, vector<8x16xf32> -> vector<8x16xf32>
    %c0_24 = arith.constant 0 : index
    %c0_25 = arith.constant 0 : index
    %26 = vector.load %arg9[%c0_24, %c0_25] : memref<1x16xf32, #tpu.memory_space<vmem>>, vector<1x16xf32>
    %27 = vector.broadcast %26 : vector<1x16xf32> to vector<8x16xf32>
    %28 = arith.addf %25, %27 : vector<8x16xf32>
    %c0_26 = arith.constant 0 : index
    %c0_27 = arith.constant 0 : index
    %29 = vector.load %arg10[%c0_26, %c0_27] : memref<32x16xf32, #tpu.memory_space<vmem>>, vector<32x16xf32>
    %cst_28 = arith.constant dense<0.000000e+00> : vector<8x16xf32>
    %30 = tpu.matmul %22, %29, %cst_28 {dimension_numbers = #tpu.dot_dimension_numbers<[1], [0], [0], [1], [0, 0, 1, 1], [], []>} : vector<8x32xf32>, vector<32x16xf32>, vector<8x16xf32> -> vector<8x16xf32>
    %c0_29 = arith.constant 0 : index
    %c0_30 = arith.constant 0 : index
    %31 = vector.load %arg11[%c0_29, %c0_30] : memref<1x16xf32, #tpu.memory_space<vmem>>, vector<1x16xf32>
    %32 = vector.broadcast %31 : vector<1x16xf32> to vector<8x16xf32>
    %33 = arith.addf %30, %32 : vector<8x16xf32>
    %c0_31 = arith.constant 0 : index
    %c0_32 = arith.constant 0 : index
    %34 = vector.load %arg12[%c0_31, %c0_32] : memref<16x64xf32, #tpu.memory_space<vmem>>, vector<16x64xf32>
    %cst_33 = arith.constant dense<0.000000e+00> : vector<8x64xf32>
    %35 = tpu.matmul %28, %34, %cst_33 {dimension_numbers = #tpu.dot_dimension_numbers<[1], [0], [0], [1], [0, 0, 1, 1], [], []>} : vector<8x16xf32>, vector<16x64xf32>, vector<8x64xf32> -> vector<8x64xf32>
    %c0_34 = arith.constant 0 : index
    %c0_35 = arith.constant 0 : index
    %36 = vector.load %arg13[%c0_34, %c0_35] : memref<16x64xf32, #tpu.memory_space<vmem>>, vector<16x64xf32>
    %cst_36 = arith.constant dense<0.000000e+00> : vector<8x64xf32>
    %37 = tpu.matmul %33, %36, %cst_36 {dimension_numbers = #tpu.dot_dimension_numbers<[1], [0], [0], [1], [0, 0, 1, 1], [], []>} : vector<8x16xf32>, vector<16x64xf32>, vector<8x64xf32> -> vector<8x64xf32>
    %38 = arith.addf %35, %37 : vector<8x64xf32>
    %c0_37 = arith.constant 0 : index
    %c0_38 = arith.constant 0 : index
    %39 = vector.load %arg14[%c0_37, %c0_38] : memref<1x64xf32, #tpu.memory_space<vmem>>, vector<1x64xf32>
    %40 = vector.broadcast %39 : vector<1x64xf32> to vector<8x64xf32>
    %41 = arith.addf %38, %40 : vector<8x64xf32>
    %c0_39 = arith.constant 0 : index
    %c0_40 = arith.constant 0 : index
    %42 = vector.load %arg18[%c0_39, %c0_40] : memref<8x64xf32, #tpu.memory_space<vmem>>, vector<8x64xf32>
    tpu.vector_store %arg18[%c0_39, %c0_40], %41 {strides = array<i32>} : memref<8x64xf32, #tpu.memory_space<vmem>>, vector<8x64xf32>,
    return
  }
  func.func @transform_0(%arg0: i32) -> (i32, i32) {
    %c0_i32 = arith.constant 0 : i32
    %c0_i32_0 = arith.constant 0 : i32
    %c0_i32_1 = arith.constant 0 : i32
    return %c0_i32, %c0_i32_0 : i32, i32
  }
  func.func @transform_1(%arg0: i32) -> (i32, i32) {
    %c0_i32 = arith.constant 0 : i32
    %c0_i32_0 = arith.constant 0 : i32
    %c0_i32_1 = arith.constant 0 : i32
    return %c0_i32, %c0_i32_0 : i32, i32
  }
  func.func @transform_2(%arg0: i32) -> (i32, i32) {
    %c0_i32 = arith.constant 0 : i32
    %c0_i32_0 = arith.constant 0 : i32
    %c0_i32_1 = arith.constant 0 : i32
    return %c0_i32, %c0_i32_0 : i32, i32
  }
  func.func @transform_3(%arg0: i32) -> (i32, i32) {
    %c0_i32 = arith.constant 0 : i32
    %c0_i32_0 = arith.constant 0 : i32
    %c0_i32_1 = arith.constant 0 : i32
    return %c0_i32, %c0_i32_0 : i32, i32
  }
  func.func @transform_4(%arg0: i32) -> (i32, i32) {
    %c0_i32 = arith.constant 0 : i32
    %c0_i32_0 = arith.constant 0 : i32
    %c0_i32_1 = arith.constant 0 : i32
    return %c0_i32, %c0_i32_0 : i32, i32
  }
  func.func @transform_5(%arg0: i32) -> (i32, i32) {
    %c0_i32 = arith.constant 0 : i32
    %c0_i32_0 = arith.constant 0 : i32
    %c0_i32_1 = arith.constant 0 : i32
    return %c0_i32, %c0_i32_0 : i32, i32
  }
  func.func @transform_6(%arg0: i32) -> (i32, i32) {
    %c0_i32 = arith.constant 0 : i32
    %c0_i32_0 = arith.constant 0 : i32
    %c0_i32_1 = arith.constant 0 : i32
    return %c0_i32, %c0_i32_0 : i32, i32
  }
  func.func @transform_7(%arg0: i32) -> (i32, i32) {
    %c0_i32 = arith.constant 0 : i32
    %c0_i32_0 = arith.constant 0 : i32
    %c0_i32_1 = arith.constant 0 : i32
    return %c0_i32, %c0_i32_0 : i32, i32
  }
  func.func @transform_8(%arg0: i32) -> (i32, i32) {
    %c0_i32 = arith.constant 0 : i32
    %c0_i32_0 = arith.constant 0 : i32
    %c0_i32_1 = arith.constant 0 : i32
    return %c0_i32, %c0_i32_0 : i32, i32
  }
  func.func @transform_9(%arg0: i32) -> (i32, i32) {
    %c0_i32 = arith.constant 0 : i32
    %c0_i32_0 = arith.constant 0 : i32
    %c0_i32_1 = arith.constant 0 : i32
    return %c0_i32, %c0_i32_0 : i32, i32
  }
  func.func @transform_10(%arg0: i32) -> (i32, i32) {
    %c0_i32 = arith.constant 0 : i32
    %c0_i32_0 = arith.constant 0 : i32
    %c0_i32_1 = arith.constant 0 : i32
    return %c0_i32, %c0_i32_0 : i32, i32
  }
  func.func @transform_11(%arg0: i32) -> (i32, i32) {
    %c0_i32 = arith.constant 0 : i32
    %c0_i32_0 = arith.constant 0 : i32
    %c0_i32_1 = arith.constant 0 : i32
    return %c0_i32, %c0_i32_0 : i32, i32
  }
  func.func @transform_12(%arg0: i32) -> (i32, i32) {
    %c0_i32 = arith.constant 0 : i32
    %c0_i32_0 = arith.constant 0 : i32
    %c0_i32_1 = arith.constant 0 : i32
    return %c0_i32, %c0_i32_0 : i32, i32
  }
  func.func @transform_13(%arg0: i32) -> (i32, i32) {
    %c0_i32 = arith.constant 0 : i32
    %c0_i32_0 = arith.constant 0 : i32
    %c0_i32_1 = arith.constant 0 : i32
    return %c0_i32, %c0_i32_0 : i32, i32
  }
  func.func @transform_14(%arg0: i32) -> (i32, i32) {
    %c0_i32 = arith.constant 0 : i32
    %c0_i32_0 = arith.constant 0 : i32
    %c0_i32_1 = arith.constant 0 : i32
    return %c0_i32, %c0_i32_0 : i32, i32
  }
  func.func @transform_15(%arg0: i32) -> (i32, i32) {
    %c0_i32 = arith.constant 0 : i32
    %c0_i32_0 = arith.constant 0 : i32
    %c0_i32_1 = arith.constant 0 : i32
    return %c0_i32, %c0_i32_0 : i32, i32
  }
  func.func @transform_16(%arg0: i32) -> (i32, i32) {
    %c0_i32 = arith.constant 0 : i32
    %c0_i32_0 = arith.constant 0 : i32
    %c0_i32_1 = arith.constant 0 : i32
    return %c0_i32, %c0_i32_0 : i32, i32
  }
  func.func @transform_17(%arg0: i32) -> (i32, i32) {
    %c0_i32 = arith.constant 0 : i32
    %c0_i32_0 = arith.constant 0 : i32
    %c0_i32_1 = arith.constant 0 : i32
    return %c0_i32, %c0_i32_0 : i32, i32
  }
}

module attributes {stable_mosaic.version = 11 : i64} {
  func.func @_matmul_bias_act_kernel(%arg0: i32, %arg1: memref<8x512xbf16, #tpu.memory_space<vmem>>, %arg2: memref<512x256xbf16, #tpu.memory_space<vmem>>, %arg3: memref<1x256xf32, #tpu.memory_space<vmem>>, %arg4: memref<8x256xbf16, #tpu.memory_space<vmem>>) attributes {dimension_semantics = [#tpu.dimension_semantics<parallel>], iteration_bounds = array<i64: 1>, scalar_prefetch = 0 : i64, scratch_operands = 0 : i64, tpu.core_type = #tpu.core_type<tc>, window_params = [{transform_indices = @transform_0, window_bounds = array<i64: 8, 512>}, {pipeline_mode = #tpu.pipeline_mode<synchronous>, transform_indices = @transform_1, window_bounds = array<i64: 512, 256>}, {pipeline_mode = #tpu.pipeline_mode<synchronous>, transform_indices = @transform_2, window_bounds = array<i64: 1, 256>}, {transform_indices = @transform_3, window_bounds = array<i64: 8, 256>}]} {
    %c0 = arith.constant 0 : index
    %c0_0 = arith.constant 0 : index
    %0 = vector.load %arg1[%c0, %c0_0] : memref<8x512xbf16, #tpu.memory_space<vmem>>, vector<8x512xbf16>
    %c0_1 = arith.constant 0 : index
    %c0_2 = arith.constant 0 : index
    %1 = vector.load %arg2[%c0_1, %c0_2] : memref<512x256xbf16, #tpu.memory_space<vmem>>, vector<512x256xbf16>
    %cst = arith.constant dense<0.000000e+00> : vector<8x256xf32>
    %2 = tpu.matmul %0, %1, %cst {dimension_numbers = #tpu.dot_dimension_numbers<[1], [0], [0], [1], [0, 0, 1, 1], [], []>} : vector<8x512xbf16>, vector<512x256xbf16>, vector<8x256xf32> -> vector<8x256xf32>
    %c0_3 = arith.constant 0 : index
    %c0_4 = arith.constant 0 : index
    %3 = vector.load %arg3[%c0_3, %c0_4] : memref<1x256xf32, #tpu.memory_space<vmem>>, vector<1x256xf32>
    %4 = vector.broadcast %3 : vector<1x256xf32> to vector<8x256xf32>
    %5 = arith.addf %2, %4 : vector<8x256xf32>
    %cst_5 = arith.constant 0.000000e+00 : f32
    %6 = vector.broadcast %cst_5 : f32 to vector<8x256xf32>
    %7 = arith.maximumf %5, %6 : vector<8x256xf32>
    %8 = arith.truncf %7 : vector<8x256xf32> to vector<8x256xbf16>
    %c0_6 = arith.constant 0 : index
    %c0_7 = arith.constant 0 : index
    %9 = vector.load %arg4[%c0_6, %c0_7] : memref<8x256xbf16, #tpu.memory_space<vmem>>, vector<8x256xbf16>
    tpu.vector_store %arg4[%c0_6, %c0_7], %8 {strides = array<i32>} : memref<8x256xbf16, #tpu.memory_space<vmem>>, vector<8x256xbf16>,
    return
  }
  func.func @transform_0(%arg0: i32) -> (i32, i32) {
    %c0_i32 = arith.constant 0 : i32
    %c0_i32_0 = arith.constant 0 : i32
    return %arg0, %c0_i32 : i32, i32
  }
  func.func @transform_1(%arg0: i32) -> (i32, i32) {
    %c0_i32 = arith.constant 0 : i32
    %c0_i32_0 = arith.constant 0 : i32
    %c0_i32_1 = arith.constant 0 : i32
    return %c0_i32, %c0_i32_0 : i32, i32
  }
  func.func @transform_2(%arg0: i32) -> (i32, i32) {
    %c0_i32 = arith.constant 0 : i32
    %c0_i32_0 = arith.constant 0 : i32
    %c0_i32_1 = arith.constant 0 : i32
    return %c0_i32, %c0_i32_0 : i32, i32
  }
  func.func @transform_3(%arg0: i32) -> (i32, i32) {
    %c0_i32 = arith.constant 0 : i32
    %c0_i32_0 = arith.constant 0 : i32
    return %arg0, %c0_i32 : i32, i32
  }
}

module attributes {stable_mosaic.version = 11 : i64} {
  func.func @_matmul_bias_act_kernel(%arg0: i32, %arg1: memref<16x576xbf16, #tpu.memory_space<vmem>>, %arg2: memref<576x128xbf16, #tpu.memory_space<vmem>>, %arg3: memref<1x128xf32, #tpu.memory_space<vmem>>, %arg4: memref<16x128xbf16, #tpu.memory_space<vmem>>) attributes {dimension_semantics = [#tpu.dimension_semantics<parallel>], iteration_bounds = array<i64: 2>, scalar_prefetch = 0 : i64, scratch_operands = 0 : i64, tpu.core_type = #tpu.core_type<tc>, window_params = [{transform_indices = @transform_0, window_bounds = array<i64: 16, 576>}, {pipeline_mode = #tpu.pipeline_mode<synchronous>, transform_indices = @transform_1, window_bounds = array<i64: 576, 128>}, {pipeline_mode = #tpu.pipeline_mode<synchronous>, transform_indices = @transform_2, window_bounds = array<i64: 1, 128>}, {transform_indices = @transform_3, window_bounds = array<i64: 16, 128>}]} {
    %c0 = arith.constant 0 : index
    %c0_0 = arith.constant 0 : index
    %0 = vector.load %arg1[%c0, %c0_0] : memref<16x576xbf16, #tpu.memory_space<vmem>>, vector<16x576xbf16>
    %c0_1 = arith.constant 0 : index
    %c0_2 = arith.constant 0 : index
    %1 = vector.load %arg2[%c0_1, %c0_2] : memref<576x128xbf16, #tpu.memory_space<vmem>>, vector<576x128xbf16>
    %cst = arith.constant dense<0.000000e+00> : vector<16x128xf32>
    %2 = tpu.matmul %0, %1, %cst {dimension_numbers = #tpu.dot_dimension_numbers<[1], [0], [0], [1], [0, 0, 1, 1], [], []>} : vector<16x576xbf16>, vector<576x128xbf16>, vector<16x128xf32> -> vector<16x128xf32>
    %c0_3 = arith.constant 0 : index
    %c0_4 = arith.constant 0 : index
    %3 = vector.load %arg3[%c0_3, %c0_4] : memref<1x128xf32, #tpu.memory_space<vmem>>, vector<1x128xf32>
    %4 = vector.broadcast %3 : vector<1x128xf32> to vector<16x128xf32>
    %5 = arith.addf %2, %4 : vector<16x128xf32>
    %cst_5 = arith.constant 0.000000e+00 : f32
    %6 = vector.broadcast %cst_5 : f32 to vector<16x128xf32>
    %7 = arith.maximumf %5, %6 : vector<16x128xf32>
    %8 = arith.truncf %7 : vector<16x128xf32> to vector<16x128xbf16>
    %c0_6 = arith.constant 0 : index
    %c0_7 = arith.constant 0 : index
    %9 = vector.load %arg4[%c0_6, %c0_7] : memref<16x128xbf16, #tpu.memory_space<vmem>>, vector<16x128xbf16>
    tpu.vector_store %arg4[%c0_6, %c0_7], %8 {strides = array<i32>} : memref<16x128xbf16, #tpu.memory_space<vmem>>, vector<16x128xbf16>,
    return
  }
  func.func @transform_0(%arg0: i32) -> (i32, i32) {
    %c0_i32 = arith.constant 0 : i32
    %c0_i32_0 = arith.constant 0 : i32
    return %arg0, %c0_i32 : i32, i32
  }
  func.func @transform_1(%arg0: i32) -> (i32, i32) {
    %c0_i32 = arith.constant 0 : i32
    %c0_i32_0 = arith.constant 0 : i32
    %c0_i32_1 = arith.constant 0 : i32
    return %c0_i32, %c0_i32_0 : i32, i32
  }
  func.func @transform_2(%arg0: i32) -> (i32, i32) {
    %c0_i32 = arith.constant 0 : i32
    %c0_i32_0 = arith.constant 0 : i32
    %c0_i32_1 = arith.constant 0 : i32
    return %c0_i32, %c0_i32_0 : i32, i32
  }
  func.func @transform_3(%arg0: i32) -> (i32, i32) {
    %c0_i32 = arith.constant 0 : i32
    %c0_i32_0 = arith.constant 0 : i32
    return %arg0, %c0_i32 : i32, i32
  }
}

module attributes {stable_mosaic.version = 11 : i64} {
  func.func @_matmul_bias_act_kernel(%arg0: i32, %arg1: memref<64x800xbf16, #tpu.memory_space<vmem>>, %arg2: memref<800x16xbf16, #tpu.memory_space<vmem>>, %arg3: memref<1x16xf32, #tpu.memory_space<vmem>>, %arg4: memref<64x16xf32, #tpu.memory_space<vmem>>) attributes {dimension_semantics = [#tpu.dimension_semantics<parallel>], iteration_bounds = array<i64: 2>, scalar_prefetch = 0 : i64, scratch_operands = 0 : i64, tpu.core_type = #tpu.core_type<tc>, window_params = [{transform_indices = @transform_0, window_bounds = array<i64: 64, 800>}, {pipeline_mode = #tpu.pipeline_mode<synchronous>, transform_indices = @transform_1, window_bounds = array<i64: 800, 16>}, {pipeline_mode = #tpu.pipeline_mode<synchronous>, transform_indices = @transform_2, window_bounds = array<i64: 1, 16>}, {transform_indices = @transform_3, window_bounds = array<i64: 64, 16>}]} {
    %c0 = arith.constant 0 : index
    %c0_0 = arith.constant 0 : index
    %0 = vector.load %arg1[%c0, %c0_0] : memref<64x800xbf16, #tpu.memory_space<vmem>>, vector<64x800xbf16>
    %c0_1 = arith.constant 0 : index
    %c0_2 = arith.constant 0 : index
    %1 = vector.load %arg2[%c0_1, %c0_2] : memref<800x16xbf16, #tpu.memory_space<vmem>>, vector<800x16xbf16>
    %cst = arith.constant dense<0.000000e+00> : vector<64x16xf32>
    %2 = tpu.matmul %0, %1, %cst {dimension_numbers = #tpu.dot_dimension_numbers<[1], [0], [0], [1], [0, 0, 1, 1], [], []>} : vector<64x800xbf16>, vector<800x16xbf16>, vector<64x16xf32> -> vector<64x16xf32>
    %c0_3 = arith.constant 0 : index
    %c0_4 = arith.constant 0 : index
    %3 = vector.load %arg3[%c0_3, %c0_4] : memref<1x16xf32, #tpu.memory_space<vmem>>, vector<1x16xf32>
    %4 = vector.broadcast %3 : vector<1x16xf32> to vector<64x16xf32>
    %5 = arith.addf %2, %4 : vector<64x16xf32>
    %6 = arith.negf %5 : vector<64x16xf32>
    %7 = math.exp %6 : vector<64x16xf32>
    %cst_5 = arith.constant 1.000000e+00 : f32
    %8 = vector.broadcast %cst_5 : f32 to vector<64x16xf32>
    %9 = arith.addf %8, %7 : vector<64x16xf32>
    %10 = arith.divf %8, %9 : vector<64x16xf32>
    %c0_6 = arith.constant 0 : index
    %c0_7 = arith.constant 0 : index
    %11 = vector.load %arg4[%c0_6, %c0_7] : memref<64x16xf32, #tpu.memory_space<vmem>>, vector<64x16xf32>
    tpu.vector_store %arg4[%c0_6, %c0_7], %10 {strides = array<i32>} : memref<64x16xf32, #tpu.memory_space<vmem>>, vector<64x16xf32>,
    return
  }
  func.func @transform_0(%arg0: i32) -> (i32, i32) {
    %c0_i32 = arith.constant 0 : i32
    %c0_i32_0 = arith.constant 0 : i32
    return %arg0, %c0_i32 : i32, i32
  }
  func.func @transform_1(%arg0: i32) -> (i32, i32) {
    %c0_i32 = arith.constant 0 : i32
    %c0_i32_0 = arith.constant 0 : i32
    %c0_i32_1 = arith.constant 0 : i32
    return %c0_i32, %c0_i32_0 : i32, i32
  }
  func.func @transform_2(%arg0: i32) -> (i32, i32) {
    %c0_i32 = arith.constant 0 : i32
    %c0_i32_0 = arith.constant 0 : i32
    %c0_i32_1 = arith.constant 0 : i32
    return %c0_i32, %c0_i32_0 : i32, i32
  }
  func.func @transform_3(%arg0: i32) -> (i32, i32) {
    %c0_i32 = arith.constant 0 : i32
    %c0_i32_0 = arith.constant 0 : i32
    return %arg0, %c0_i32 : i32, i32
  }
}

module attributes {stable_mosaic.version = 11 : i64} {
  func.func @_matmul_bias_act_kernel(%arg0: i32, %arg1: memref<16x800xbf16, #tpu.memory_space<vmem>>, %arg2: memref<800x16xbf16, #tpu.memory_space<vmem>>, %arg3: memref<1x16xf32, #tpu.memory_space<vmem>>, %arg4: memref<16x16xf32, #tpu.memory_space<vmem>>) attributes {dimension_semantics = [#tpu.dimension_semantics<parallel>], iteration_bounds = array<i64: 2>, scalar_prefetch = 0 : i64, scratch_operands = 0 : i64, tpu.core_type = #tpu.core_type<tc>, window_params = [{transform_indices = @transform_0, window_bounds = array<i64: 16, 800>}, {pipeline_mode = #tpu.pipeline_mode<synchronous>, transform_indices = @transform_1, window_bounds = array<i64: 800, 16>}, {pipeline_mode = #tpu.pipeline_mode<synchronous>, transform_indices = @transform_2, window_bounds = array<i64: 1, 16>}, {transform_indices = @transform_3, window_bounds = array<i64: 16, 16>}]} {
    %c0 = arith.constant 0 : index
    %c0_0 = arith.constant 0 : index
    %0 = vector.load %arg1[%c0, %c0_0] : memref<16x800xbf16, #tpu.memory_space<vmem>>, vector<16x800xbf16>
    %c0_1 = arith.constant 0 : index
    %c0_2 = arith.constant 0 : index
    %1 = vector.load %arg2[%c0_1, %c0_2] : memref<800x16xbf16, #tpu.memory_space<vmem>>, vector<800x16xbf16>
    %cst = arith.constant dense<0.000000e+00> : vector<16x16xf32>
    %2 = tpu.matmul %0, %1, %cst {dimension_numbers = #tpu.dot_dimension_numbers<[1], [0], [0], [1], [0, 0, 1, 1], [], []>} : vector<16x800xbf16>, vector<800x16xbf16>, vector<16x16xf32> -> vector<16x16xf32>
    %c0_3 = arith.constant 0 : index
    %c0_4 = arith.constant 0 : index
    %3 = vector.load %arg3[%c0_3, %c0_4] : memref<1x16xf32, #tpu.memory_space<vmem>>, vector<1x16xf32>
    %4 = vector.broadcast %3 : vector<1x16xf32> to vector<16x16xf32>
    %5 = arith.addf %2, %4 : vector<16x16xf32>
    %6 = arith.negf %5 : vector<16x16xf32>
    %7 = math.exp %6 : vector<16x16xf32>
    %cst_5 = arith.constant 1.000000e+00 : f32
    %8 = vector.broadcast %cst_5 : f32 to vector<16x16xf32>
    %9 = arith.addf %8, %7 : vector<16x16xf32>
    %10 = arith.divf %8, %9 : vector<16x16xf32>
    %c0_6 = arith.constant 0 : index
    %c0_7 = arith.constant 0 : index
    %11 = vector.load %arg4[%c0_6, %c0_7] : memref<16x16xf32, #tpu.memory_space<vmem>>, vector<16x16xf32>
    tpu.vector_store %arg4[%c0_6, %c0_7], %10 {strides = array<i32>} : memref<16x16xf32, #tpu.memory_space<vmem>>, vector<16x16xf32>,
    return
  }
  func.func @transform_0(%arg0: i32) -> (i32, i32) {
    %c0_i32 = arith.constant 0 : i32
    %c0_i32_0 = arith.constant 0 : i32
    return %arg0, %c0_i32 : i32, i32
  }
  func.func @transform_1(%arg0: i32) -> (i32, i32) {
    %c0_i32 = arith.constant 0 : i32
    %c0_i32_0 = arith.constant 0 : i32
    %c0_i32_1 = arith.constant 0 : i32
    return %c0_i32, %c0_i32_0 : i32, i32
  }
  func.func @transform_2(%arg0: i32) -> (i32, i32) {
    %c0_i32 = arith.constant 0 : i32
    %c0_i32_0 = arith.constant 0 : i32
    %c0_i32_1 = arith.constant 0 : i32
    return %c0_i32, %c0_i32_0 : i32, i32
  }
  func.func @transform_3(%arg0: i32) -> (i32, i32) {
    %c0_i32 = arith.constant 0 : i32
    %c0_i32_0 = arith.constant 0 : i32
    return %arg0, %c0_i32 : i32, i32
  }
}

</mosaic_0001>

<bundles_post_ra>
// kernel: forward.13
= control target key start
LH: loop header
LB: loop body
LE: loop exit
PB: predicated region body
PF: predicated region fallthrough
CT: control target
= control target key end

     0   :  { %s355_s12 = smov 0   ;;  %s384_s0 = inlined_call_operand.vmem [shape: bf16[32,36], index: 0, kind: input, shape index: {}]   ;;  %s385_s1 = inlined_call_operand.vmem [shape: bf16[36,64], index: 1, kind: input, shape index: {}]   ;;  %s386_s2 = inlined_call_operand.vmem [shape: f32[1,64], index: 2, kind: input, shape index: {}]   ;;  %s387_s3 = inlined_call_operand.vmem [shape: bf16[32,64], index: 3, kind: output, shape index: {}]  }
   0x1 LB: > { %s291_s13 = sadd.s32 4294967295, %s333_s12   ;;  %p295_p0 = scmp.ge.s32.totalorder %s333_s12, 1  ;;  %s333_s12 = sphi %s355_s12, %s13_s12  }
   0x2   : > { %p138_p1 = scmp.lt.s32.totalorder %s333_s12, 3 }
   0x4   : > { %p139_p2 = pnand %p295_p0, %p138_p1 }
   0x5   : > { %s296_s16 = sshll.u32 (!%p139_p2), %s291_s13, 1 }
   0x6   : > { %142 = sbr.rel (%p139_p2) target bundleno = 169 (0xa9), region = 32  ;;  %p163_p3 = scmp.lt.s32.totalorder (!%p139_p2), %s296_s16, 3 }
   0xb   : > { %v181_v0 = vld [vmem:[%s385_s1 + $0x10] sm:$0x3]  ;;  %vm210_vm0 = vcmask 1041408   ;;  %s389_s16 = smov (!%p163_p3, %s296_s16), 3  ;;  %v317_v4 = vld [vmem:[%s385_s1 + $0x8] sm:$0xff]  ;;  %v316_v5 = vld [vmem:[%s385_s1] sm:$0xff] }
   0xc   : > { %v200_v1 = vunpack.c.l.b16 %v181_v0  ;;  %s297_s19 = sshll.u32 %s389_s16, 2  ;;  %vm206_vm1 = vcmask 293888   ;;  %v326_v7 = vld [vmem:[%s386_s2] ss:$0 sm:$0xff]  ;;  %vm232_vm2 = vcmask 519168  }
   0xd   : > { %s166_s24 = scalar_lea.vmem %s384_s0, %s297_s19  ;;  %s172_s29 = scalar_lea.vmem %s387_s3, %s297_s19 }
   0xe   : > { %v203_v2 = vpack.c.b16 %v200_v1, %v200_v1  ;;  %v315_v6 = vld [vmem:[%s166_s24] sm:$0xff] }
  0x10   : > { %v212_v3 = vsel %vm210_vm0, %v203_v2, 0 }
  0x11   : > { %219 = vmatpush.bf16.msra.mxu0 %v212_v3 }
  0x15   : > { %220 = vmatpush.bf16.msra.mxu0 %v317_v4 }
  0x19   : > { %221 = vmatpush.bf16.msra.mxu0 %v316_v5 }
  0x1c   : > { %312 = vmatmul.msk.bf16.vlgmr.msra.gmra.mxu0 %vm206_vm1, %v315_v6 }
  0x99   : > { %v223_v8 = vpop.f32.mrf.mxu0 }
  0x9a   : > { %v224_v9 = vadd.f32 %v326_v7, %v223_v8 }
  0x9c   : > { %v228_v10 = vmax.f32 %v224_v9, 0.0 }
  0x9e   : > { %v230_v11 = vpack.c.bf16 %v228_v10, %v228_v10 }
  0xa0   : > { %233 = vst.msk [vmem:[%s172_s29] sm:$0xf] %vm232_vm2, %v230_v11 }
  0xa1   : > { %v225_v12 = vpop.f32.mrf.mxu0 }
  0xa2   : > { %v226_v13 = vadd.f32 %v326_v7, %v225_v12 }
  0xa4   : > { %v229_v14 = vmax.f32 %v226_v13, 0.0 }
  0xa6   : > { %v231_v15 = vpack.c.bf16 %v229_v14, %v229_v14 }
  0xa8   : > { %234 = vst.msk [vmem:[%s172_s29 + $0x4] sm:$0xf] %vm232_vm2, %v231_v15 }
  0xa9 PF: > { %s13_s12 = sadd.s32 1, %s333_s12  }
  0xaa   : > { %p10_p4 = scmp.ge.s32.totalorder %s13_s12, 4  }
  0xac   :  { %12 = sbr.rel (!%p10_p4) target bundleno = 1 (0x1), region = 62 }

// kernel: forward.14
= control target key start
LH: loop header
LB: loop body
LE: loop exit
PB: predicated region body
PF: predicated region fallthrough
CT: control target
= control target key end

     0   :  { %vm327_vm0 = vcmask 523264   ;;  %s728_s1 = inlined_call_operand.vmem [shape: bf16[576,128], index: 1, kind: input, shape index: {}]   ;;  %s729_s2 = inlined_call_operand.vmem [shape: f32[1,128], index: 2, kind: input, shape index: {}]   ;;  %s730_s0 = inlined_call_operand.vmem [shape: bf16[8,576], index: 0, kind: input, shape index: {}]   ;;  %s731_s3 = inlined_call_operand.vmem [shape: bf16[8,128], index: 3, kind: output, shape index: {}]  }
   0x1   :  { %v555_v0 = vld [vmem:[%s728_s1 + $0x38] sm:$0xff]  ;;  %v554_v4 = vld [vmem:[%s728_s1 + $0x30] sm:$0xff]  ;;  %v553_v8 = vld [vmem:[%s728_s1 + $0x28] sm:$0xff] }
   0x2   :  { %v571_v1 = vld [vmem:[%s728_s1 + $0xb8] sm:$0xff]  ;;  %331 = vmatpush.bf16.msra.mxu0 %v555_v0  ;;  %v570_v5 = vld [vmem:[%s728_s1 + $0xb0] sm:$0xff]  ;;  %v569_v9 = vld [vmem:[%s728_s1 + $0xa8] sm:$0xff] }
   0x3   :  { %v579_v2 = vld [vmem:[%s728_s1 + $0xf8] sm:$0xff]  ;;  %357 = vmatpush.bf16.msra.mxu2 %v571_v1  ;;  %v578_v6 = vld [vmem:[%s728_s1 + $0xf0] sm:$0xff]  ;;  %v577_v10 = vld [vmem:[%s728_s1 + $0xe8] sm:$0xff] }
   0x4   :  { %v563_v3 = vld [vmem:[%s728_s1 + $0x78] sm:$0xff]  ;;  %370 = vmatpush.bf16.msra.mxu3 %v579_v2  ;;  %v562_v7 = vld [vmem:[%s728_s1 + $0x70] sm:$0xff]  ;;  %v561_v11 = vld [vmem:[%s728_s1 + $0x68] sm:$0xff] }
   0x5   :  { %344 = vmatpush.bf16.msra.mxu1 %v563_v3  ;;  %v552_v12 = vld [vmem:[%s728_s1 + $0x20] sm:$0xff]  ;;  %v551_v16 = vld [vmem:[%s728_s1 + $0x18] sm:$0xff]  ;;  %v550_v20 = vld [vmem:[%s728_s1 + $0x10] sm:$0xff] }
   0x6   :  { %332 = vmatpush.bf16.msra.mxu0 %v554_v4  ;;  %v568_v13 = vld [vmem:[%s728_s1 + $0xa0] sm:$0xff]  ;;  %v567_v17 = vld [vmem:[%s728_s1 + $0x98] sm:$0xff]  ;;  %v566_v21 = vld [vmem:[%s728_s1 + $0x90] sm:$0xff] }
   0x7   :  { %358 = vmatpush.bf16.msra.mxu2 %v570_v5  ;;  %v576_v14 = vld [vmem:[%s728_s1 + $0xe0] sm:$0xff]  ;;  %v575_v18 = vld [vmem:[%s728_s1 + $0xd8] sm:$0xff]  ;;  %v574_v22 = vld [vmem:[%s728_s1 + $0xd0] sm:$0xff] }
   0x8   :  { %371 = vmatpush.bf16.msra.mxu3 %v578_v6  ;;  %v560_v15 = vld [vmem:[%s728_s1 + $0x60] sm:$0xff]  ;;  %v559_v19 = vld [vmem:[%s728_s1 + $0x58] sm:$0xff]  ;;  %v558_v23 = vld [vmem:[%s728_s1 + $0x50] sm:$0xff] }
   0x9   :  { %345 = vmatpush.bf16.msra.mxu1 %v562_v7  ;;  %v549_v24 = vld [vmem:[%s728_s1 + $0x8] sm:$0xff]  ;;  %v15_v26 = vld [vmem:[%s730_s0] sm:$0xff]  ;;  %v583_v38 = vld [vmem:[%s728_s1 + $0x118] sm:$0xff] }
   0xa   :  { %333 = vmatpush.bf16.msra.mxu0 %v553_v8  ;;  %v565_v25 = vld [vmem:[%s728_s1 + $0x88] sm:$0xff]  ;;  %v97_v30 = vunpack.c.l.b16 %v15_v26  ;;  %v548_v32 = vld [vmem:[%s728_s1] sm:$0xff]  ;;  %v98_v35 = vunpack.c.h.b16 %v15_v26  ;;  %v582_v43 = vld [vmem:[%s728_s1 + $0x110] sm:$0xff] }
   0xb   :  { %359 = vmatpush.bf16.msra.mxu2 %v569_v9  ;;  %v16_v27 = vld [vmem:[%s730_s0 + $0x8] sm:$0xff]  ;;  %v564_v33 = vld [vmem:[%s728_s1 + $0x80] sm:$0xff]  ;;  %v17_v45 = vld [vmem:[%s730_s0 + $0x10] sm:$0xf] }
   0xc   :  { %372 = vmatpush.bf16.msra.mxu3 %v577_v10  ;;  %v573_v28 = vld [vmem:[%s728_s1 + $0xc8] sm:$0xff]  ;;  %v99_v31 = vunpack.c.l.b16 %v16_v27  ;;  %v100_v34 = vunpack.c.h.b16 %v16_v27  ;;  %v572_v36 = vld [vmem:[%s728_s1 + $0xc0] sm:$0xff]  ;;  %v102_v39 = vpack.c.b16 %v97_v30, %v97_v30  ;;  %v103_v42 = vpack.c.b16 %v98_v35, %v98_v35 }
   0xd   :  { %346 = vmatpush.bf16.msra.mxu1 %v561_v11  ;;  %v557_v29 = vld [vmem:[%s728_s1 + $0x48] sm:$0xff]  ;;  %v556_v37 = vld [vmem:[%s728_s1 + $0x40] sm:$0xff]  ;;  %v101_v47 = vunpack.c.l.b16 %v17_v45 }
   0xe   :  { %334 = vmatpush.bf16.msra.mxu0 %v552_v12  ;;  %v104_v40 = vpack.c.b16 %v99_v31, %v99_v31  ;;  %v105_v41 = vpack.c.b16 %v100_v34, %v100_v34  ;;  %v581_v44 = vld [vmem:[%s728_s1 + $0x108] sm:$0xff]  ;;  %v580_v46 = vld [vmem:[%s728_s1 + $0x100] sm:$0xff] }
   0xf   :  { %360 = vmatpush.bf16.msra.mxu2 %v568_v13  ;;  %v106_v48 = vpack.c.b16 %v101_v47, %v101_v47  ;;  %v584_v50 = vld [vmem:[%s729_s2] ss:$0 sm:$0xff] }
  0x10   :  { %373 = vmatpush.bf16.msra.mxu3 %v576_v14 }
  0x11   :  { %347 = vmatpush.bf16.msra.mxu1 %v560_v15 }
  0x12   :  { %335 = vmatpush.bf16.msra.mxu0 %v551_v16 }
  0x13   :  { %361 = vmatpush.bf16.msra.mxu2 %v567_v17 }
  0x14   :  { %374 = vmatpush.bf16.msra.mxu3 %v575_v18 }
  0x15   :  { %348 = vmatpush.bf16.msra.mxu1 %v559_v19 }
  0x16   :  { %336 = vmatpush.bf16.msra.mxu0 %v550_v20 }
  0x17   :  { %362 = vmatpush.bf16.msra.mxu2 %v566_v21 }
  0x18   :  { %375 = vmatpush.bf16.msra.mxu3 %v574_v22 }
  0x19   :  { %349 = vmatpush.bf16.msra.mxu1 %v558_v23 }
  0x1a   :  { %337 = vmatpush.bf16.msra.mxu0 %v549_v24 }
  0x1b   :  { %363 = vmatpush.bf16.msra.mxu2 %v565_v25 }
  0x1c   :  { %376 = vmatpush.bf16.msra.mxu3 %v573_v28 }
  0x1d   :  { %350 = vmatpush.bf16.msra.mxu1 %v557_v29 }
  0x1e   :  { %338 = vmatpush.bf16.msra.mxu0 %v548_v32 }
  0x1f   :  { %364 = vmatpush.bf16.msra.mxu2 %v564_v33 }
  0x20   :  { %377 = vmatpush.bf16.msra.mxu3 %v572_v36 }
  0x21   :  { %351 = vmatpush.bf16.msra.mxu1 %v556_v37  ;;  %339 = vmatmul.bf16.vlgmr.msra.gmra.mxu0 %v102_v39 }
  0x22   :  { %387 = vmatpush.bf16.msrb.mxu0 %v583_v38  ;;  %365 = vmatmul.bf16.vlgmr.msra.gmra.mxu2 %v104_v40 }
  0x23   :  { %378 = vmatmul.bf16.vlgmr.msra.gmra.mxu3 %v105_v41 }
  0x24   :  { %352 = vmatmul.bf16.vlgmr.msra.gmra.mxu1 %v103_v42 }
  0x26   :  { %388 = vmatpush.bf16.msrb.mxu0 %v582_v43 }
  0x2a   :  { %389 = vmatpush.bf16.msrb.mxu0 %v581_v44 }
  0x2e   :  { %390 = vmatpush.bf16.msrb.mxu0 %v580_v46 }
  0x31   :  { %547 = vmatmul.msk.bf16.vlgmr.msrb.gmra.mxu0 %vm327_vm0, %v106_v48 }
  0x9e   :  { %v340_v49 = vpop.f32.mrf.mxu0 }
  0x9f   :  { %v341_v52 = vadd.f32 %v584_v50, %v340_v49 }
  0xa1   :  { %v353_v51 = vpop.f32.mrf.mxu1 }
  0xa2   :  { %v354_v56 = vadd.f32 %v353_v51, %v341_v52 }
  0xa5   :  { %v366_v53 = vpop.f32.mrf.mxu2 }
  0xa6   :  { %v379_v54 = vpop.f32.mrf.mxu3  ;;  %v342_v55 = vpop.f32.mrf.mxu0  ;;  %v367_v58 = vadd.f32 %v366_v53, %v354_v56 }
  0xa8   :  { %v380_v60 = vadd.f32 %v379_v54, %v367_v58 }
  0xa9   :  { %v355_v57 = vpop.f32.mrf.mxu1 }
  0xad   :  { %v368_v59 = vpop.f32.mrf.mxu2 }
  0xae   :  { %v381_v61 = vpop.f32.mrf.mxu3  ;;  %v392_v62 = vpop.f32.mrf.mxu0 }
  0xaf   :  { %v393_v63 = vadd.f32 %v392_v62, %v380_v60 }
  0xb1   :  { %v396_v0 = vmax.f32 %v393_v63, 0.0 }
  0xb3   :  { %v397_v1 = vpack.c.bf16 %v396_v0, %v396_v0 }
  0xb5   :  { %398 = vst [vmem:[%s731_s3] sm:$0xf] %v397_v1 }
  0xb6   :  { %v394_v2 = vpop.f32.mrf.mxu0 }

// kernel: forward.15
= control target key start
LH: loop header
LB: loop body
LE: loop exit
PB: predicated region body
PF: predicated region fallthrough
CT: control target
= control target key end

     0   :  { %s2824_s1 = inlined_call_operand.vmem [shape: bf16[1152,256], index: 1, kind: input, shape index: {}]   ;;  %s2825_s0 = inlined_call_operand.vmem [shape: bf16[8,1152], index: 0, kind: input, shape index: {}]   ;;  %s2826_s2 = inlined_call_operand.vmem [shape: f32[1,256], index: 2, kind: input, shape index: {}]   ;;  %s2827_s3 = inlined_call_operand.vmem [shape: bf16[8,256], index: 3, kind: output, shape index: {}]  }
   0x1   :  { %v1221_v0 = vld [vmem:[%s2824_s1 + $0x70] sm:$0xf]  ;;  %v1754_v1 = vld [vmem:[%s2824_s1 + $0x74] sm:$0xf0]  ;;  %v1213_v9 = vld [vmem:[%s2824_s1 + $0x60] sm:$0xf] }
   0x2   :  { %v1285_v2 = vld [vmem:[%s2824_s1 + $0xf0] sm:$0xf]  ;;  %v1222_v3 = vor.u32 %v1754_v1, %v1221_v0  ;;  %v1770_v4 = vld [vmem:[%s2824_s1 + $0xf4] sm:$0xf0]  ;;  %v1752_v10 = vld [vmem:[%s2824_s1 + $0x64] sm:$0xf0] }
   0x3   :  { %v1349_v5 = vld [vmem:[%s2824_s1 + $0x170] sm:$0xf]  ;;  %v1786_v6 = vld [vmem:[%s2824_s1 + $0x174] sm:$0xf0]  ;;  %v1286_v7 = vor.u32 %v1770_v4, %v1285_v2  ;;  %v1277_v11 = vld [vmem:[%s2824_s1 + $0xe0] sm:$0xf]  ;;  %v1214_v12 = vor.u32 %v1752_v10, %v1213_v9 }
   0x4   :  { %v1350_v8 = vor.u32 %v1786_v6, %v1349_v5  ;;  %921 = vmatpush.bf16.msra.mxu0 %v1222_v3  ;;  %v1768_v13 = vld [vmem:[%s2824_s1 + $0xe4] sm:$0xf0]  ;;  %v1413_v14 = vld [vmem:[%s2824_s1 + $0x1f0] sm:$0xf]  ;;  %v1802_v15 = vld [vmem:[%s2824_s1 + $0x1f4] sm:$0xf0] }
   0x5   :  { %934 = vmatpush.bf16.msra.mxu1 %v1286_v7  ;;  %v1278_v16 = vor.u32 %v1768_v13, %v1277_v11  ;;  %v1414_v17 = vor.u32 %v1802_v15, %v1413_v14  ;;  %v1341_v18 = vld [vmem:[%s2824_s1 + $0x160] sm:$0xf]  ;;  %v1784_v19 = vld [vmem:[%s2824_s1 + $0x164] sm:$0xf0]  ;;  %v1205_v20 = vld [vmem:[%s2824_s1 + $0x50] sm:$0xf] }
   0x6   :  { %947 = vmatpush.bf16.msra.mxu2 %v1350_v8  ;;  %v1342_v21 = vor.u32 %v1784_v19, %v1341_v18  ;;  %v1750_v22 = vld [vmem:[%s2824_s1 + $0x54] sm:$0xf0]  ;;  %v1269_v23 = vld [vmem:[%s2824_s1 + $0xd0] sm:$0xf]  ;;  %v1405_v25 = vld [vmem:[%s2824_s1 + $0x1e0] sm:$0xf] }
   0x7   :  { %v1766_v24 = vld [vmem:[%s2824_s1 + $0xd4] sm:$0xf0]  ;;  %960 = vmatpush.bf16.msra.mxu3 %v1414_v17  ;;  %v1800_v26 = vld [vmem:[%s2824_s1 + $0x1e4] sm:$0xf0]  ;;  %v1333_v27 = vld [vmem:[%s2824_s1 + $0x150] sm:$0xf]  ;;  %v1206_v28 = vor.u32 %v1750_v22, %v1205_v20 }
   0x8   :  { %922 = vmatpush.bf16.msra.mxu0 %v1214_v12  ;;  %v1406_v29 = vor.u32 %v1800_v26, %v1405_v25  ;;  %v1782_v30 = vld [vmem:[%s2824_s1 + $0x154] sm:$0xf0]  ;;  %v1197_v31 = vld [vmem:[%s2824_s1 + $0x40] sm:$0xf]  ;;  %v1748_v32 = vld [vmem:[%s2824_s1 + $0x44] sm:$0xf0]  ;;  %v1270_v33 = vor.u32 %v1766_v24, %v1269_v23 }
   0x9   :  { %935 = vmatpush.bf16.msra.mxu1 %v1278_v16  ;;  %v1334_v34 = vor.u32 %v1782_v30, %v1333_v27  ;;  %v1261_v35 = vld [vmem:[%s2824_s1 + $0xc0] sm:$0xf]  ;;  %v1764_v36 = vld [vmem:[%s2824_s1 + $0xc4] sm:$0xf0]  ;;  %v1397_v37 = vld [vmem:[%s2824_s1 + $0x1d0] sm:$0xf]  ;;  %v1198_v42 = vor.u32 %v1748_v32, %v1197_v31 }
   0xa   :  { %948 = vmatpush.bf16.msra.mxu2 %v1342_v21  ;;  %v1798_v38 = vld [vmem:[%s2824_s1 + $0x1d4] sm:$0xf0]  ;;  %v1325_v39 = vld [vmem:[%s2824_s1 + $0x140] sm:$0xf]  ;;  %v1780_v40 = vld [vmem:[%s2824_s1 + $0x144] sm:$0xf0]  ;;  %v1262_v45 = vor.u32 %v1764_v36, %v1261_v35 }
   0xb   :  { %961 = vmatpush.bf16.msra.mxu3 %v1406_v29  ;;  %v1398_v41 = vor.u32 %v1798_v38, %v1397_v37  ;;  %v1389_v43 = vld [vmem:[%s2824_s1 + $0x1c0] sm:$0xf]  ;;  %v1796_v44 = vld [vmem:[%s2824_s1 + $0x1c4] sm:$0xf0]  ;;  %v1326_v46 = vor.u32 %v1780_v40, %v1325_v39  ;;  %v1189_v47 = vld [vmem:[%s2824_s1 + $0x30] sm:$0xf] }
   0xc   :  { %923 = vmatpush.bf16.msra.mxu0 %v1206_v28  ;;  %v1746_v48 = vld [vmem:[%s2824_s1 + $0x34] sm:$0xf0]  ;;  %v1253_v49 = vld [vmem:[%s2824_s1 + $0xb0] sm:$0xf]  ;;  %v1390_v53 = vor.u32 %v1796_v44, %v1389_v43  ;;  %v1181_v59 = vld [vmem:[%s2824_s1 + $0x20] sm:$0xf] }
   0xd   :  { %936 = vmatpush.bf16.msra.mxu1 %v1270_v33  ;;  %v1762_v50 = vld [vmem:[%s2824_s1 + $0xb4] sm:$0xf0]  ;;  %v1317_v51 = vld [vmem:[%s2824_s1 + $0x130] sm:$0xf]  ;;  %v1190_v54 = vor.u32 %v1746_v48, %v1189_v47  ;;  %v1744_v60 = vld [vmem:[%s2824_s1 + $0x24] sm:$0xf0] }
   0xe   :  { %949 = vmatpush.bf16.msra.mxu2 %v1334_v34  ;;  %v1778_v52 = vld [vmem:[%s2824_s1 + $0x134] sm:$0xf0]  ;;  %v1381_v55 = vld [vmem:[%s2824_s1 + $0x1b0] sm:$0xf]  ;;  %v1254_v57 = vor.u32 %v1762_v50, %v1253_v49  ;;  %v1245_v61 = vld [vmem:[%s2824_s1 + $0xa0] sm:$0xf]  ;;  %v1182_v2 = vor.u32 %v1744_v60, %v1181_v59 }
   0xf   :  { %962 = vmatpush.bf16.msra.mxu3 %v1398_v41  ;;  %v1794_v56 = vld [vmem:[%s2824_s1 + $0x1b4] sm:$0xf0]  ;;  %v1318_v58 = vor.u32 %v1778_v52, %v1317_v51  ;;  %v1760_v62 = vld [vmem:[%s2824_s1 + $0xa4] sm:$0xf0]  ;;  %v1309_v63 = vld [vmem:[%s2824_s1 + $0x120] sm:$0xf] }
  0x10   :  { %924 = vmatpush.bf16.msra.mxu0 %v1198_v42  ;;  %v1776_v0 = vld [vmem:[%s2824_s1 + $0x124] sm:$0xf0]  ;;  %v1382_v1 = vor.u32 %v1794_v56, %v1381_v55  ;;  %v1373_v3 = vld [vmem:[%s2824_s1 + $0x1a0] sm:$0xf]  ;;  %v1246_v5 = vor.u32 %v1760_v62, %v1245_v61  ;;  %v1173_v7 = vld [vmem:[%s2824_s1 + $0x10] sm:$0xf] }
  0x11   :  { %937 = vmatpush.bf16.msra.mxu1 %v1262_v45  ;;  %v1792_v4 = vld [vmem:[%s2824_s1 + $0x1a4] sm:$0xf0]  ;;  %v1310_v6 = vor.u32 %v1776_v0, %v1309_v63  ;;  %v1742_v8 = vld [vmem:[%s2824_s1 + $0x14] sm:$0xf0]  ;;  %v1237_v9 = vld [vmem:[%s2824_s1 + $0x90] sm:$0xf] }
  0x12   :  { %950 = vmatpush.bf16.msra.mxu2 %v1326_v46  ;;  %v1758_v10 = vld [vmem:[%s2824_s1 + $0x94] sm:$0xf0]  ;;  %v1301_v11 = vld [vmem:[%s2824_s1 + $0x110] sm:$0xf]  ;;  %v1374_v13 = vor.u32 %v1792_v4, %v1373_v3  ;;  %v1165_v14 = vld [vmem:[%s2824_s1] sm:$0xf]  ;;  %v1174_v15 = vor.u32 %v1742_v8, %v1173_v7 }
  0x13   :  { %963 = vmatpush.bf16.msra.mxu3 %v1390_v53  ;;  %v1774_v12 = vld [vmem:[%s2824_s1 + $0x114] sm:$0xf0]  ;;  %v1740_v16 = vld [vmem:[%s2824_s1 + $0x4] sm:$0xf0]  ;;  %v1365_v17 = vld [vmem:[%s2824_s1 + $0x190] sm:$0xf]  ;;  %v1238_v19 = vor.u32 %v1758_v10, %v1237_v9 }
  0x14   :  { %925 = vmatpush.bf16.msra.mxu0 %v1190_v54  ;;  %v1790_v18 = vld [vmem:[%s2824_s1 + $0x194] sm:$0xf0]  ;;  %v1302_v20 = vor.u32 %v1774_v12, %v1301_v11  ;;  %v1229_v21 = vld [vmem:[%s2824_s1 + $0x80] sm:$0xf]  ;;  %v1756_v22 = vld [vmem:[%s2824_s1 + $0x84] sm:$0xf0]  ;;  %v1166_v31 = vor.u32 %v1740_v16, %v1165_v14 }
  0x15   :  { %938 = vmatpush.bf16.msra.mxu1 %v1254_v57  ;;  %v1477_v23 = vld [vmem:[%s2824_s1 + $0x270] sm:$0xf]  ;;  %v1818_v24 = vld [vmem:[%s2824_s1 + $0x274] sm:$0xf0]  ;;  %v1366_v27 = vor.u32 %v1790_v18, %v1365_v17  ;;  %v1293_v28 = vld [vmem:[%s2824_s1 + $0x100] sm:$0xf]  ;;  %v1230_v35 = vor.u32 %v1756_v22, %v1229_v21 }
  0x16   :  { %951 = vmatpush.bf16.msra.mxu2 %v1318_v58  ;;  %v1541_v25 = vld [vmem:[%s2824_s1 + $0x2f0] sm:$0xf]  ;;  %v1834_v26 = vld [vmem:[%s2824_s1 + $0x2f4] sm:$0xf0]  ;;  %v1772_v29 = vld [vmem:[%s2824_s1 + $0x104] sm:$0xf0]  ;;  %v1478_v36 = vor.u32 %v1818_v24, %v1477_v23 }
  0x17   :  { %964 = vmatpush.bf16.msra.mxu3 %v1382_v1  ;;  %v1605_v30 = vld [vmem:[%s2824_s1 + $0x370] sm:$0xf]  ;;  %v1850_v32 = vld [vmem:[%s2824_s1 + $0x374] sm:$0xf0]  ;;  %v1357_v33 = vld [vmem:[%s2824_s1 + $0x180] sm:$0xf]  ;;  %v1542_v39 = vor.u32 %v1834_v26, %v1541_v25  ;;  %v1294_v40 = vor.u32 %v1772_v29, %v1293_v28 }
  0x18   :  { %926 = vmatpush.bf16.msra.mxu0 %v1182_v2  ;;  %v1788_v34 = vld [vmem:[%s2824_s1 + $0x184] sm:$0xf0]  ;;  %v1669_v37 = vld [vmem:[%s2824_s1 + $0x3f0] sm:$0xf]  ;;  %v1866_v38 = vld [vmem:[%s2824_s1 + $0x3f4] sm:$0xf0]  ;;  %v1606_v43 = vor.u32 %v1850_v32, %v1605_v30 }
  0x19   :  { %939 = vmatpush.bf16.msra.mxu1 %v1246_v5  ;;  %v1469_v41 = vld [vmem:[%s2824_s1 + $0x260] sm:$0xf]  ;;  %v1816_v42 = vld [vmem:[%s2824_s1 + $0x264] sm:$0xf0]  ;;  %v1358_v44 = vor.u32 %v1788_v34, %v1357_v33  ;;  %v1670_v47 = vor.u32 %v1866_v38, %v1669_v37  ;;  %v1461_v54 = vld [vmem:[%s2824_s1 + $0x250] sm:$0xf] }
  0x1a   :  { %952 = vmatpush.bf16.msra.mxu2 %v1310_v6  ;;  %v1533_v45 = vld [vmem:[%s2824_s1 + $0x2e0] sm:$0xf]  ;;  %v1832_v46 = vld [vmem:[%s2824_s1 + $0x2e4] sm:$0xf0]  ;;  %v1470_v50 = vor.u32 %v1816_v42, %v1469_v41  ;;  %v1814_v55 = vld [vmem:[%s2824_s1 + $0x254] sm:$0xf0] }
  0x1b   :  { %965 = vmatpush.bf16.msra.mxu3 %v1374_v13  ;;  %v1597_v48 = vld [vmem:[%s2824_s1 + $0x360] sm:$0xf]  ;;  %v1848_v49 = vld [vmem:[%s2824_s1 + $0x364] sm:$0xf0]  ;;  %v1534_v53 = vor.u32 %v1832_v46, %v1533_v45  ;;  %v1525_v58 = vld [vmem:[%s2824_s1 + $0x2d0] sm:$0xf]  ;;  %v1462_v4 = vor.u32 %v1814_v55, %v1461_v54 }
  0x1c   :  { %927 = vmatpush.bf16.msra.mxu0 %v1174_v15  ;;  %v1661_v51 = vld [vmem:[%s2824_s1 + $0x3e0] sm:$0xf]  ;;  %v1864_v52 = vld [vmem:[%s2824_s1 + $0x3e4] sm:$0xf0]  ;;  %v1598_v57 = vor.u32 %v1848_v49, %v1597_v48  ;;  %v1830_v59 = vld [vmem:[%s2824_s1 + $0x2d4] sm:$0xf0] }
  0x1d   :  { %940 = vmatpush.bf16.msra.mxu1 %v1238_v19  ;;  %v15_v56 = vld [vmem:[%s2825_s0 + $0x8] sm:$0xff]  ;;  %v14_v61 = vld [vmem:[%s2825_s0] sm:$0xff]  ;;  %v1662_v63 = vor.u32 %v1864_v52, %v1661_v51  ;;  %v1589_v0 = vld [vmem:[%s2824_s1 + $0x350] sm:$0xf]  ;;  %v1526_v9 = vor.u32 %v1830_v59, %v1525_v58 }
  0x1e   :  { %953 = vmatpush.bf16.msra.mxu2 %v1302_v20  ;;  %v176_v60 = vunpack.c.l.b16 %v15_v56  ;;  %v177_v62 = vunpack.c.h.b16 %v15_v56  ;;  %v1846_v1 = vld [vmem:[%s2824_s1 + $0x354] sm:$0xf0]  ;;  %v174_v2 = vunpack.c.l.b16 %v14_v61  ;;  %v175_v3 = vunpack.c.h.b16 %v14_v61  ;;  %v1653_v5 = vld [vmem:[%s2824_s1 + $0x3d0] sm:$0xf]  ;;  %v1453_v10 = vld [vmem:[%s2824_s1 + $0x240] sm:$0xf] }
  0x1f   :  { %966 = vmatpush.bf16.msra.mxu3 %v1366_v27  ;;  %v1862_v6 = vld [vmem:[%s2824_s1 + $0x3d4] sm:$0xf0]  ;;  %v1812_v11 = vld [vmem:[%s2824_s1 + $0x244] sm:$0xf0]  ;;  %v1590_v14 = vor.u32 %v1846_v1, %v1589_v0  ;;  %v1517_v15 = vld [vmem:[%s2824_s1 + $0x2c0] sm:$0xf] }
  0x20   :  { %928 = vmatpush.bf16.msra.mxu0 %v1166_v31  ;;  %v2173_v7 = vpack.c.b16 %v176_v60, %v176_v60  ;;  %v2175_v8 = vpack.c.b16 %v177_v62, %v177_v62  ;;  %v2183_v12 = vpack.c.b16 %v174_v2, %v174_v2  ;;  %v2185_v13 = vpack.c.b16 %v175_v3, %v175_v3  ;;  %v1828_v16 = vld [vmem:[%s2824_s1 + $0x2c4] sm:$0xf0]  ;;  %v1581_v18 = vld [vmem:[%s2824_s1 + $0x340] sm:$0xf]  ;;  %v1445_v24 = vld [vmem:[%s2824_s1 + $0x230] sm:$0xf] }
  0x21   :  { %941 = vmatpush.bf16.msra.mxu1 %v1230_v35  ;;  %v1654_v17 = vor.u32 %v1862_v6, %v1653_v5  ;;  %v1844_v19 = vld [vmem:[%s2824_s1 + $0x344] sm:$0xf0]  ;;  %v1454_v20 = vor.u32 %v1812_v11, %v1453_v10  ;;  %v1645_v21 = vld [vmem:[%s2824_s1 + $0x3c0] sm:$0xf]  ;;  %v1518_v23 = vor.u32 %v1828_v16, %v1517_v15  ;;  %v1810_v25 = vld [vmem:[%s2824_s1 + $0x234] sm:$0xf0] }
  0x22   :  { %954 = vmatpush.bf16.msra.mxu2 %v1294_v40  ;;  %v1860_v22 = vld [vmem:[%s2824_s1 + $0x3c4] sm:$0xf0]  ;;  %v1582_v26 = vor.u32 %v1844_v19, %v1581_v18  ;;  %v1509_v27 = vld [vmem:[%s2824_s1 + $0x2b0] sm:$0xf]  ;;  %v1826_v28 = vld [vmem:[%s2824_s1 + $0x2b4] sm:$0xf0]  ;;  %v1446_v32 = vor.u32 %v1810_v25, %v1445_v24 }
  0x23   :  { %967 = vmatpush.bf16.msra.mxu3 %v1358_v44  ;;  %929 = vmatmul.bf16.vlgmr.msra.gmra.mxu0 %v2183_v12  ;;  %v1646_v29 = vor.u32 %v1860_v22, %v1645_v21  ;;  %v1573_v30 = vld [vmem:[%s2824_s1 + $0x330] sm:$0xf]  ;;  %v1842_v31 = vld [vmem:[%s2824_s1 + $0x334] sm:$0xf0]  ;;  %v1510_v35 = vor.u32 %v1826_v28, %v1509_v27  ;;  %v1808_v37 = vld [vmem:[%s2824_s1 + $0x224] sm:$0xf0] }
  0x24   :  { %973 = vmatpush.bf16.msrb.mxu0 %v1478_v36  ;;  %942 = vmatmul.bf16.vlgmr.msra.gmra.mxu1 %v2185_v13  ;;  %v1637_v33 = vld [vmem:[%s2824_s1 + $0x3b0] sm:$0xf]  ;;  %v1858_v34 = vld [vmem:[%s2824_s1 + $0x3b4] sm:$0xf0]  ;;  %v1437_v36 = vld [vmem:[%s2824_s1 + $0x220] sm:$0xf]  ;;  %v1574_v38 = vor.u32 %v1842_v31, %v1573_v30 }
  0x25   :  { %986 = vmatpush.bf16.msrb.mxu1 %v1542_v39  ;;  %955 = vmatmul.bf16.vlgmr.msra.gmra.mxu2 %v2173_v7  ;;  %v1501_v39 = vld [vmem:[%s2824_s1 + $0x2a0] sm:$0xf]  ;;  %v1824_v40 = vld [vmem:[%s2824_s1 + $0x2a4] sm:$0xf0]  ;;  %v1638_v41 = vor.u32 %v1858_v34, %v1637_v33  ;;  %v1438_v44 = vor.u32 %v1808_v37, %v1437_v36  ;;  %v1429_v48 = vld [vmem:[%s2824_s1 + $0x210] sm:$0xf] }
  0x26   :  { %999 = vmatpush.bf16.msrb.mxu2 %v1606_v43  ;;  %968 = vmatmul.bf16.vlgmr.msra.gmra.mxu3 %v2175_v8  ;;  %v1565_v42 = vld [vmem:[%s2824_s1 + $0x320] sm:$0xf]  ;;  %v1840_v43 = vld [vmem:[%s2824_s1 + $0x324] sm:$0xf0]  ;;  %v1806_v49 = vld [vmem:[%s2824_s1 + $0x214] sm:$0xf0] }
  0x27   :  { %1012 = vmatpush.bf16.msrb.mxu3 %v1670_v47  ;;  %v1629_v45 = vld [vmem:[%s2824_s1 + $0x3a0] sm:$0xf]  ;;  %v1856_v46 = vld [vmem:[%s2824_s1 + $0x3a4] sm:$0xf0]  ;;  %v1502_v47 = vor.u32 %v1824_v40, %v1501_v39  ;;  %v1493_v51 = vld [vmem:[%s2824_s1 + $0x290] sm:$0xf]  ;;  %v1430_v58 = vor.u32 %v1806_v49, %v1429_v48 }
  0x28   :  { %974 = vmatpush.bf16.msrb.mxu0 %v1470_v50  ;;  %v1566_v50 = vor.u32 %v1840_v43, %v1565_v42  ;;  %v1822_v52 = vld [vmem:[%s2824_s1 + $0x294] sm:$0xf0]  ;;  %v1630_v54 = vor.u32 %v1856_v46, %v1629_v45  ;;  %v1421_v56 = vld [vmem:[%s2824_s1 + $0x200] sm:$0xf]  ;;  %v1820_v60 = vld [vmem:[%s2824_s1 + $0x284] sm:$0xf0] }
  0x29   :  { %987 = vmatpush.bf16.msrb.mxu1 %v1534_v53  ;;  %v1557_v53 = vld [vmem:[%s2824_s1 + $0x310] sm:$0xf]  ;;  %v1838_v55 = vld [vmem:[%s2824_s1 + $0x314] sm:$0xf0]  ;;  %v1485_v59 = vld [vmem:[%s2824_s1 + $0x280] sm:$0xf] }
  0x2a   :  { %1000 = vmatpush.bf16.msrb.mxu2 %v1598_v57  ;;  %v1804_v57 = vld [vmem:[%s2824_s1 + $0x204] sm:$0xf0]  ;;  %v1621_v61 = vld [vmem:[%s2824_s1 + $0x390] sm:$0xf]  ;;  %v1854_v62 = vld [vmem:[%s2824_s1 + $0x394] sm:$0xf0]  ;;  %v1558_v3 = vor.u32 %v1838_v55, %v1557_v53 }
  0x2b   :  { %1013 = vmatpush.bf16.msrb.mxu3 %v1662_v63  ;;  %v1494_v63 = vor.u32 %v1822_v52, %v1493_v51  ;;  %v1733_v0 = vld [vmem:[%s2824_s1 + $0x470] sm:$0xf]  ;;  %v1882_v1 = vld [vmem:[%s2824_s1 + $0x474] sm:$0xf0]  ;;  %v1223_v5 = vld [vmem:[%s2824_s1 + $0x78] sm:$0xf0]  ;;  %v1422_v15 = vor.u32 %v1804_v57, %v1421_v56 }
  0x2c   :  { %975 = vmatpush.bf16.msrb.mxu0 %v1462_v4  ;;  %v16_v2 = vld [vmem:[%s2825_s0 + $0x10] sm:$0xff]  ;;  %v17_v6 = vld [vmem:[%s2825_s0 + $0x18] sm:$0xff]  ;;  %v1549_v10 = vld [vmem:[%s2824_s1 + $0x300] sm:$0xf]  ;;  %v1734_v21 = vor.u32 %v1882_v1, %v1733_v0 }
  0x2d   :  { %988 = vmatpush.bf16.msrb.mxu1 %v1526_v9  ;;  %v1753_v4 = vld [vmem:[%s2824_s1 + $0x74] sm:$0xf]  ;;  %v1622_v9 = vor.u32 %v1854_v62, %v1621_v61  ;;  %v1836_v11 = vld [vmem:[%s2824_s1 + $0x304] sm:$0xf0]  ;;  %v1287_v16 = vld [vmem:[%s2824_s1 + $0xf8] sm:$0xf0]  ;;  %v178_v19 = vunpack.c.l.b16 %v16_v2  ;;  %v180_v24 = vunpack.c.l.b16 %v17_v6  ;;  %v179_v34 = vunpack.c.h.b16 %v16_v2 }
  0x2e   :  { %1001 = vmatpush.bf16.msrb.mxu2 %v1590_v14  ;;  %v1769_v14 = vld [vmem:[%s2824_s1 + $0xf4] sm:$0xf]  ;;  %v1852_v18 = vld [vmem:[%s2824_s1 + $0x384] sm:$0xf0]  ;;  %v1226_v25 = vor.u32 %v1753_v4, %v1223_v5  ;;  %v1725_v27 = vld [vmem:[%s2824_s1 + $0x460] sm:$0xf] }
  0x2f   :  { %1014 = vmatpush.bf16.msrb.mxu3 %v1654_v17  ;;  %v1613_v17 = vld [vmem:[%s2824_s1 + $0x380] sm:$0xf]  ;;  %v1785_v22 = vld [vmem:[%s2824_s1 + $0x174] sm:$0xf]  ;;  %v1880_v28 = vld [vmem:[%s2824_s1 + $0x464] sm:$0xf0]  ;;  %v1290_v30 = vor.u32 %v1769_v14, %v1287_v16  ;;  %v2355_v40 = vpack.c.b16 %v180_v24, %v180_v24 }
  0x30   :  { %976 = vmatpush.bf16.msrb.mxu0 %v1454_v20  ;;  %v1486_v20 = vor.u32 %v1820_v60, %v1485_v59  ;;  %v1614_v31 = vor.u32 %v1852_v18, %v1613_v17  ;;  %v1215_v33 = vld [vmem:[%s2824_s1 + $0x68] sm:$0xf0]  ;;  %v1767_v36 = vld [vmem:[%s2824_s1 + $0xe4] sm:$0xf]  ;;  %v1726_v39 = vor.u32 %v1880_v28, %v1725_v27  ;;  %v1717_v45 = vld [vmem:[%s2824_s1 + $0x450] sm:$0xf] }
  0x31   :  { %989 = vmatpush.bf16.msrb.mxu1 %v1518_v23  ;;  %v1351_v23 = vld [vmem:[%s2824_s1 + $0x178] sm:$0xf0]  ;;  %v1279_v37 = vld [vmem:[%s2824_s1 + $0xe8] sm:$0xf0]  ;;  %v1878_v46 = vld [vmem:[%s2824_s1 + $0x454] sm:$0xf0] }
  0x32   :  { %1002 = vmatpush.bf16.msrb.mxu2 %v1582_v26  ;;  %v1550_v26 = vor.u32 %v1836_v11, %v1549_v10  ;;  %v1343_v42 = vld [vmem:[%s2824_s1 + $0x168] sm:$0xf0]  ;;  %v1749_v48 = vld [vmem:[%s2824_s1 + $0x54] sm:$0xf]  ;;  %v1207_v49 = vld [vmem:[%s2824_s1 + $0x58] sm:$0xf0] }
  0x33   :  { %1015 = vmatpush.bf16.msrb.mxu3 %v1646_v29  ;;  %v181_v29 = vunpack.c.h.b16 %v17_v6  ;;  %v1765_v52 = vld [vmem:[%s2824_s1 + $0xd4] sm:$0xf]  ;;  %v1271_v53 = vld [vmem:[%s2824_s1 + $0xd8] sm:$0xf0]  ;;  %v1210_v57 = vor.u32 %v1749_v48, %v1207_v49  ;;  %v1876_v59 = vld [vmem:[%s2824_s1 + $0x444] sm:$0xf0] }
  0x34   :  { %977 = vmatpush.bf16.msrb.mxu0 %v1446_v32  ;;  %v1751_v32 = vld [vmem:[%s2824_s1 + $0x64] sm:$0xf]  ;;  %v1781_v55 = vld [vmem:[%s2824_s1 + $0x154] sm:$0xf]  ;;  %v1335_v56 = vld [vmem:[%s2824_s1 + $0x158] sm:$0xf0]  ;;  %v1274_v60 = vor.u32 %v1765_v52, %v1271_v53 }
  0x35   :  { %990 = vmatpush.bf16.msrb.mxu1 %v1510_v35  ;;  %v1354_v35 = vor.u32 %v1785_v22, %v1351_v23  ;;  %v1218_v43 = vor.u32 %v1751_v32, %v1215_v33  ;;  %v1747_v61 = vld [vmem:[%s2824_s1 + $0x44] sm:$0xf]  ;;  %v1199_v62 = vld [vmem:[%s2824_s1 + $0x48] sm:$0xf0]  ;;  %v1701_v6 = vld [vmem:[%s2824_s1 + $0x430] sm:$0xf] }
  0x36   :  { %1003 = vmatpush.bf16.msrb.mxu2 %v1574_v38  ;;  %v2353_v38 = vpack.c.b16 %v178_v19, %v178_v19  ;;  %v1763_v0 = vld [vmem:[%s2824_s1 + $0xc4] sm:$0xf]  ;;  %v1263_v1 = vld [vmem:[%s2824_s1 + $0xc8] sm:$0xf0]  ;;  %v1202_v5 = vor.u32 %v1747_v61, %v1199_v62  ;;  %v1745_v11 = vld [vmem:[%s2824_s1 + $0x34] sm:$0xf] }
  0x37   :  { %1016 = vmatpush.bf16.msrb.mxu3 %v1638_v41  ;;  %v1783_v41 = vld [vmem:[%s2824_s1 + $0x164] sm:$0xf]  ;;  %v1327_v4 = vld [vmem:[%s2824_s1 + $0x148] sm:$0xf0]  ;;  %v1266_v10 = vor.u32 %v1763_v0, %v1263_v1  ;;  %v1191_v14 = vld [vmem:[%s2824_s1 + $0x38] sm:$0xf0] }
  0x38   :  { %978 = vmatpush.bf16.msrb.mxu0 %v1438_v44  ;;  %v2363_v44 = vpack.c.b16 %v181_v29, %v181_v29  ;;  %v1346_v51 = vor.u32 %v1783_v41, %v1343_v42  ;;  %v1761_v16 = vld [vmem:[%s2824_s1 + $0xb4] sm:$0xf]  ;;  %v1255_v17 = vld [vmem:[%s2824_s1 + $0xb8] sm:$0xf0]  ;;  %v1693_v22 = vld [vmem:[%s2824_s1 + $0x420] sm:$0xf] }
  0x39   :  { %991 = vmatpush.bf16.msrb.mxu1 %v1502_v47  ;;  %v1282_v47 = vor.u32 %v1767_v36, %v1279_v37  ;;  %v1777_v19 = vld [vmem:[%s2824_s1 + $0x134] sm:$0xf]  ;;  %v1872_v23 = vld [vmem:[%s2824_s1 + $0x424] sm:$0xf0]  ;;  %v1258_v24 = vor.u32 %v1761_v16, %v1255_v17  ;;  %v1759_v28 = vld [vmem:[%s2824_s1 + $0xa4] sm:$0xf] }
  0x3a   :  { %1004 = vmatpush.bf16.msrb.mxu2 %v1566_v50  ;;  %v2377_v50 = vpack.c.b16 %v179_v34, %v179_v34  ;;  %v1247_v29 = vld [vmem:[%s2824_s1 + $0xa8] sm:$0xf0]  ;;  %v1685_v34 = vld [vmem:[%s2824_s1 + $0x410] sm:$0xf]  ;;  %v1741_v37 = vld [vmem:[%s2824_s1 + $0x14] sm:$0xf] }
  0x3b   :  { %1017 = vmatpush.bf16.msrb.mxu3 %v1630_v54  ;;  %v1718_v54 = vor.u32 %v1878_v46, %v1717_v45  ;;  %v1311_v32 = vld [vmem:[%s2824_s1 + $0x128] sm:$0xf0]  ;;  %v1250_v36 = vor.u32 %v1759_v28, %v1247_v29  ;;  %v1757_v42 = vld [vmem:[%s2824_s1 + $0x94] sm:$0xf]  ;;  %v1677_v45 = vld [vmem:[%s2824_s1 + $0x400] sm:$0xf] }
  0x3c   :  { %979 = vmatpush.bf16.msrb.mxu0 %v1430_v58  ;;  %v1709_v58 = vld [vmem:[%s2824_s1 + $0x440] sm:$0xf]  ;;  %v1303_v48 = vld [vmem:[%s2824_s1 + $0x118] sm:$0xf0]  ;;  %v1868_v52 = vld [vmem:[%s2824_s1 + $0x404] sm:$0xf0] }
  0x3d   :  { %992 = vmatpush.bf16.msrb.mxu1 %v1494_v63  ;;  %v1338_v63 = vor.u32 %v1781_v55, %v1335_v56  ;;  %v1710_v2 = vor.u32 %v1876_v59, %v1709_v58  ;;  %v18_v49 = vld [vmem:[%s2825_s0 + $0x20] sm:$0xf]  ;;  %v1739_v53 = vld [vmem:[%s2824_s1 + $0x4] sm:$0xf]  ;;  %v1801_v56 = vld [vmem:[%s2824_s1 + $0x1f4] sm:$0xf]  ;;  %v1678_v0 = vor.u32 %v1868_v52, %v1677_v45 }
  0x3e   :  { %1005 = vmatpush.bf16.msrb.mxu2 %v1558_v3  ;;  %v1779_v3 = vld [vmem:[%s2824_s1 + $0x144] sm:$0xf]  ;;  %v1817_v58 = vld [vmem:[%s2824_s1 + $0x274] sm:$0xf]  ;;  %v1231_v62 = vld [vmem:[%s2824_s1 + $0x88] sm:$0xf0] }
  0x3f   :  { %1018 = vmatpush.bf16.msrb.mxu3 %v1622_v9  ;;  %v1874_v9 = vld [vmem:[%s2824_s1 + $0x434] sm:$0xf0]  ;;  %v1755_v61 = vld [vmem:[%s2824_s1 + $0x84] sm:$0xf]  ;;  %v1833_v1 = vld [vmem:[%s2824_s1 + $0x2f4] sm:$0xf] }
  0x40   :  { %980 = vmatpush.bf16.msrb.mxu0 %v1422_v15  ;;  %v1330_v15 = vor.u32 %v1779_v3, %v1327_v4  ;;  %v1702_v18 = vor.u32 %v1874_v9, %v1701_v6  ;;  %v1295_v6 = vld [vmem:[%s2824_s1 + $0x108] sm:$0xf0]  ;;  %v1799_v9 = vld [vmem:[%s2824_s1 + $0x1e4] sm:$0xf]  ;;  %v1607_v16 = vld [vmem:[%s2824_s1 + $0x378] sm:$0xf0] }
  0x41   :  { %993 = vmatpush.bf16.msrb.mxu1 %v1486_v20  ;;  %v1319_v20 = vld [vmem:[%s2824_s1 + $0x138] sm:$0xf0]  ;;  %v1847_v29 = vld [vmem:[%s2824_s1 + $0x364] sm:$0xf]  ;;  %v1793_v52 = vld [vmem:[%s2824_s1 + $0x1b4] sm:$0xf] }
  0x42   :  { %1006 = vmatpush.bf16.msrb.mxu2 %v1550_v26  ;;  %v1183_v26 = vld [vmem:[%s2824_s1 + $0x28] sm:$0xf0]  ;;  %v1322_v27 = vor.u32 %v1777_v19, %v1319_v20  ;;  %v1815_v19 = vld [vmem:[%s2824_s1 + $0x264] sm:$0xf]  ;;  %v1399_v28 = vld [vmem:[%s2824_s1 + $0x1d8] sm:$0xf0] }
  0x43   :  { %1019 = vmatpush.bf16.msrb.mxu3 %v1614_v31  ;;  %981 = vmatmul.bf16.vlgmr.msrb.gmra.mxu0 %v2353_v38  ;;  %v1775_v31 = vld [vmem:[%s2824_s1 + $0x124] sm:$0xf]  ;;  %v1471_v20 = vld [vmem:[%s2824_s1 + $0x268] sm:$0xf0] }
  0x44   :  { %1025 = vmatpush.bf16.msra.mxu0 %v1734_v21  ;;  %994 = vmatmul.bf16.vlgmr.msrb.gmra.mxu1 %v2377_v50  ;;  %v1194_v21 = vor.u32 %v1745_v11, %v1191_v14  ;;  %v1314_v41 = vor.u32 %v1775_v31, %v1311_v32  ;;  %v1234_v11 = vor.u32 %v1755_v61, %v1231_v62  ;;  %v1407_v14 = vld [vmem:[%s2824_s1 + $0x1e8] sm:$0xf0]  ;;  %v1813_v32 = vld [vmem:[%s2824_s1 + $0x254] sm:$0xf] }
  0x45   :  { %1038 = vmatpush.bf16.msra.mxu1 %v1226_v25  ;;  %1007 = vmatmul.bf16.vlgmr.msrb.gmra.mxu2 %v2355_v40  ;;  %v1743_v25 = vld [vmem:[%s2824_s1 + $0x24] sm:$0xf] }
  0x46   :  { %1051 = vmatpush.bf16.msra.mxu2 %v1290_v30  ;;  %1020 = vmatmul.bf16.vlgmr.msrb.gmra.mxu3 %v2363_v44  ;;  %v1694_v30 = vor.u32 %v1872_v23, %v1693_v22  ;;  %v1186_v33 = vor.u32 %v1743_v25, %v1183_v26  ;;  %v1831_v22 = vld [vmem:[%s2824_s1 + $0x2e4] sm:$0xf]  ;;  %v1535_v23 = vld [vmem:[%s2824_s1 + $0x2e8] sm:$0xf0]  ;;  %v1797_v26 = vld [vmem:[%s2824_s1 + $0x1d4] sm:$0xf] }
  0x47   :  { %1064 = vmatpush.bf16.msra.mxu3 %v1354_v35  ;;  %v1870_v35 = vld [vmem:[%s2824_s1 + $0x414] sm:$0xf0]  ;;  %v1538_v31 = vor.u32 %v1831_v22, %v1535_v23  ;;  %v1805_v22 = vld [vmem:[%s2824_s1 + $0x214] sm:$0xf]  ;;  %v1431_v23 = vld [vmem:[%s2824_s1 + $0x218] sm:$0xf0] }
  0x48   :  { %1026 = vmatpush.bf16.msra.mxu0 %v1726_v39  ;;  %v1175_v39 = vld [vmem:[%s2824_s1 + $0x18] sm:$0xf0]  ;;  %v1686_v46 = vor.u32 %v1870_v35, %v1685_v34  ;;  %v1829_v34 = vld [vmem:[%s2824_s1 + $0x2d4] sm:$0xf] }
  0x49   :  { %1039 = vmatpush.bf16.msra.mxu1 %v1218_v43  ;;  %v1239_v43 = vld [vmem:[%s2824_s1 + $0x98] sm:$0xf0] }
  0x4a   :  { %1052 = vmatpush.bf16.msra.mxu2 %v1282_v47  ;;  %v1773_v47 = vld [vmem:[%s2824_s1 + $0x114] sm:$0xf]  ;;  %v1242_v55 = vor.u32 %v1757_v42, %v1239_v43  ;;  %v1527_v35 = vld [vmem:[%s2824_s1 + $0x2d8] sm:$0xf0]  ;;  %v1391_v42 = vld [vmem:[%s2824_s1 + $0x1c8] sm:$0xf0] }
  0x4b   :  { %1065 = vmatpush.bf16.msra.mxu3 %v1346_v51  ;;  %v1178_v51 = vor.u32 %v1741_v37, %v1175_v39  ;;  %v1306_v59 = vor.u32 %v1773_v47, %v1303_v48  ;;  %v1795_v39 = vld [vmem:[%s2824_s1 + $0x1c4] sm:$0xf]  ;;  %v1845_v43 = vld [vmem:[%s2824_s1 + $0x354] sm:$0xf]  ;;  %v1530_v45 = vor.u32 %v1829_v34, %v1527_v35  ;;  %v1455_v47 = vld [vmem:[%s2824_s1 + $0x248] sm:$0xf0] }
  0x4c   :  { %1027 = vmatpush.bf16.msra.mxu0 %v1718_v54  ;;  %v1167_v54 = vld [vmem:[%s2824_s1 + $0x8] sm:$0xf0]  ;;  %v1827_v48 = vld [vmem:[%s2824_s1 + $0x2c4] sm:$0xf]  ;;  %v1559_v34 = vld [vmem:[%s2824_s1 + $0x318] sm:$0xf0] }
  0x4d   :  { %1040 = vmatpush.bf16.msra.mxu1 %v1210_v57  ;;  %v1415_v57 = vld [vmem:[%s2824_s1 + $0x1f8] sm:$0xf0]  ;;  %v1170_v3 = vor.u32 %v1739_v53, %v1167_v54  ;;  %v1843_v54 = vld [vmem:[%s2824_s1 + $0x344] sm:$0xf] }
  0x4e   :  { %1053 = vmatpush.bf16.msra.mxu2 %v1274_v60  ;;  %v1479_v60 = vld [vmem:[%s2824_s1 + $0x278] sm:$0xf0]  ;;  %v1418_v4 = vor.u32 %v1801_v56, %v1415_v57  ;;  %v1809_v57 = vld [vmem:[%s2824_s1 + $0x234] sm:$0xf] }
  0x4f   :  { %1066 = vmatpush.bf16.msra.mxu3 %v1338_v63  ;;  %v182_v63 = vunpack.c.l.b16 %v18_v49  ;;  %v1394_v49 = vor.u32 %v1795_v39, %v1391_v42  ;;  %v1881_v39 = vld [vmem:[%s2824_s1 + $0x474] sm:$0xf]  ;;  %v1819_v42 = vld [vmem:[%s2824_s1 + $0x284] sm:$0xf] }
  0x50   :  { %1028 = vmatpush.bf16.msra.mxu0 %v1710_v2  ;;  %v1543_v2 = vld [vmem:[%s2824_s1 + $0x2f8] sm:$0xf0] }
  0x51   :  { %1041 = vmatpush.bf16.msra.mxu1 %v1202_v5  ;;  %v1771_v5 = vld [vmem:[%s2824_s1 + $0x104] sm:$0xf]  ;;  %v2548_v17 = vpack.c.b16 %v182_v63, %v182_v63 }
  0x52   :  { %1054 = vmatpush.bf16.msra.mxu2 %v1266_v10  ;;  %v1482_v10 = vor.u32 %v1817_v58, %v1479_v60  ;;  %v1447_v58 = vld [vmem:[%s2824_s1 + $0x238] sm:$0xf0]  ;;  %v1791_v63 = vld [vmem:[%s2824_s1 + $0x1a4] sm:$0xf] }
  0x53   :  { %1067 = vmatpush.bf16.msra.mxu3 %v1330_v15  ;;  %v1849_v15 = vld [vmem:[%s2824_s1 + $0x374] sm:$0xf]  ;;  %v1511_v60 = vld [vmem:[%s2824_s1 + $0x2b8] sm:$0xf0] }
  0x54   :  { %1029 = vmatpush.bf16.msra.mxu0 %v1702_v18  ;;  %v1546_v18 = vor.u32 %v1833_v1, %v1543_v2  ;;  %v1610_v25 = vor.u32 %v1849_v15, %v1607_v16  ;;  %v1375_v1 = vld [vmem:[%s2824_s1 + $0x1a8] sm:$0xf0]  ;;  %v1841_v2 = vld [vmem:[%s2824_s1 + $0x334] sm:$0xf] }
  0x55   :  { %1042 = vmatpush.bf16.msra.mxu1 %v1194_v21  ;;  %v1298_v21 = vor.u32 %v1771_v5, %v1295_v6  ;;  %v1807_v5 = vld [vmem:[%s2824_s1 + $0x224] sm:$0xf]  ;;  %v1439_v6 = vld [vmem:[%s2824_s1 + $0x228] sm:$0xf0]  ;;  %v1789_v15 = vld [vmem:[%s2824_s1 + $0x194] sm:$0xf] }
  0x56   :  { %1055 = vmatpush.bf16.msra.mxu2 %v1258_v24  ;;  %v1410_v24 = vor.u32 %v1799_v9, %v1407_v14  ;;  %v1823_v9 = vld [vmem:[%s2824_s1 + $0x2a4] sm:$0xf]  ;;  %v1442_v16 = vor.u32 %v1807_v5, %v1439_v6  ;;  %v1703_v5 = vld [vmem:[%s2824_s1 + $0x438] sm:$0xf0] }
  0x57   :  { %1068 = vmatpush.bf16.msra.mxu3 %v1322_v27  ;;  %v1474_v27 = vor.u32 %v1815_v19, %v1471_v20  ;;  %v1839_v19 = vld [vmem:[%s2824_s1 + $0x324] sm:$0xf]  ;;  %v1567_v20 = vld [vmem:[%s2824_s1 + $0x328] sm:$0xf0] }
  0x58   :  { %1030 = vmatpush.bf16.msra.mxu0 %v1694_v30  ;;  %v1599_v30 = vld [vmem:[%s2824_s1 + $0x368] sm:$0xf0] }
  0x59   :  { %1043 = vmatpush.bf16.msra.mxu1 %v1186_v33  ;;  %v1463_v33 = vld [vmem:[%s2824_s1 + $0x258] sm:$0xf0]  ;;  %v1602_v37 = vor.u32 %v1847_v29, %v1599_v30  ;;  %v1359_v29 = vld [vmem:[%s2824_s1 + $0x188] sm:$0xf0]  ;;  %v1803_v30 = vld [vmem:[%s2824_s1 + $0x204] sm:$0xf] }
  0x5a   :  { %1056 = vmatpush.bf16.msra.mxu2 %v1250_v36  ;;  %v1402_v36 = vor.u32 %v1797_v26, %v1399_v28  ;;  %v1787_v28 = vld [vmem:[%s2824_s1 + $0x184] sm:$0xf] }
  0x5b   :  { %1069 = vmatpush.bf16.msra.mxu3 %v1314_v41  ;;  %v1466_v41 = vor.u32 %v1813_v32, %v1463_v33  ;;  %v1423_v32 = vld [vmem:[%s2824_s1 + $0x208] sm:$0xf0]  ;;  %v1837_v33 = vld [vmem:[%s2824_s1 + $0x314] sm:$0xf] }
  0x5c   :  { %1031 = vmatpush.bf16.msra.mxu0 %v1686_v46  ;;  %v1811_v46 = vld [vmem:[%s2824_s1 + $0x244] sm:$0xf] }
  0x5d   :  { %1044 = vmatpush.bf16.msra.mxu1 %v1178_v51  ;;  %v1458_v53 = vor.u32 %v1811_v46, %v1455_v47  ;;  %v1426_v46 = vor.u32 %v1803_v30, %v1423_v32 }
  0x5e   :  { %1057 = vmatpush.bf16.msra.mxu2 %v1242_v55  ;;  %v1583_v55 = vld [vmem:[%s2824_s1 + $0x348] sm:$0xf0] }
  0x5f   :  { %1070 = vmatpush.bf16.msra.mxu3 %v1306_v59  ;;  %v1825_v59 = vld [vmem:[%s2824_s1 + $0x2b4] sm:$0xf]  ;;  %v1586_v62 = vor.u32 %v1843_v54, %v1583_v55  ;;  %v1727_v54 = vld [vmem:[%s2824_s1 + $0x468] sm:$0xf0] }
  0x60   :  { %1032 = vmatpush.bf16.msra.mxu0 %v1678_v0  ;;  %v1450_v0 = vor.u32 %v1809_v57, %v1447_v58  ;;  %v1861_v58 = vld [vmem:[%s2824_s1 + $0x3d4] sm:$0xf] }
  0x61   :  { %1045 = vmatpush.bf16.msra.mxu1 %v1170_v3  ;;  %v1575_v3 = vld [vmem:[%s2824_s1 + $0x338] sm:$0xf0] }
  0x62   :  { %1058 = vmatpush.bf16.msra.mxu2 %v1234_v11  ;;  %v1378_v11 = vor.u32 %v1791_v63, %v1375_v1  ;;  %v1578_v14 = vor.u32 %v1841_v2, %v1575_v3  ;;  %v1857_v3 = vld [vmem:[%s2824_s1 + $0x3b4] sm:$0xf] }
  0x63   :  { %1033 = vmatmul.bf16.vlgmr.msra.gmra.mxu0 %v2548_v17  ;;  %1071 = vmatpush.bf16.msra.mxu3 %v1298_v21 }
  0x64   :  { %1077 = vmatpush.bf16.msrb.mxu0 %v1418_v4  ;;  %1046 = vmatmul.bf16.vlgmr.msra.gmra.mxu1 %v2183_v12  ;;  %v1591_v12 = vld [vmem:[%s2824_s1 + $0x358] sm:$0xf0]  ;;  %v1514_v4 = vor.u32 %v1825_v59, %v1511_v60  ;;  %v1877_v60 = vld [vmem:[%s2824_s1 + $0x454] sm:$0xf] }
  0x65   :  { %1090 = vmatpush.bf16.msrb.mxu1 %v1482_v10  ;;  %1059 = vmatmul.bf16.vlgmr.msra.gmra.mxu2 %v2185_v13  ;;  %v1519_v13 = vld [vmem:[%s2824_s1 + $0x2c8] sm:$0xf0]  ;;  %v1594_v51 = vor.u32 %v1845_v43, %v1591_v12  ;;  %v1362_v12 = vor.u32 %v1787_v28, %v1359_v29  ;;  %v1655_v59 = vld [vmem:[%s2824_s1 + $0x3d8] sm:$0xf0] }
  0x66   :  { %1103 = vmatpush.bf16.msrb.mxu2 %v1546_v18  ;;  %1072 = vmatmul.bf16.vlgmr.msra.gmra.mxu3 %v2173_v7  ;;  %v1383_v7 = vld [vmem:[%s2824_s1 + $0x1b8] sm:$0xf0]  ;;  %v1522_v56 = vor.u32 %v1827_v48, %v1519_v13  ;;  %v1503_v10 = vld [vmem:[%s2824_s1 + $0x2a8] sm:$0xf0]  ;;  %v1835_v48 = vld [vmem:[%s2824_s1 + $0x304] sm:$0xf] }
  0x67   :  { %1116 = vmatpush.bf16.msrb.mxu3 %v1610_v25  ;;  %v1386_v61 = vor.u32 %v1793_v52, %v1383_v7  ;;  %v1367_v18 = vld [vmem:[%s2824_s1 + $0x198] sm:$0xf0]  ;;  %v1506_v21 = vor.u32 %v1823_v9, %v1503_v10  ;;  %v1487_v43 = vld [vmem:[%s2824_s1 + $0x288] sm:$0xf0]  ;;  %v1863_v52 = vld [vmem:[%s2824_s1 + $0x3e4] sm:$0xf] }
  0x68   :  { %1078 = vmatpush.bf16.msrb.mxu0 %v1410_v24  ;;  %v1821_v24 = vld [vmem:[%s2824_s1 + $0x294] sm:$0xf]  ;;  %v1495_v25 = vld [vmem:[%s2824_s1 + $0x298] sm:$0xf0]  ;;  %v1370_v26 = vor.u32 %v1789_v15, %v1367_v18  ;;  %v1551_v13 = vld [vmem:[%s2824_s1 + $0x308] sm:$0xf0] }
  0x69   :  { %1091 = vmatpush.bf16.msrb.mxu1 %v1474_v27  ;;  %v1570_v27 = vor.u32 %v1839_v19, %v1567_v20  ;;  %v1498_v35 = vor.u32 %v1821_v24, %v1495_v25  ;;  %v1879_v7 = vld [vmem:[%s2824_s1 + $0x464] sm:$0xf]  ;;  %v1554_v55 = vor.u32 %v1835_v48, %v1551_v13  ;;  %v1695_v15 = vld [vmem:[%s2824_s1 + $0x428] sm:$0xf0]  ;;  %v1853_v19 = vld [vmem:[%s2824_s1 + $0x394] sm:$0xf] }
  0x6a   :  { %1104 = vmatpush.bf16.msrb.mxu2 %v1538_v31  ;;  %v1434_v31 = vor.u32 %v1805_v22, %v1431_v23  ;;  %v1730_v57 = vor.u32 %v1879_v7, %v1727_v54  ;;  %v1855_v10 = vld [vmem:[%s2824_s1 + $0x3a4] sm:$0xf]  ;;  %v1623_v20 = vld [vmem:[%s2824_s1 + $0x398] sm:$0xf0]  ;;  %v1679_v28 = vld [vmem:[%s2824_s1 + $0x408] sm:$0xf0] }
  0x6b   :  { %1117 = vmatpush.bf16.msrb.mxu3 %v1602_v37  ;;  %v1671_v37 = vld [vmem:[%s2824_s1 + $0x3f8] sm:$0xf0]  ;;  %v1626_v23 = vor.u32 %v1853_v19, %v1623_v20  ;;  %v1851_v25 = vld [vmem:[%s2824_s1 + $0x384] sm:$0xf] }
  0x6c   :  { %1079 = vmatpush.bf16.msrb.mxu0 %v1402_v36  ;;  %v1865_v36 = vld [vmem:[%s2824_s1 + $0x3f4] sm:$0xf]  ;;  %v1687_v22 = vld [vmem:[%s2824_s1 + $0x418] sm:$0xf0] }
  0x6d   :  { %1092 = vmatpush.bf16.msrb.mxu1 %v1466_v41  ;;  %v1735_v41 = vld [vmem:[%s2824_s1 + $0x478] sm:$0xf0]  ;;  %v1674_v47 = vor.u32 %v1865_v36, %v1671_v37 }
  0x6e   :  { %1105 = vmatpush.bf16.msrb.mxu2 %v1530_v45  ;;  %v1562_v45 = vor.u32 %v1837_v33, %v1559_v34 }
  0x6f   :  { %1118 = vmatpush.bf16.msrb.mxu3 %v1594_v51  ;;  %v1490_v51 = vor.u32 %v1819_v42, %v1487_v43 }
  0x70   :  { %1080 = vmatpush.bf16.msrb.mxu0 %v1394_v49  ;;  %v1738_v49 = vor.u32 %v1881_v39, %v1735_v41 }
  0x71   :  { %1093 = vmatpush.bf16.msrb.mxu1 %v1458_v53  ;;  %v1663_v53 = vld [vmem:[%s2824_s1 + $0x3e8] sm:$0xf0] }
  0x72   :  { %1106 = vmatpush.bf16.msrb.mxu2 %v1522_v56  ;;  %v1666_v56 = vor.u32 %v1863_v52, %v1663_v53 }
  0x73   :  { %1119 = vmatpush.bf16.msrb.mxu3 %v1586_v62  ;;  %v1658_v62 = vor.u32 %v1861_v58, %v1655_v59 }
  0x74   :  { %1081 = vmatpush.bf16.msrb.mxu0 %v1386_v61  ;;  %v1719_v61 = vld [vmem:[%s2824_s1 + $0x458] sm:$0xf0] }
  0x75   :  { %1094 = vmatpush.bf16.msrb.mxu1 %v1450_v0  ;;  %v1722_v63 = vor.u32 %v1877_v60, %v1719_v61  ;;  %v1647_v0 = vld [vmem:[%s2824_s1 + $0x3c8] sm:$0xf0] }
  0x76   :  { %1107 = vmatpush.bf16.msrb.mxu2 %v1514_v4  ;;  %v1873_v4 = vld [vmem:[%s2824_s1 + $0x434] sm:$0xf] }
  0x77   :  { %1120 = vmatpush.bf16.msrb.mxu3 %v1578_v14  ;;  %v1706_v9 = vor.u32 %v1873_v4, %v1703_v5  ;;  %v1871_v14 = vld [vmem:[%s2824_s1 + $0x424] sm:$0xf] }
  0x78   :  { %1082 = vmatpush.bf16.msrb.mxu0 %v1378_v11  ;;  %v1631_v11 = vld [vmem:[%s2824_s1 + $0x3a8] sm:$0xf0]  ;;  %v1698_v18 = vor.u32 %v1871_v14, %v1695_v15 }
  0x79   :  { %1095 = vmatpush.bf16.msrb.mxu1 %v1442_v16  ;;  %v1634_v16 = vor.u32 %v1855_v10, %v1631_v11 }
  0x7a   :  { %1108 = vmatpush.bf16.msrb.mxu2 %v1506_v21  ;;  %v1869_v21 = vld [vmem:[%s2824_s1 + $0x414] sm:$0xf] }
  0x7b   :  { %1121 = vmatpush.bf16.msrb.mxu3 %v1570_v27  ;;  %v1690_v24 = vor.u32 %v1869_v21, %v1687_v22  ;;  %v1867_v27 = vld [vmem:[%s2824_s1 + $0x404] sm:$0xf] }
  0x7c   :  { %1083 = vmatpush.bf16.msrb.mxu0 %v1370_v26  ;;  %v1615_v26 = vld [vmem:[%s2824_s1 + $0x388] sm:$0xf0]  ;;  %v1682_v30 = vor.u32 %v1867_v27, %v1679_v28 }
  0x7d   :  { %1096 = vmatpush.bf16.msrb.mxu1 %v1434_v31  ;;  %v1618_v29 = vor.u32 %v1851_v25, %v1615_v26  ;;  %v163_v31 = vld [vmem:[%s2826_s2] sm:$0x3] }
  0x7e   :  { %1109 = vmatpush.bf16.msrb.mxu2 %v1498_v35  ;;  %v165_v32 = vperm.slane %v163_v31, 0 }
  0x7f   :  { %1122 = vmatpush.bf16.msrb.mxu3 %v1562_v45 }
  0x80   :  { %1084 = vmatpush.bf16.msrb.mxu0 %v1362_v12 }
  0x81   :  { %1097 = vmatpush.bf16.msrb.mxu1 %v1426_v46 }
  0x82   :  { %1110 = vmatpush.bf16.msrb.mxu2 %v1490_v51 }
  0x83   :  { %1085 = vmatmul.bf16.vlgmr.msrb.gmra.mxu0 %v2175_v8  ;;  %1123 = vmatpush.bf16.msrb.mxu3 %v1554_v55  ;;  %v1859_v8 = vld [vmem:[%s2824_s1 + $0x3c4] sm:$0xf] }
  0x84   :  { %1129 = vmatpush.bf16.msra.mxu0 %v1674_v47  ;;  %1098 = vmatmul.bf16.vlgmr.msrb.gmra.mxu1 %v2353_v38  ;;  %v1875_v38 = vld [vmem:[%s2824_s1 + $0x444] sm:$0xf]  ;;  %v1650_v1 = vor.u32 %v1859_v8, %v1647_v0  ;;  %v166_v8 = vperm.slane %v163_v31, 1 }
  0x85   :  { %1142 = vmatpush.bf16.msra.mxu1 %v1738_v49  ;;  %1111 = vmatmul.bf16.vlgmr.msrb.gmra.mxu2 %v2377_v50  ;;  %v1711_v50 = vld [vmem:[%s2824_s1 + $0x448] sm:$0xf0] }
  0x86   :  { %1124 = vmatmul.bf16.vlgmr.msrb.gmra.mxu3 %v2355_v40  ;;  %v1714_v2 = vor.u32 %v1875_v38, %v1711_v50  ;;  %v1639_v40 = vld [vmem:[%s2824_s1 + $0x3b8] sm:$0xf0] }
  0x87   :  { %v1642_v6 = vor.u32 %v1857_v3, %v1639_v40 }
  0x88   :  { %1130 = vmatpush.bf16.msra.mxu0 %v1666_v56 }
  0x89   :  { %1143 = vmatpush.bf16.msra.mxu1 %v1730_v57 }
  0x8c   :  { %1131 = vmatpush.bf16.msra.mxu0 %v1658_v62 }
  0x8d   :  { %1144 = vmatpush.bf16.msra.mxu1 %v1722_v63 }
  0x90   :  { %1132 = vmatpush.bf16.msra.mxu0 %v1650_v1 }
  0x91   :  { %1145 = vmatpush.bf16.msra.mxu1 %v1714_v2 }
  0x94   :  { %1133 = vmatpush.bf16.msra.mxu0 %v1642_v6 }
  0x95   :  { %1146 = vmatpush.bf16.msra.mxu1 %v1706_v9 }
  0x98   :  { %1134 = vmatpush.bf16.msra.mxu0 %v1634_v16 }
  0x99   :  { %1147 = vmatpush.bf16.msra.mxu1 %v1698_v18 }
  0x9c   :  { %1135 = vmatpush.bf16.msra.mxu0 %v1626_v23 }
  0x9d   :  { %1148 = vmatpush.bf16.msra.mxu1 %v1690_v24 }
  0xa0   :  { %1136 = vmatpush.bf16.msra.mxu0 %v1618_v29  ;;  %v930_v34 = vpop.f32.mrf.mxu0 }
  0xa1   :  { %1149 = vmatpush.bf16.msra.mxu1 %v1682_v30  ;;  %v943_v33 = vpop.f32.mrf.mxu1  ;;  %v931_v35 = vadd.f32 %v930_v34, %v165_v32 }
  0xa3   :  { %1137 = vmatmul.bf16.vlgmr.msra.gmra.mxu0 %v2363_v44  ;;  %v944_v36 = vadd.f32 %v943_v33, %v931_v35 }
  0xa4   :  { %1150 = vmatmul.bf16.vlgmr.msra.gmra.mxu1 %v2548_v17 }
  0xa8   :  { %v956_v39 = vpop.f32.mrf.mxu2  ;;  %v932_v12 = vpop.f32.mrf.mxu0 }
  0xa9   :  { %v969_v37 = vpop.f32.mrf.mxu3  ;;  %v957_v41 = vadd.f32 %v956_v39, %v944_v36  ;;  %v945_v43 = vpop.f32.mrf.mxu1 }
  0xab   :  { %v970_v42 = vadd.f32 %v969_v37, %v957_v41 }
  0xb0   :  { %v958_v46 = vpop.f32.mrf.mxu2 }
  0xb1   :  { %v971_v45 = vpop.f32.mrf.mxu3 }
  0xc0   :  { %v982_v44 = vpop.f32.mrf.mxu0 }
  0xc1   :  { %v983_v47 = vadd.f32 %v982_v44, %v970_v42  ;;  %v995_v17 = vpop.f32.mrf.mxu1 }
  0xc3   :  { %v996_v48 = vadd.f32 %v995_v17, %v983_v47 }
  0xc8   :  { %v1008_v13 = vpop.f32.mrf.mxu2  ;;  %v984_v52 = vpop.f32.mrf.mxu0 }
  0xc9   :  { %v1009_v49 = vadd.f32 %v1008_v13, %v996_v48  ;;  %v1021_v51 = vpop.f32.mrf.mxu3  ;;  %v997_v7 = vpop.f32.mrf.mxu1 }
  0xcb   :  { %v1022_v53 = vadd.f32 %v1021_v51, %v1009_v49 }
  0xd0   :  { %v1010_v54 = vpop.f32.mrf.mxu2 }
  0xd1   :  { %v1023_v55 = vpop.f32.mrf.mxu3 }
  0xe0   :  { %v1034_v56 = vpop.f32.mrf.mxu0 }
  0xe1   :  { %v1047_v57 = vpop.f32.mrf.mxu1  ;;  %v1035_v18 = vadd.f32 %v1034_v56, %v1022_v53 }
  0xe2   :  { %v1048_v50 = vadd.f32 %v1047_v57, %v166_v8 }
  0xe3   :  { %v1155_v22 = vmax.f32 %v1035_v18, 0.0 }
  0xe8   :  { %v1036_v58 = vpop.f32.mrf.mxu0  ;;  %v1060_v59 = vpop.f32.mrf.mxu2 }
  0xe9   :  { %v1049_v60 = vpop.f32.mrf.mxu1  ;;  %v1073_v61 = vpop.f32.mrf.mxu3  ;;  %v1061_v1 = vadd.f32 %v1060_v59, %v1048_v50 }
  0xeb   :  { %v1074_v5 = vadd.f32 %v1073_v61, %v1061_v1 }
  0xf0   :  { %v1062_v62 = vpop.f32.mrf.mxu2 }
  0xf1   :  { %v1075_v63 = vpop.f32.mrf.mxu3 }
 0x100   :  { %v1086_v0 = vpop.f32.mrf.mxu0 }
 0x101   :  { %v1099_v38 = vpop.f32.mrf.mxu1  ;;  %v1087_v6 = vadd.f32 %v1086_v0, %v1074_v5 }
 0x103   :  { %v1100_v11 = vadd.f32 %v1099_v38, %v1087_v6 }
 0x108   :  { %v1112_v2 = vpop.f32.mrf.mxu2  ;;  %v1088_v3 = vpop.f32.mrf.mxu0 }
 0x109   :  { %v1101_v40 = vpop.f32.mrf.mxu1  ;;  %v1125_v4 = vpop.f32.mrf.mxu3  ;;  %v1113_v14 = vadd.f32 %v1112_v2, %v1100_v11 }
 0x10b   :  { %v1126_v15 = vadd.f32 %v1125_v4, %v1113_v14 }
 0x110   :  { %v1114_v9 = vpop.f32.mrf.mxu2 }
 0x111   :  { %v1127_v10 = vpop.f32.mrf.mxu3 }
 0x120   :  { %v1138_v16 = vpop.f32.mrf.mxu0 }
 0x121   :  { %v1139_v19 = vadd.f32 %v1138_v16, %v1126_v15  ;;  %v1151_v20 = vpop.f32.mrf.mxu1 }
 0x123   :  { %v1152_v21 = vadd.f32 %v1151_v20, %v1139_v19 }
 0x125   :  { %v1156_v23 = vmax.f32 %v1152_v21, 0.0 }
 0x127   :  { %v1157_v24 = vpack.c.bf16 %v1156_v23, %v1155_v22 }
 0x128   :  { %v1140_v25 = vpop.f32.mrf.mxu0 }
 0x129   :  { %1158 = vst [vmem:[%s2827_s3] sm:$0xff] %v1157_v24  ;;  %v1153_v26 = vpop.f32.mrf.mxu1 }

// kernel: forward.16
= control target key start
LH: loop header
LB: loop body
LE: loop exit
PB: predicated region body
PF: predicated region fallthrough
CT: control target
= control target key end

     0   :  { %s445_s12 = smov 0   ;;  %s495_s0 = inlined_call_operand.vmem [shape: bf16[128,36], index: 0, kind: input, shape index: {}]   ;;  %s496_s1 = inlined_call_operand.vmem [shape: bf16[36,32], index: 1, kind: input, shape index: {}]   ;;  %s497_s2 = inlined_call_operand.vmem [shape: f32[1,32], index: 2, kind: input, shape index: {}]   ;;  %s498_s3 = inlined_call_operand.vmem [shape: bf16[128,32], index: 3, kind: output, shape index: {}]  }
   0x1 LB: > { %s354_s13 = sadd.s32 4294967295, %s423_s12   ;;  %p358_p0 = scmp.ge.s32.totalorder %s423_s12, 1  ;;  %s423_s12 = sphi %s445_s12, %s13_s12  }
   0x2   : > { %p138_p1 = scmp.lt.s32.totalorder %s423_s12, 3 }
   0x4   : > { %p139_p2 = pnand %p358_p0, %p138_p1 }
   0x5   : > { %s359_s16 = sshll.u32 (!%p139_p2), %s354_s13, 3 }
   0x6   : > { %142 = sbr.rel (%p139_p2) target bundleno = 177 (0xb1), region = 32  ;;  %p163_p3 = scmp.lt.s32.totalorder (!%p139_p2), %s359_s16, 15 }
   0xb   : > { %v187_v0 = vld [vmem:[%s496_s1 + $0x10] sm:$0x3]  ;;  %vm240_vm0 = vcmask 1041408   ;;  %s500_s16 = smov (!%p163_p3, %s359_s16), 15  ;;  %v398_v4 = vld [vmem:[%s496_s1 + $0x8] sm:$0xff]  ;;  %v397_v5 = vld [vmem:[%s496_s1] sm:$0xff] }
   0xc   : > { %v221_v1 = vunpack.c.l.b16 %v187_v0  ;;  %s360_s19 = sshll.u32 %s500_s16, 2  ;;  %vm227_vm1 = vcmask 293888   ;;  %v416_v10 = vld [vmem:[%s497_s2] ss:$0 sm:$0xff]  ;;  %vm289_vm2 = vcmask 257024  }
   0xd   : > { %s166_s24 = scalar_lea.vmem %s495_s0, %s360_s19  ;;  %s474_s29 = scalar_lea.vmem %s498_s3, %s360_s19 }
   0xe   : > { %v224_v2 = vpack.c.b16 %v221_v1, %v221_v1  ;;  %v393_v6 = vld [vmem:[%s166_s24] sm:$0xff]  ;;  %v394_v7 = vld [vmem:[%s166_s24 + $0x8] sm:$0xff]  ;;  %v395_v8 = vld [vmem:[%s166_s24 + $0x10] sm:$0xff] }
   0xf   : > { %v396_v9 = vld [vmem:[%s166_s24 + $0x18] sm:$0xff] }
  0x10   : > { %v242_v3 = vsel %vm240_vm0, %v224_v2, 0 }
  0x11   : > { %249 = vmatpush.bf16.msra.mxu0 %v242_v3  ;;  %399 = vmatpush.bf16.msra.mxu1 %v242_v3 }
  0x12   : > { %400 = vmatpush.bf16.msra.mxu2 %v242_v3  ;;  %401 = vmatpush.bf16.msra.mxu3 %v242_v3 }
  0x15   : > { %250 = vmatpush.bf16.msra.mxu0 %v398_v4  ;;  %402 = vmatpush.bf16.msra.mxu1 %v398_v4 }
  0x16   : > { %403 = vmatpush.bf16.msra.mxu2 %v398_v4  ;;  %404 = vmatpush.bf16.msra.mxu3 %v398_v4 }
  0x19   : > { %251 = vmatpush.bf16.msra.mxu0 %v397_v5  ;;  %405 = vmatpush.bf16.msra.mxu1 %v397_v5 }
  0x1a   : > { %406 = vmatpush.bf16.msra.mxu2 %v397_v5  ;;  %407 = vmatpush.bf16.msra.mxu3 %v397_v5 }
  0x1c   : > { %387 = vmatmul.msk.bf16.vlgmr.msra.gmra.mxu0 %vm227_vm1, %v393_v6  ;;  %388 = vmatmul.msk.bf16.vlgmr.msra.gmra.mxu1 %vm227_vm1, %v394_v7 }
  0x1d   : > { %389 = vmatmul.msk.bf16.vlgmr.msra.gmra.mxu2 %vm227_vm1, %v395_v8  ;;  %390 = vmatmul.msk.bf16.vlgmr.msra.gmra.mxu3 %vm227_vm1, %v396_v9 }
  0x99   : > { %v253_v11 = vpop.f32.mrf.mxu0  ;;  %v258_v12 = vpop.f32.mrf.mxu1 }
  0x9a   : > { %v254_v13 = vadd.f32 %v416_v10, %v253_v11  ;;  %v259_v14 = vadd.f32 %v416_v10, %v258_v12 }
  0x9c   : > { %v273_v15 = vmax.f32 %v254_v13, 0.0  ;;  %v275_v16 = vmax.f32 %v259_v14, 0.0 }
  0x9e   : > { %v281_v17 = vpack.c.bf16 %v273_v15, %v273_v15  ;;  %v283_v18 = vpack.c.bf16 %v275_v16, %v275_v16 }
  0xa0   : > { %290 = vst.msk [vmem:[%s474_s29] sm:$0xf] %vm289_vm2, %v281_v17  ;;  %v263_v19 = vpop.f32.mrf.mxu2  ;;  %v268_v20 = vpop.f32.mrf.mxu3 }
  0xa1   : > { %292 = vst.msk [vmem:[%s474_s29 + $0x8] sm:$0xf] %vm289_vm2, %v283_v18  ;;  %v264_v21 = vadd.f32 %v416_v10, %v263_v19  ;;  %v269_v22 = vadd.f32 %v416_v10, %v268_v20  ;;  %v255_v23 = vpop.f32.mrf.mxu0  ;;  %v260_v24 = vpop.f32.mrf.mxu1 }
  0xa2   : > { %v256_v25 = vadd.f32 %v416_v10, %v255_v23  ;;  %v261_v26 = vadd.f32 %v416_v10, %v260_v24 }
  0xa3   : > { %v277_v27 = vmax.f32 %v264_v21, 0.0  ;;  %v279_v28 = vmax.f32 %v269_v22, 0.0 }
  0xa4   : > { %v274_v29 = vmax.f32 %v256_v25, 0.0  ;;  %v276_v30 = vmax.f32 %v261_v26, 0.0 }
  0xa5   : > { %v285_v31 = vpack.c.bf16 %v277_v27, %v277_v27  ;;  %v287_v32 = vpack.c.bf16 %v279_v28, %v279_v28 }
  0xa6   : > { %v282_v33 = vpack.c.bf16 %v274_v29, %v274_v29  ;;  %v284_v34 = vpack.c.bf16 %v276_v30, %v276_v30 }
  0xa7   : > { %294 = vst.msk [vmem:[%s474_s29 + $0x10] sm:$0xf] %vm289_vm2, %v285_v31 }
  0xa8   : > { %296 = vst.msk [vmem:[%s474_s29 + $0x18] sm:$0xf] %vm289_vm2, %v287_v32  ;;  %v265_v35 = vpop.f32.mrf.mxu2  ;;  %v270_v36 = vpop.f32.mrf.mxu3 }
  0xa9   : > { %291 = vst.msk [vmem:[%s474_s29 + $0x4] sm:$0xf] %vm289_vm2, %v282_v33  ;;  %v266_v37 = vadd.f32 %v416_v10, %v265_v35  ;;  %v271_v38 = vadd.f32 %v416_v10, %v270_v36 }
  0xaa   : > { %293 = vst.msk [vmem:[%s474_s29 + $0xc] sm:$0xf] %vm289_vm2, %v284_v34 }
  0xab   : > { %v278_v39 = vmax.f32 %v266_v37, 0.0  ;;  %v280_v40 = vmax.f32 %v271_v38, 0.0 }
  0xad   : > { %v286_v41 = vpack.c.bf16 %v278_v39, %v278_v39  ;;  %v288_v42 = vpack.c.bf16 %v280_v40, %v280_v40 }
  0xaf   : > { %295 = vst.msk [vmem:[%s474_s29 + $0x14] sm:$0xf] %vm289_vm2, %v286_v41 }
  0xb0   : > { %297 = vst.msk [vmem:[%s474_s29 + $0x1c] sm:$0xf] %vm289_vm2, %v288_v42 }
  0xb1 PF: > { %s13_s12 = sadd.s32 1, %s423_s12  }
  0xb2   : > { %p10_p4 = scmp.ge.s32.totalorder %s13_s12, 4  }
  0xb4   :  { %12 = sbr.rel (!%p10_p4) target bundleno = 1 (0x1), region = 62 }

// kernel: forward.17
= control target key start
LH: loop header
LB: loop body
LE: loop exit
PB: predicated region body
PF: predicated region fallthrough
CT: control target
= control target key end

     0   :  { %s609_s12 = smov 0   ;;  %s687_s0 = inlined_call_operand.vmem [shape: bf16[32,288], index: 0, kind: input, shape index: {}]   ;;  %s688_s1 = inlined_call_operand.vmem [shape: bf16[288,64], index: 1, kind: input, shape index: {}]   ;;  %s689_s2 = inlined_call_operand.vmem [shape: f32[1,64], index: 2, kind: input, shape index: {}]   ;;  %s690_s3 = inlined_call_operand.vmem [shape: bf16[32,64], index: 3, kind: output, shape index: {}]  }
   0x1 LB: > { %s454_s13 = sadd.s32 4294967295, %s587_s12   ;;  %p458_p0 = scmp.ge.s32.totalorder %s587_s12, 1  ;;  %s587_s12 = sphi %s609_s12, %s13_s12  }
   0x2   : > { %p139_p1 = scmp.lt.s32.totalorder %s587_s12, 3 }
   0x4   : > { %p140_p2 = pnand %p458_p0, %p139_p1 }
   0x5   : > { %s459_s18 = sshll.u32 (!%p140_p2), %s454_s13, 1 }
   0x6   : > { %143 = sbr.rel (%p140_p2) target bundleno = 188 (0xbc), region = 32  ;;  %p165_p3 = scmp.lt.s32.totalorder (!%p140_p2), %s459_s18, 3 }
   0xb   : > { %v560_v0 = vld [vmem:[%s688_s1 + $0x38] sm:$0xff]  ;;  %v559_v2 = vld [vmem:[%s688_s1 + $0x30] sm:$0xff]  ;;  %v570_v4 = vld [vmem:[%s688_s1 + $0x88] sm:$0xff]  ;;  %s692_s18 = smov (!%p165_p3, %s459_s18), 3  ;;  %vm345_vm0 = vcmask 261120   ;;  %vm395_vm1 = vcmask 519168  }
   0xc   : > { %v568_v1 = vld [vmem:[%s688_s1 + $0x78] sm:$0xff]  ;;  %349 = vmatpush.bf16.msra.mxu0 %v560_v0  ;;  %v567_v3 = vld [vmem:[%s688_s1 + $0x70] sm:$0xff]  ;;  %383 = vmatpush.bf16.msra.mxu2 %v570_v4  ;;  %v569_v5 = vld [vmem:[%s688_s1 + $0x80] sm:$0xff]  ;;  %s571_s27 = smul.u32 12, %s692_s18  ;;  %s462_s5 = sshll.u32 %s692_s18, 2 }
   0xd   : > { %363 = vmatpush.bf16.msra.mxu1 %v568_v1  ;;  %v558_v6 = vld [vmem:[%s688_s1 + $0x28] sm:$0xff]  ;;  %v557_v11 = vld [vmem:[%s688_s1 + $0x20] sm:$0xff]  ;;  %v556_v13 = vld [vmem:[%s688_s1 + $0x18] sm:$0xff]  ;;  %s175_s8 = scalar_lea.vmem %s690_s3, %s462_s5 }
   0xe   : > { %v566_v7 = vld [vmem:[%s688_s1 + $0x68] sm:$0xff]  ;;  %s169_s7 = scalar_lea.vmem %s687_s0, %s571_s27  ;;  %v565_v12 = vld [vmem:[%s688_s1 + $0x60] sm:$0xff]  ;;  %v564_v14 = vld [vmem:[%s688_s1 + $0x58] sm:$0xff] }
   0xf   : > { %v473_v8 = vld [vmem:[%s169_s7 + $0x8] sm:$0xf]  ;;  %v552_v9 = vld [vmem:[%s169_s7 + $0x10] sm:$0xf0]  ;;  %v553_v19 = vld [vmem:[%s688_s1] sm:$0xff] }
  0x10   : > { %350 = vmatpush.bf16.msra.mxu0 %v559_v2  ;;  %384 = vmatpush.bf16.msra.mxu2 %v569_v5  ;;  %v474_v10 = vor.u32 %v552_v9, %v473_v8  ;;  %v555_v15 = vld [vmem:[%s688_s1 + $0x10] sm:$0xff]  ;;  %v554_v17 = vld [vmem:[%s688_s1 + $0x8] sm:$0xff]  ;;  %v561_v20 = vld [vmem:[%s688_s1 + $0x40] sm:$0xff] }
  0x11   : > { %364 = vmatpush.bf16.msra.mxu1 %v567_v3  ;;  %v563_v16 = vld [vmem:[%s688_s1 + $0x50] sm:$0xff]  ;;  %v562_v18 = vld [vmem:[%s688_s1 + $0x48] sm:$0xff]  ;;  %v465_v21 = vld [vmem:[%s169_s7] sm:$0xf] }
  0x12   : > { %v551_v22 = vld [vmem:[%s169_s7 + $0x8] sm:$0xf0]  ;;  %v550_v23 = vld [vmem:[%s169_s7 + $0x4] sm:$0xf]  ;;  %v467_v24 = vld [vmem:[%s169_s7 + $0xc] sm:$0xf0] }
  0x13   : > { %547 = vmatmul.msk.bf16.vlgmr.msra.gmra.mxu2 %vm345_vm0, %v474_v10  ;;  %v466_v25 = vor.u32 %v551_v22, %v465_v21  ;;  %v470_v26 = vor.u32 %v550_v23, %v467_v24  ;;  %v580_v27 = vld [vmem:[%s689_s2] ss:$0 sm:$0xff] }
  0x14   : > { %351 = vmatpush.bf16.msra.mxu0 %v558_v6 }
  0x15   : > { %365 = vmatpush.bf16.msra.mxu1 %v566_v7 }
  0x18   : > { %352 = vmatpush.bf16.msra.mxu0 %v557_v11 }
  0x19   : > { %366 = vmatpush.bf16.msra.mxu1 %v565_v12 }
  0x1c   : > { %353 = vmatpush.bf16.msra.mxu0 %v556_v13 }
  0x1d   : > { %367 = vmatpush.bf16.msra.mxu1 %v564_v14 }
  0x20   : > { %354 = vmatpush.bf16.msra.mxu0 %v555_v15 }
  0x21   : > { %368 = vmatpush.bf16.msra.mxu1 %v563_v16 }
  0x24   : > { %355 = vmatpush.bf16.msra.mxu0 %v554_v17 }
  0x25   : > { %369 = vmatpush.bf16.msra.mxu1 %v562_v18 }
  0x28   : > { %356 = vmatpush.bf16.msra.mxu0 %v553_v19 }
  0x29   : > { %370 = vmatpush.bf16.msra.mxu1 %v561_v20 }
  0x2b   : > { %357 = vmatmul.bf16.vlgmr.msra.gmra.mxu0 %v466_v25 }
  0x2c   : > { %371 = vmatmul.bf16.vlgmr.msra.gmra.mxu1 %v470_v26 }
  0x96   : > { %v386_v31 = vpop.f32.mrf.mxu2 }
  0x9e   : > { %v388_v40 = vpop.f32.mrf.mxu2 }
  0xa8   : > { %v358_v28 = vpop.f32.mrf.mxu0 }
  0xa9   : > { %v372_v29 = vpop.f32.mrf.mxu1  ;;  %v359_v30 = vadd.f32 %v580_v27, %v358_v28 }
  0xab   : > { %v373_v32 = vadd.f32 %v372_v29, %v359_v30 }
  0xad   : > { %v387_v33 = vadd.f32 %v386_v31, %v373_v32 }
  0xaf   : > { %v391_v34 = vmax.f32 %v387_v33, 0.0 }
  0xb0   : > { %v360_v35 = vpop.f32.mrf.mxu0 }
  0xb1   : > { %v393_v36 = vpack.c.bf16 %v391_v34, %v391_v34  ;;  %v361_v37 = vadd.f32 %v580_v27, %v360_v35  ;;  %v374_v38 = vpop.f32.mrf.mxu1 }
  0xb3   : > { %396 = vst.msk [vmem:[%s175_s8] sm:$0xf] %vm395_vm1, %v393_v36  ;;  %v375_v39 = vadd.f32 %v374_v38, %v361_v37 }
  0xb5   : > { %v389_v41 = vadd.f32 %v388_v40, %v375_v39 }
  0xb7   : > { %v392_v42 = vmax.f32 %v389_v41, 0.0 }
  0xb9   : > { %v394_v43 = vpack.c.bf16 %v392_v42, %v392_v42 }
  0xbb   : > { %397 = vst.msk [vmem:[%s175_s8 + $0x4] sm:$0xf] %vm395_vm1, %v394_v43 }
  0xbc PF: > { %s13_s12 = sadd.s32 1, %s587_s12  }
  0xbd   : > { %p10_p4 = scmp.ge.s32.totalorder %s13_s12, 4  }
  0xbf   :  { %12 = sbr.rel (!%p10_p4) target bundleno = 1 (0x1), region = 62 }

// kernel: forward.19
= control target key start
LH: loop header
LB: loop body
LE: loop exit
PB: predicated region body
PF: predicated region fallthrough
CT: control target
= control target key end

     0   :  { %s1213_s0 = inlined_call_operand.vmem [shape: f32[8,640], index: 0, kind: input, shape index: {}]   ;;  %s1214_s1 = inlined_call_operand.vmem [shape: f32[8,128], index: 1, kind: input, shape index: {}]   ;;  %s1215_s2 = inlined_call_operand.vmem [shape: f32[8,64], index: 2, kind: input, shape index: {}]   ;;  %s1216_s3 = inlined_call_operand.vmem [shape: f32[640,128], index: 3, kind: input, shape index: {}]   ;;  %s1217_s4 = inlined_call_operand.vmem [shape: f32[1,128], index: 4, kind: input, shape index: {}]   ;;  %s1218_s5 = inlined_call_operand.vmem [shape: f32[64,640], index: 5, kind: input, shape index: {}]   ;;  %s1219_s6 = inlined_call_operand.vmem [shape: f32[1,640], index: 6, kind: input, shape index: {}]   ;;  %s1220_s7 = inlined_call_operand.vmem [shape: f32[128,16], index: 7, kind: input, shape index: {}]   ;;  %s1221_s8 = inlined_call_operand.vmem [shape: f32[1,16], index: 8, kind: input, shape index: {}]   ;;  %s1222_s9 = inlined_call_operand.vmem [shape: f32[32,16], index: 9, kind: input, shape index: {}]   ;;  %s1223_s10 = inlined_call_operand.vmem [shape: f32[1,16], index: 10, kind: input, shape index: {}]   ;;  %s1224_s11 = inlined_call_operand.vmem [shape: f32[16,64], index: 11, kind: input, shape index: {}]   ;;  %s1225_s12 = inlined_call_operand.vmem [shape: f32[16,64], index: 12, kind: input, shape index: {}]   ;;  %s1226_s13 = inlined_call_operand.vmem [shape: f32[1,64], index: 13, kind: input, shape index: {}]   ;;  %s1227_s14 = inlined_call_operand.vmem [shape: f32[8,128], index: 14, kind: output, shape index: {0}]   ;;  %s1228_s15 = inlined_call_operand.hbm [shape: f32[8,64], index: 15, kind: output, shape index: {1}]   ;;  %s1229_s16 = inlined_call_operand.vmem [shape: f32[8,640], index: 16, kind: output, shape index: {2}]   ;;  %s1230_s17 = inlined_call_operand.vmem [shape: f32[8,64], index: 17, kind: output, shape index: {3}]  }
   0x1   :  { %1232 = sst [smem:[#allocation5_spill]] %s1213_s0 }
   0x2   :  { %1233 = sst [smem:[#allocation6_spill]] %s1214_s1 }
   0x3   :  { %v72_v0 = vld [vmem:[%s1216_s3 + $0x78] sm:$0xff]  ;;  %v71_v1 = vld [vmem:[%s1216_s3 + $0x70] sm:$0xff]  ;;  %v70_v2 = vld [vmem:[%s1216_s3 + $0x68] sm:$0xff] }
   0x4   :  { %141 = vmatpush.msra.mxu0 %v72_v0  ;;  %v104_v3 = vld [vmem:[%s1216_s3 + $0x178] sm:$0xff]  ;;  %v69_v4 = vld [vmem:[%s1216_s3 + $0x60] sm:$0xff]  ;;  %v103_v5 = vld [vmem:[%s1216_s3 + $0x170] sm:$0xff] }
   0x5   :  { %181 = vmatpush.msra.mxu2 %v104_v3  ;;  %v120_v6 = vld [vmem:[%s1216_s3 + $0x1f8] sm:$0xff]  ;;  %v102_v8 = vld [vmem:[%s1216_s3 + $0x168] sm:$0xff]  ;;  %v119_v10 = vld [vmem:[%s1216_s3 + $0x1f0] sm:$0xff] }
   0x6   :  { %142 = vmatpush.msra.mxu0 %v71_v1  ;;  %201 = vmatpush.msra.mxu3 %v120_v6  ;;  %v88_v7 = vld [vmem:[%s1216_s3 + $0xf8] sm:$0xff]  ;;  %v87_v11 = vld [vmem:[%s1216_s3 + $0xf0] sm:$0xff]  ;;  %v101_v12 = vld [vmem:[%s1216_s3 + $0x160] sm:$0xff] }
   0x7   :  { %v68_v9 = vld [vmem:[%s1216_s3 + $0x58] sm:$0xff]  ;;  %182 = vmatpush.msra.mxu2 %v103_v5  ;;  %161 = vmatpush.msra.mxu1 %v88_v7  ;;  %v118_v13 = vld [vmem:[%s1216_s3 + $0x1e8] sm:$0xff]  ;;  %v67_v14 = vld [vmem:[%s1216_s3 + $0x50] sm:$0xff] }
   0x8   :  { %143 = vmatpush.msra.mxu0 %v70_v2  ;;  %202 = vmatpush.msra.mxu3 %v119_v10  ;;  %v86_v15 = vld [vmem:[%s1216_s3 + $0xe8] sm:$0xff]  ;;  %v117_v16 = vld [vmem:[%s1216_s3 + $0x1e0] sm:$0xff]  ;;  %v100_v17 = vld [vmem:[%s1216_s3 + $0x158] sm:$0xff] }
   0x9   :  { %183 = vmatpush.msra.mxu2 %v102_v8  ;;  %162 = vmatpush.msra.mxu1 %v87_v11  ;;  %v85_v18 = vld [vmem:[%s1216_s3 + $0xe0] sm:$0xff]  ;;  %v66_v19 = vld [vmem:[%s1216_s3 + $0x48] sm:$0xff]  ;;  %v116_v20 = vld [vmem:[%s1216_s3 + $0x1d8] sm:$0xff] }
   0xa   :  { %144 = vmatpush.msra.mxu0 %v69_v4  ;;  %203 = vmatpush.msra.mxu3 %v118_v13  ;;  %v99_v21 = vld [vmem:[%s1216_s3 + $0x150] sm:$0xff]  ;;  %v84_v22 = vld [vmem:[%s1216_s3 + $0xd8] sm:$0xff]  ;;  %v65_v23 = vld [vmem:[%s1216_s3 + $0x40] sm:$0xff] }
   0xb   :  { %184 = vmatpush.msra.mxu2 %v101_v12  ;;  %163 = vmatpush.msra.mxu1 %v86_v15  ;;  %v115_v24 = vld [vmem:[%s1216_s3 + $0x1d0] sm:$0xff]  ;;  %v98_v25 = vld [vmem:[%s1216_s3 + $0x148] sm:$0xff]  ;;  %v64_v27 = vld [vmem:[%s1216_s3 + $0x38] sm:$0xff] }
   0xc   :  { %145 = vmatpush.msra.mxu0 %v68_v9  ;;  %204 = vmatpush.msra.mxu3 %v117_v16  ;;  %v83_v26 = vld [vmem:[%s1216_s3 + $0xd0] sm:$0xff]  ;;  %v114_v28 = vld [vmem:[%s1216_s3 + $0x1c8] sm:$0xff]  ;;  %v97_v29 = vld [vmem:[%s1216_s3 + $0x140] sm:$0xff] }
   0xd   :  { %185 = vmatpush.msra.mxu2 %v100_v17  ;;  %164 = vmatpush.msra.mxu1 %v85_v18  ;;  %v82_v30 = vld [vmem:[%s1216_s3 + $0xc8] sm:$0xff]  ;;  %v63_v31 = vld [vmem:[%s1216_s3 + $0x30] sm:$0xff]  ;;  %v113_v32 = vld [vmem:[%s1216_s3 + $0x1c0] sm:$0xff] }
   0xe   :  { %146 = vmatpush.msra.mxu0 %v67_v14  ;;  %205 = vmatpush.msra.mxu3 %v116_v20  ;;  %v96_v33 = vld [vmem:[%s1216_s3 + $0x138] sm:$0xff]  ;;  %v81_v34 = vld [vmem:[%s1216_s3 + $0xc0] sm:$0xff]  ;;  %v62_v35 = vld [vmem:[%s1216_s3 + $0x28] sm:$0xff] }
   0xf   :  { %186 = vmatpush.msra.mxu2 %v99_v21  ;;  %165 = vmatpush.msra.mxu1 %v84_v22  ;;  %v112_v36 = vld [vmem:[%s1216_s3 + $0x1b8] sm:$0xff]  ;;  %v95_v37 = vld [vmem:[%s1216_s3 + $0x130] sm:$0xff]  ;;  %v61_v39 = vld [vmem:[%s1216_s3 + $0x20] sm:$0xff] }
  0x10   :  { %147 = vmatpush.msra.mxu0 %v66_v19  ;;  %206 = vmatpush.msra.mxu3 %v115_v24  ;;  %v80_v38 = vld [vmem:[%s1216_s3 + $0xb8] sm:$0xff]  ;;  %v111_v40 = vld [vmem:[%s1216_s3 + $0x1b0] sm:$0xff]  ;;  %v94_v41 = vld [vmem:[%s1216_s3 + $0x128] sm:$0xff] }
  0x11   :  { %187 = vmatpush.msra.mxu2 %v98_v25  ;;  %166 = vmatpush.msra.mxu1 %v83_v26  ;;  %v79_v42 = vld [vmem:[%s1216_s3 + $0xb0] sm:$0xff]  ;;  %v60_v43 = vld [vmem:[%s1216_s3 + $0x18] sm:$0xff]  ;;  %v110_v44 = vld [vmem:[%s1216_s3 + $0x1a8] sm:$0xff] }
  0x12   :  { %148 = vmatpush.msra.mxu0 %v65_v23  ;;  %207 = vmatpush.msra.mxu3 %v114_v28  ;;  %v93_v45 = vld [vmem:[%s1216_s3 + $0x120] sm:$0xff]  ;;  %v78_v46 = vld [vmem:[%s1216_s3 + $0xa8] sm:$0xff]  ;;  %v59_v47 = vld [vmem:[%s1216_s3 + $0x10] sm:$0xff] }
  0x13   :  { %188 = vmatpush.msra.mxu2 %v97_v29  ;;  %167 = vmatpush.msra.mxu1 %v82_v30  ;;  %v109_v48 = vld [vmem:[%s1216_s3 + $0x1a0] sm:$0xff]  ;;  %v92_v49 = vld [vmem:[%s1216_s3 + $0x118] sm:$0xff]  ;;  %v58_v51 = vld [vmem:[%s1216_s3 + $0x8] sm:$0xff] }
  0x14   :  { %149 = vmatpush.msra.mxu0 %v64_v27  ;;  %208 = vmatpush.msra.mxu3 %v113_v32  ;;  %v77_v50 = vld [vmem:[%s1216_s3 + $0xa0] sm:$0xff]  ;;  %v108_v53 = vld [vmem:[%s1216_s3 + $0x198] sm:$0xff]  ;;  %v91_v55 = vld [vmem:[%s1216_s3 + $0x110] sm:$0xff] }
  0x15   :  { %189 = vmatpush.msra.mxu2 %v96_v33  ;;  %168 = vmatpush.msra.mxu1 %v81_v34  ;;  %v57_v52 = vld [vmem:[%s1216_s3] sm:$0xff]  ;;  %v136_v54 = vld [vmem:[%s1216_s3 + $0x278] sm:$0xff]  ;;  %v107_v57 = vld [vmem:[%s1216_s3 + $0x190] sm:$0xff] }
  0x16   :  { %150 = vmatpush.msra.mxu0 %v63_v31  ;;  %209 = vmatpush.msra.mxu3 %v112_v36  ;;  %v76_v56 = vld [vmem:[%s1216_s3 + $0x98] sm:$0xff]  ;;  %v90_v58 = vld [vmem:[%s1216_s3 + $0x108] sm:$0xff] }
  0x17   :  { %190 = vmatpush.msra.mxu2 %v95_v37  ;;  %169 = vmatpush.msra.mxu1 %v80_v38 }
  0x18   :  { %151 = vmatpush.msra.mxu0 %v62_v35  ;;  %210 = vmatpush.msra.mxu3 %v111_v40 }
  0x19   :  { %191 = vmatpush.msra.mxu2 %v94_v41  ;;  %170 = vmatpush.msra.mxu1 %v79_v42 }
  0x1a   :  { %152 = vmatpush.msra.mxu0 %v61_v39  ;;  %211 = vmatpush.msra.mxu3 %v110_v44 }
  0x1b   :  { %192 = vmatpush.msra.mxu2 %v93_v45  ;;  %171 = vmatpush.msra.mxu1 %v78_v46 }
  0x1c   :  { %153 = vmatpush.msra.mxu0 %v60_v43  ;;  %212 = vmatpush.msra.mxu3 %v109_v48 }
  0x1d   :  { %193 = vmatpush.msra.mxu2 %v92_v49  ;;  %172 = vmatpush.msra.mxu1 %v77_v50 }
  0x1e   :  { %154 = vmatpush.msra.mxu0 %v59_v47  ;;  %213 = vmatpush.msra.mxu3 %v108_v53 }
  0x20   :  { %155 = vmatpush.msra.mxu0 %v58_v51 }
  0x21   :  { %23 = vsyncpa [#allocation3], 0  ;;  %194 = vmatpush.msra.mxu2 %v91_v55  ;;  %173 = vmatpush.msra.mxu1 %v76_v56  ;;  %v75_v59 = vld [vmem:[%s1216_s3 + $0x90] sm:$0xff]  ;;  %v106_v60 = vld [vmem:[%s1216_s3 + $0x188] sm:$0xff]  ;;  %s1234_s18 = sld [smem:[#allocation5_spill]]  ;;  %s616_s23 = smov 64  }
  0x22   :  { %156 = vmatpush.msra.mxu0 %v57_v52  ;;  %v135_v61 = vld [vmem:[%s1216_s3 + $0x270] sm:$0xff]  ;;  %214 = vmatpush.msra.mxu3 %v107_v57  ;;  %v89_v62 = vld [vmem:[%s1216_s3 + $0x100] sm:$0xff]  ;;  %v74_v0 = vld [vmem:[%s1216_s3 + $0x88] sm:$0xff]  ;;  %vm252_vm0 = vcmask 523264   ;;  %s1235_s21 = sld [smem:[#allocation6_spill]]  ;;  %vm465_vm1 = vcmask 261120  }
  0x23   :  { %195 = vmatpush.msra.mxu2 %v90_v58  ;;  %v134_v1 = vld [vmem:[%s1216_s3 + $0x268] sm:$0xff]  ;;  %174 = vmatpush.msra.mxu1 %v75_v59  ;;  %v105_v2 = vld [vmem:[%s1216_s3 + $0x180] sm:$0xff]  ;;  %v132_v8 = vld [vmem:[%s1216_s3 + $0x258] sm:$0xff]  ;;  %vm492_vm2 = vcmask 130048  }
  0x24   :  { %221 = vmatpush.msrb.mxu0 %v136_v54  ;;  %215 = vmatpush.msra.mxu3 %v106_v60  ;;  %v133_v5 = vld [vmem:[%s1216_s3 + $0x260] sm:$0xff]  ;;  %v131_v9 = vld [vmem:[%s1216_s3 + $0x250] sm:$0xff]  ;;  %v130_v10 = vld [vmem:[%s1216_s3 + $0x248] sm:$0xff] }
  0x25   :  { %196 = vmatpush.msra.mxu2 %v89_v62  ;;  %175 = vmatpush.msra.mxu1 %v74_v0  ;;  %v73_v6 = vld [vmem:[%s1216_s3 + $0x80] sm:$0xff]  ;;  %v128_v12 = vld [vmem:[%s1216_s3 + $0x238] sm:$0xff]  ;;  %v127_v13 = vld [vmem:[%s1216_s3 + $0x230] sm:$0xff] }
  0x26   :  { %222 = vmatpush.msrb.mxu0 %v135_v61  ;;  %216 = vmatpush.msra.mxu3 %v105_v2  ;;  %v129_v11 = vld [vmem:[%s1216_s3 + $0x240] sm:$0xff]  ;;  %v126_v14 = vld [vmem:[%s1216_s3 + $0x228] sm:$0xff]  ;;  %v124_v16 = vld [vmem:[%s1216_s3 + $0x218] sm:$0xff] }
  0x27   :  { %v54_v63 = vld [vmem:[%s1234_s18 + $0x10] sm:$0xff]  ;;  %v52_v3 = vld [vmem:[%s1234_s18] sm:$0xff]  ;;  %v55_v4 = vld [vmem:[%s1234_s18 + $0x18] sm:$0xff]  ;;  %176 = vmatpush.msra.mxu1 %v73_v6 }
  0x28   :  { %197 = vmatmul.f32.vlgmr.msra.gmra.mxu2 %v54_v63  ;;  %223 = vmatpush.msrb.mxu0 %v134_v1  ;;  %v53_v7 = vld [vmem:[%s1234_s18 + $0x8] sm:$0xff]  ;;  %v125_v15 = vld [vmem:[%s1216_s3 + $0x220] sm:$0xff]  ;;  %v123_v17 = vld [vmem:[%s1216_s3 + $0x210] sm:$0xff] }
  0x29   :  { %157 = vmatmul.f32.vlgmr.msra.gmra.mxu0 %v52_v3  ;;  %217 = vmatmul.f32.vlgmr.msra.gmra.mxu3 %v55_v4  ;;  %v122_v18 = vld [vmem:[%s1216_s3 + $0x208] sm:$0xff]  ;;  %v121_v19 = vld [vmem:[%s1216_s3 + $0x200] sm:$0xff]  ;;  %v289_v23 = vld [vmem:[%s1218_s5 + $0x118] sm:$0xff] }
  0x2a   :  { %224 = vmatpush.msrb.mxu0 %v133_v5  ;;  %177 = vmatmul.f32.vlgmr.msra.gmra.mxu1 %v53_v7  ;;  %v56_v20 = vld [vmem:[%s1234_s18 + $0x20] sm:$0xff]  ;;  %v284_v25 = vld [vmem:[%s1218_s5 + $0xf0] sm:$0xff]  ;;  %v285_v26 = vld [vmem:[%s1218_s5 + $0xf8] sm:$0xff] }
  0x2b   :  { %v584_v21 = vld [vmem:[%s1217_s4] ss:$0 sm:$0xff]  ;;  %317 = vmatpush.msrb.mxu1 %v289_v23  ;;  %v279_v27 = vld [vmem:[%s1218_s5 + $0xc8] sm:$0xff]  ;;  %v280_v28 = vld [vmem:[%s1218_s5 + $0xd0] sm:$0xff] }
  0x2c   :  { %225 = vmatpush.msrb.mxu0 %v132_v8  ;;  %v290_v24 = vld [vmem:[%s1218_s5 + $0x120] sm:$0xff]  ;;  %v291_v29 = vld [vmem:[%s1218_s5 + $0x128] sm:$0xff]  ;;  %v281_v35 = vld [vmem:[%s1218_s5 + $0xd8] sm:$0xff] }
  0x2d   :  { %337 = vmatpush.msrb.mxu2 %v290_v24  ;;  %318 = vmatpush.msrb.mxu1 %v284_v25  ;;  %v286_v31 = vld [vmem:[%s1218_s5 + $0x100] sm:$0xff]  ;;  %v275_v34 = vld [vmem:[%s1218_s5 + $0xa8] sm:$0xff]  ;;  %v269_v36 = vld [vmem:[%s1218_s5 + $0x78] sm:$0xff] }
  0x2e   :  { %226 = vmatpush.msrb.mxu0 %v131_v9  ;;  %v274_v33 = vld [vmem:[%s1218_s5 + $0xa0] sm:$0xff]  ;;  %357 = vmatpush.msrb.mxu3 %v291_v29  ;;  %v276_v39 = vld [vmem:[%s1218_s5 + $0xb0] sm:$0xff]  ;;  %v265_v42 = vld [vmem:[%s1218_s5 + $0x58] sm:$0xff] }
  0x2f   :  { %338 = vmatpush.msrb.mxu2 %v285_v26  ;;  %319 = vmatpush.msrb.mxu1 %v279_v27  ;;  %v270_v37 = vld [vmem:[%s1218_s5 + $0x80] sm:$0xff]  ;;  %v264_v41 = vld [vmem:[%s1218_s5 + $0x50] sm:$0xff]  ;;  %v271_v43 = vld [vmem:[%s1218_s5 + $0x88] sm:$0xff] }
  0x30   :  { %227 = vmatpush.msrb.mxu0 %v130_v10  ;;  %358 = vmatpush.msrb.mxu3 %v286_v31  ;;  %v259_v44 = vld [vmem:[%s1218_s5 + $0x28] sm:$0xff]  ;;  %v260_v45 = vld [vmem:[%s1218_s5 + $0x30] sm:$0xff]  ;;  %v266_v47 = vld [vmem:[%s1218_s5 + $0x60] sm:$0xff] }
  0x31   :  { %339 = vmatpush.msrb.mxu2 %v280_v28  ;;  %320 = vmatpush.msrb.mxu1 %v274_v33  ;;  %v254_v49 = vld [vmem:[%s1218_s5] sm:$0xff]  ;;  %v255_v50 = vld [vmem:[%s1218_s5 + $0x8] sm:$0xff]  ;;  %v292_v51 = vld [vmem:[%s1218_s5 + $0x130] sm:$0xff] }
  0x32   :  { %228 = vmatpush.msrb.mxu0 %v129_v11  ;;  %359 = vmatpush.msrb.mxu3 %v281_v35  ;;  %v293_v52 = vld [vmem:[%s1218_s5 + $0x138] sm:$0xff]  ;;  %v287_v54 = vld [vmem:[%s1218_s5 + $0x108] sm:$0xff]  ;;  %v288_v55 = vld [vmem:[%s1218_s5 + $0x110] sm:$0xff] }
  0x33   :  { %340 = vmatpush.msrb.mxu2 %v275_v34  ;;  %321 = vmatpush.msrb.mxu1 %v269_v36  ;;  %v261_v61 = vld [vmem:[%s1218_s5 + $0x38] sm:$0xff]  ;;  %v282_v62 = vld [vmem:[%s1218_s5 + $0xe0] sm:$0xff]  ;;  %v283_v63 = vld [vmem:[%s1218_s5 + $0xe8] sm:$0xff] }
  0x34   :  { %229 = vmatpush.msrb.mxu0 %v128_v12  ;;  %360 = vmatpush.msrb.mxu3 %v276_v39  ;;  %v256_v0 = vld [vmem:[%s1218_s5 + $0x10] sm:$0xff]  ;;  %v277_v1 = vld [vmem:[%s1218_s5 + $0xb8] sm:$0xff]  ;;  %v278_v2 = vld [vmem:[%s1218_s5 + $0xc0] sm:$0xff] }
  0x35   :  { %341 = vmatpush.msrb.mxu2 %v270_v37  ;;  %322 = vmatpush.msrb.mxu1 %v264_v41  ;;  %v272_v3 = vld [vmem:[%s1218_s5 + $0x90] sm:$0xff]  ;;  %v273_v4 = vld [vmem:[%s1218_s5 + $0x98] sm:$0xff]  ;;  %v267_v5 = vld [vmem:[%s1218_s5 + $0x68] sm:$0xff] }
  0x36   :  { %230 = vmatpush.msrb.mxu0 %v127_v13  ;;  %361 = vmatpush.msrb.mxu3 %v271_v43  ;;  %v268_v6 = vld [vmem:[%s1218_s5 + $0x70] sm:$0xff]  ;;  %v262_v7 = vld [vmem:[%s1218_s5 + $0x40] sm:$0xff]  ;;  %v263_v8 = vld [vmem:[%s1218_s5 + $0x48] sm:$0xff] }
  0x37   :  { %342 = vmatpush.msrb.mxu2 %v265_v42  ;;  %323 = vmatpush.msrb.mxu1 %v259_v44  ;;  %v257_v9 = vld [vmem:[%s1218_s5 + $0x18] sm:$0xff]  ;;  %v258_v10 = vld [vmem:[%s1218_s5 + $0x20] sm:$0xff]  ;;  %v429_v12 = vld [vmem:[%s1220_s7 + $0x70] sm:$0xff] }
  0x38   :  { %231 = vmatpush.msrb.mxu0 %v126_v14  ;;  %362 = vmatpush.msrb.mxu3 %v266_v47  ;;  %v430_v11 = vld [vmem:[%s1220_s7 + $0x78] sm:$0xff]  ;;  %v428_v13 = vld [vmem:[%s1220_s7 + $0x68] sm:$0xff]  ;;  %v427_v14 = vld [vmem:[%s1220_s7 + $0x60] sm:$0xff] }
  0x39   :  { %343 = vmatpush.msrb.mxu2 %v260_v45  ;;  %324 = vmatpush.msrb.mxu1 %v254_v49  ;;  %v422_v23 = vld [vmem:[%s1220_s7 + $0x38] sm:$0xff]  ;;  %v242_v24 = vld [vmem:[%s1215_s2] sm:$0xff]  ;;  %v421_v25 = vld [vmem:[%s1220_s7 + $0x30] sm:$0xff]  ;;  %s617_s2 = smov 96  }
  0x3a   :  { %232 = vmatpush.msrb.mxu0 %v125_v15  ;;  %363 = vmatpush.msrb.mxu3 %v261_v61  ;;  %v458_v15 = vld [vmem:[%s1222_s9 + $0x18] sm:$0xff]  ;;  %v420_v27 = vld [vmem:[%s1220_s7 + $0x28] sm:$0xff]  ;;  %v415_v34 = vld [vmem:[%s1220_s7] sm:$0xff] }
  0x3b   :  { %344 = vmatpush.msrb.mxu2 %v255_v50  ;;  %377 = vmatpush.msra.mxu1 %v292_v51  ;;  %v418_v31 = vld [vmem:[%s1220_s7 + $0x18] sm:$0xff]  ;;  %v416_v33 = vld [vmem:[%s1220_s7 + $0x8] sm:$0xff]  ;;  %v414_v35 = vld [vmem:[%s1235_s21] sm:$0xff]  ;;  %s618_s21 = smov [#allocation2]  }
  0x3c   :  { %233 = vmatpush.msrb.mxu0 %v124_v16  ;;  %364 = vmatpush.msrb.mxu3 %v256_v0  ;;  %v426_v16 = vld [vmem:[%s1220_s7 + $0x58] sm:$0xff]  ;;  %v489_v36 = vld [vmem:[%s1224_s11 + $0x8] sm:$0xff]  ;;  %v488_v37 = vld [vmem:[%s1224_s11] sm:$0xff]  ;;  %s552_s22 = sshll.u32 %s618_s21, 4  ;;  %s553_s22 = int_to_ptr.vmem [resolvable:$true] %s552_s22 }
  0x3d   :  { %397 = vmatpush.msra.mxu2 %v293_v52  ;;  %378 = vmatpush.msra.mxu1 %v287_v54  ;;  %v490_v39 = vld [vmem:[%s1225_s12] sm:$0xff] }
  0x3e   :  { %234 = vmatpush.msrb.mxu0 %v123_v17  ;;  %435 = vmatpush.msra.mxu3 %v430_v11  ;;  %v457_v17 = vld [vmem:[%s1222_s9 + $0x10] sm:$0xff]  ;;  %v294_v41 = vld [vmem:[%s1219_s6] sm:$0x1f] }
  0x3f   :  { %398 = vmatpush.msra.mxu2 %v288_v55  ;;  %379 = vmatpush.msra.mxu1 %v282_v62  ;;  %v296_v42 = vperm.slane %v294_v41, 0  ;;  %v297_v45 = vperm.slane %v294_v41, 1  ;;  %v299_v47 = vperm.slane %v294_v41, 3  ;;  %v300_v54 = vperm.slane %v294_v41, 4  ;;  %v585_v55 = vld [vmem:[%s1221_s8] ss:$0 sm:$0xff] }
  0x40   :  { %235 = vmatpush.msrb.mxu0 %v122_v18  ;;  %436 = vmatpush.msra.mxu3 %v429_v12  ;;  %v456_v18 = vld [vmem:[%s1222_s9 + $0x8] sm:$0xff]  ;;  %v587_v0 = vld [vmem:[%s1226_s13] ss:$0 sm:$0xff] }
  0x41   :  { %399 = vmatpush.msra.mxu2 %v283_v63  ;;  %380 = vmatpush.msra.mxu1 %v277_v1 }
  0x42   :  { %236 = vmatpush.msrb.mxu0 %v121_v19  ;;  %437 = vmatpush.msra.mxu3 %v428_v13  ;;  %v425_v19 = vld [vmem:[%s1220_s7 + $0x50] sm:$0xff] }
  0x43   :  { %237 = vmatmul.f32.vlgmr.msrb.gmra.mxu0 %v56_v20  ;;  %400 = vmatpush.msra.mxu2 %v278_v2  ;;  %v455_v20 = vld [vmem:[%s1222_s9] sm:$0xff] }
  0x44   :  { %381 = vmatpush.msra.mxu1 %v272_v3  ;;  %480 = vmatpush.msra.mxu0 %v458_v15 }
  0x45   :  { %401 = vmatpush.msra.mxu2 %v273_v4  ;;  %438 = vmatpush.msra.mxu3 %v427_v14 }
  0x46   :  { %382 = vmatpush.msra.mxu1 %v267_v5  ;;  %481 = vmatpush.msra.mxu0 %v457_v17 }
  0x47   :  { %402 = vmatpush.msra.mxu2 %v268_v6  ;;  %439 = vmatpush.msra.mxu3 %v426_v16 }
  0x48   :  { %383 = vmatpush.msra.mxu1 %v262_v7  ;;  %482 = vmatpush.msra.mxu0 %v456_v18 }
  0x49   :  { %403 = vmatpush.msra.mxu2 %v263_v8  ;;  %440 = vmatpush.msra.mxu3 %v425_v19 }
  0x4a   :  { %384 = vmatpush.msra.mxu1 %v257_v9  ;;  %483 = vmatpush.msra.mxu0 %v455_v20 }
  0x4b   :  { %404 = vmatpush.msra.mxu2 %v258_v10 }
  0xa6   :  { %v158_v22 = vpop.f32.mrf.mxu0 }
  0xa7   :  { %v159_v30 = vadd.f32 %v584_v21, %v158_v22  ;;  %v178_v32 = vpop.f32.mrf.mxu1  ;;  %v424_v21 = vld [vmem:[%s1220_s7 + $0x48] sm:$0xff]  ;;  %v423_v22 = vld [vmem:[%s1220_s7 + $0x40] sm:$0xff] }
  0xa8   :  { %441 = vmatpush.msra.mxu3 %v424_v21 }
  0xa9   :  { %v179_v38 = vadd.f32 %v178_v32, %v159_v30  ;;  %v419_v30 = vld [vmem:[%s1220_s7 + $0x20] sm:$0xff]  ;;  %v417_v32 = vld [vmem:[%s1220_s7 + $0x10] sm:$0xff] }
  0xaa   :  { %442 = vmatpush.msra.mxu3 %v423_v22 }
  0xab   :  { %v198_v40 = vpop.f32.mrf.mxu2 }
  0xac   :  { %v199_v46 = vadd.f32 %v198_v40, %v179_v38  ;;  %v218_v48 = vpop.f32.mrf.mxu3  ;;  %443 = vmatpush.msra.mxu3 %v422_v23  ;;  %v491_v38 = vld [vmem:[%s1225_s12 + $0x8] sm:$0xff] }
  0xae   :  { %v219_v53 = vadd.f32 %v218_v48, %v199_v46  ;;  %444 = vmatpush.msra.mxu3 %v421_v25  ;;  %v298_v46 = vperm.slane %v294_v41, 2 }
  0xb0   :  { %445 = vmatpush.msra.mxu3 %v420_v27 }
  0xb2   :  { %446 = vmatpush.msra.mxu3 %v419_v30 }
  0xb4   :  { %447 = vmatpush.msra.mxu3 %v418_v31 }
  0xb6   :  { %448 = vmatpush.msra.mxu3 %v417_v32 }
  0xb8   :  { %449 = vmatpush.msra.mxu3 %v416_v33 }
  0xba   :  { %450 = vmatpush.msra.mxu3 %v415_v34 }
  0xc0   :  { %v238_v56 = vpop.f32.mrf.mxu0 }
  0xc1   :  { %v1045_v57 = vadd.f32 %v238_v56, %v219_v53 }
  0xc3   :  { %241 = vst [vmem:[%s1227_s14] sm:$0xff] %v1045_v57  ;;  %v243_v58 = vmul.f32 0.5, %v1045_v57 }
  0xc5   :  { %v244_v59 = vmul.f32 1.442695, %v243_v58 }
  0xc7   :  { %588 = vpow2.f32 %v244_v59 }
  0xcd   :  { %v589_v60 = vpop.eup %588 }
  0xce   :  { %247 = vrot.lane.b32.xlu0 %v589_v60, %s616_s23  ;;  %v586_v60 = vld [vmem:[%s1223_s10] ss:$0 sm:$0xff]  ;;  %s554_s23 = sshll.u32 %s1228_s15, 4  ;;  %s555_s23 = int_to_ptr.hbm [resolvable:$true] %s554_s23 }
 0x140   :  { %v248_v26 = vpop.permute.xlu0 %247 }
 0x141   :  { %v250_v28 = vmul.f32 %v248_v26, %v242_v24 }
 0x143   :  { %v251_v29 = vadd.f32 %v250_v28, %v1045_v57 }
 0x145   :  { %463 = vrot.lane.b32.xlu0 %v251_v29, %s617_s2  ;;  %573 = vmatmul.msk.f32.vlgmr.msrb.gmra.mxu1 %vm252_vm0, %v251_v29  ;;  %253 = vst.msk [vmem:[#allocation2] sm:$0xff] %vm252_vm0, %v251_v29 }
 0x146   :  { %574 = vmatmul.msk.f32.vlgmr.msrb.gmra.mxu2 %vm252_vm0, %v251_v29  ;;  %575 = vmatmul.msk.f32.vlgmr.msrb.gmra.mxu3 %vm252_vm0, %v251_v29  ;;  %557 = dma.vmem_to_hbm [thread:$0]  %s553_s22, 128, %s555_s23, [#allocation3]  }
 0x147   :  { %533 = vmatpush.msrb.mxu2 %v489_v36  ;;  %510 = vmatpush.msrb.mxu1 %v491_v38 }
 0x149   :  { %534 = vmatpush.msrb.mxu2 %v488_v37  ;;  %511 = vmatpush.msrb.mxu1 %v490_v39 }
 0x14d   :  { %576 = vmatmul.msk.f32.vlgmr.msra.gmra.mxu1 %vm252_vm0, %v251_v29 }
 0x14e   :  { %577 = vmatmul.msk.f32.vlgmr.msra.gmra.mxu2 %vm252_vm0, %v251_v29  ;;  %451 = vmatmul.f32.vlgmr.msra.gmra.mxu3 %v414_v35 }
 0x1b7   :  { %v464_v40 = vpop.permute.xlu0 %463 }
 0x1b8   :  { %578 = vmatmul.msk.f32.vlgmr.msra.gmra.mxu0 %vm465_vm1, %v464_v40 }
 0x1c2   :  { %v326_v43 = vpop.f32.mrf.mxu1 }
 0x1c3   :  { %v327_v44 = vadd.f32 %v326_v43, %v296_v42 }
 0x1c5   :  { %409 = vst [vmem:[%s1229_s16] sm:$0xff] %v327_v44 }
 0x1c9   :  { %v346_v48 = vpop.f32.mrf.mxu2  ;;  %v366_v49 = vpop.f32.mrf.mxu3 }
 0x1ca   :  { %v347_v50 = vadd.f32 %v346_v48, %v297_v45  ;;  %v367_v51 = vadd.f32 %v366_v49, %v298_v46  ;;  %v386_v52 = vpop.f32.mrf.mxu1 }
 0x1cb   :  { %v387_v53 = vadd.f32 %v386_v52, %v299_v47 }
 0x1cc   :  { %410 = vst [vmem:[%s1229_s16 + $0x8] sm:$0xff] %v347_v50 }
 0x1cd   :  { %411 = vst [vmem:[%s1229_s16 + $0x10] sm:$0xff] %v367_v51 }
 0x1ce   :  { %412 = vst [vmem:[%s1229_s16 + $0x18] sm:$0xff] %v387_v53 }
 0x1d1   :  { %v406_v56 = vpop.f32.mrf.mxu2  ;;  %v452_v58 = vpop.f32.mrf.mxu3 }
 0x1d2   :  { %v407_v57 = vadd.f32 %v406_v56, %v300_v54  ;;  %v453_v59 = vadd.f32 %v585_v55, %v452_v58 }
 0x1d4   :  { %413 = vst [vmem:[%s1229_s16 + $0x20] sm:$0xff] %v407_v57  ;;  %580 = vmatmul.msk.f32.vlgmr.msrb.gmra.mxu2 %vm492_vm2, %v453_v59 }
 0x235   :  { %v485_v61 = vpop.f32.mrf.mxu0 }
 0x236   :  { %v486_v62 = vadd.f32 %v586_v60, %v485_v61 }
 0x238   :  { %579 = vmatmul.msk.f32.vlgmr.msrb.gmra.mxu1 %vm492_vm2, %v486_v62 }
 0x257   :  { %v536_v63 = vpop.f32.mrf.mxu2 }
 0x2b5   :  { %v513_v1 = vpop.f32.mrf.mxu1 }
 0x2b6   :  { %v537_v2 = vadd.f32 %v536_v63, %v513_v1 }
 0x2b8   :  { %v543_v3 = vadd.f32 %v587_v0, %v537_v2 }
 0x2ba   :  { %544 = vst.msk [vmem:[%s1230_s17] sm:$0xff] %vm252_vm0, %v543_v3 }
 0x2bb   :  { %614 = dma.done.wait [#allocation3], 128  }
 0x2bc   :  { %615 = vsyncadd [#allocation3], 4294967168 }
 0x2bd   :  { %572 = vsyncpa [#allocation3], 1 }

// kernel: forward.20
= control target key start
LH: loop header
LB: loop body
LE: loop exit
PB: predicated region body
PF: predicated region fallthrough
CT: control target
= control target key end

     0   :  { %s1284_s1 = inlined_call_operand.vmem [shape: bf16[512,256], index: 1, kind: input, shape index: {}]   ;;  %s1285_s0 = inlined_call_operand.vmem [shape: bf16[8,512], index: 0, kind: input, shape index: {}]   ;;  %s1286_s2 = inlined_call_operand.vmem [shape: f32[1,256], index: 2, kind: input, shape index: {}]   ;;  %s1287_s3 = inlined_call_operand.vmem [shape: bf16[8,256], index: 3, kind: output, shape index: {}]  }
   0x1   :  { %v590_v0 = vld [vmem:[%s1284_s1 + $0x70] sm:$0xf]  ;;  %v803_v1 = vld [vmem:[%s1284_s1 + $0x74] sm:$0xf0]  ;;  %v582_v11 = vld [vmem:[%s1284_s1 + $0x60] sm:$0xf] }
   0x2   :  { %v654_v2 = vld [vmem:[%s1284_s1 + $0xf0] sm:$0xf]  ;;  %v591_v3 = vor.u32 %v803_v1, %v590_v0  ;;  %v819_v4 = vld [vmem:[%s1284_s1 + $0xf4] sm:$0xf0]  ;;  %v801_v13 = vld [vmem:[%s1284_s1 + $0x64] sm:$0xf0] }
   0x3   :  { %v718_v5 = vld [vmem:[%s1284_s1 + $0x170] sm:$0xf]  ;;  %v835_v6 = vld [vmem:[%s1284_s1 + $0x174] sm:$0xf0]  ;;  %v655_v7 = vor.u32 %v819_v4, %v654_v2  ;;  %v646_v14 = vld [vmem:[%s1284_s1 + $0xe0] sm:$0xf]  ;;  %v583_v16 = vor.u32 %v801_v13, %v582_v11 }
   0x4   :  { %v719_v8 = vor.u32 %v835_v6, %v718_v5  ;;  %v782_v9 = vld [vmem:[%s1284_s1 + $0x1f0] sm:$0xf]  ;;  %v851_v10 = vld [vmem:[%s1284_s1 + $0x1f4] sm:$0xf0]  ;;  %420 = vmatpush.bf16.msra.mxu0 %v591_v3  ;;  %v817_v15 = vld [vmem:[%s1284_s1 + $0xe4] sm:$0xf0] }
   0x5   :  { %v783_v12 = vor.u32 %v851_v10, %v782_v9  ;;  %433 = vmatpush.bf16.msra.mxu1 %v655_v7  ;;  %v647_v17 = vor.u32 %v817_v15, %v646_v14  ;;  %v710_v18 = vld [vmem:[%s1284_s1 + $0x160] sm:$0xf]  ;;  %v833_v19 = vld [vmem:[%s1284_s1 + $0x164] sm:$0xf0]  ;;  %v574_v23 = vld [vmem:[%s1284_s1 + $0x50] sm:$0xf] }
   0x6   :  { %446 = vmatpush.bf16.msra.mxu2 %v719_v8  ;;  %v774_v20 = vld [vmem:[%s1284_s1 + $0x1e0] sm:$0xf]  ;;  %v711_v21 = vor.u32 %v833_v19, %v710_v18  ;;  %v849_v22 = vld [vmem:[%s1284_s1 + $0x1e4] sm:$0xf0]  ;;  %v799_v24 = vld [vmem:[%s1284_s1 + $0x54] sm:$0xf0] }
   0x7   :  { %459 = vmatpush.bf16.msra.mxu3 %v783_v12  ;;  %v775_v25 = vor.u32 %v849_v22, %v774_v20  ;;  %v638_v26 = vld [vmem:[%s1284_s1 + $0xd0] sm:$0xf]  ;;  %v815_v27 = vld [vmem:[%s1284_s1 + $0xd4] sm:$0xf0]  ;;  %v575_v29 = vor.u32 %v799_v24, %v574_v23  ;;  %v566_v35 = vld [vmem:[%s1284_s1 + $0x40] sm:$0xf] }
   0x8   :  { %v702_v28 = vld [vmem:[%s1284_s1 + $0x150] sm:$0xf]  ;;  %421 = vmatpush.bf16.msra.mxu0 %v583_v16  ;;  %v831_v30 = vld [vmem:[%s1284_s1 + $0x154] sm:$0xf0]  ;;  %v639_v33 = vor.u32 %v815_v27, %v638_v26  ;;  %v797_v36 = vld [vmem:[%s1284_s1 + $0x44] sm:$0xf0] }
   0x9   :  { %v766_v31 = vld [vmem:[%s1284_s1 + $0x1d0] sm:$0xf]  ;;  %v847_v32 = vld [vmem:[%s1284_s1 + $0x1d4] sm:$0xf0]  ;;  %434 = vmatpush.bf16.msra.mxu1 %v647_v17  ;;  %v703_v34 = vor.u32 %v831_v30, %v702_v28  ;;  %v630_v37 = vld [vmem:[%s1284_s1 + $0xc0] sm:$0xf]  ;;  %v567_v44 = vor.u32 %v797_v36, %v566_v35 }
   0xa   :  { %447 = vmatpush.bf16.msra.mxu2 %v711_v21  ;;  %v767_v38 = vor.u32 %v847_v32, %v766_v31  ;;  %v813_v39 = vld [vmem:[%s1284_s1 + $0xc4] sm:$0xf0]  ;;  %v694_v40 = vld [vmem:[%s1284_s1 + $0x140] sm:$0xf]  ;;  %v558_v47 = vld [vmem:[%s1284_s1 + $0x30] sm:$0xf] }
   0xb   :  { %460 = vmatpush.bf16.msra.mxu3 %v775_v25  ;;  %v829_v41 = vld [vmem:[%s1284_s1 + $0x144] sm:$0xf0]  ;;  %v758_v42 = vld [vmem:[%s1284_s1 + $0x1c0] sm:$0xf]  ;;  %v631_v45 = vor.u32 %v813_v39, %v630_v37  ;;  %v795_v48 = vld [vmem:[%s1284_s1 + $0x34] sm:$0xf0] }
   0xc   :  { %v845_v43 = vld [vmem:[%s1284_s1 + $0x1c4] sm:$0xf0]  ;;  %422 = vmatpush.bf16.msra.mxu0 %v575_v29  ;;  %v695_v46 = vor.u32 %v829_v41, %v694_v40  ;;  %v622_v49 = vld [vmem:[%s1284_s1 + $0xb0] sm:$0xf]  ;;  %v811_v51 = vld [vmem:[%s1284_s1 + $0xb4] sm:$0xf0]  ;;  %v559_v56 = vor.u32 %v795_v48, %v558_v47 }
   0xd   :  { %435 = vmatpush.bf16.msra.mxu1 %v639_v33  ;;  %v759_v50 = vor.u32 %v845_v43, %v758_v42  ;;  %v686_v52 = vld [vmem:[%s1284_s1 + $0x130] sm:$0xf]  ;;  %v827_v53 = vld [vmem:[%s1284_s1 + $0x134] sm:$0xf0]  ;;  %v623_v57 = vor.u32 %v811_v51, %v622_v49  ;;  %v550_v59 = vld [vmem:[%s1284_s1 + $0x20] sm:$0xf] }
   0xe   :  { %448 = vmatpush.bf16.msra.mxu2 %v703_v34  ;;  %v750_v54 = vld [vmem:[%s1284_s1 + $0x1b0] sm:$0xf]  ;;  %v843_v55 = vld [vmem:[%s1284_s1 + $0x1b4] sm:$0xf0]  ;;  %v687_v58 = vor.u32 %v827_v53, %v686_v52  ;;  %v793_v60 = vld [vmem:[%s1284_s1 + $0x24] sm:$0xf0] }
   0xf   :  { %461 = vmatpush.bf16.msra.mxu3 %v767_v38  ;;  %v614_v61 = vld [vmem:[%s1284_s1 + $0xa0] sm:$0xf]  ;;  %v751_v62 = vor.u32 %v843_v55, %v750_v54  ;;  %v809_v63 = vld [vmem:[%s1284_s1 + $0xa4] sm:$0xf0]  ;;  %v551_v4 = vor.u32 %v793_v60, %v550_v59  ;;  %v542_v7 = vld [vmem:[%s1284_s1 + $0x10] sm:$0xf] }
  0x10   :  { %423 = vmatpush.bf16.msra.mxu0 %v567_v44  ;;  %v678_v0 = vld [vmem:[%s1284_s1 + $0x120] sm:$0xf]  ;;  %v825_v1 = vld [vmem:[%s1284_s1 + $0x124] sm:$0xf0]  ;;  %v615_v5 = vor.u32 %v809_v63, %v614_v61  ;;  %v791_v8 = vld [vmem:[%s1284_s1 + $0x14] sm:$0xf0] }
  0x11   :  { %436 = vmatpush.bf16.msra.mxu1 %v631_v45  ;;  %v742_v2 = vld [vmem:[%s1284_s1 + $0x1a0] sm:$0xf]  ;;  %v841_v3 = vld [vmem:[%s1284_s1 + $0x1a4] sm:$0xf0]  ;;  %v679_v6 = vor.u32 %v825_v1, %v678_v0  ;;  %v606_v9 = vld [vmem:[%s1284_s1 + $0x90] sm:$0xf]  ;;  %v543_v16 = vor.u32 %v791_v8, %v542_v7 }
  0x12   :  { %449 = vmatpush.bf16.msra.mxu2 %v695_v46  ;;  %v743_v10 = vor.u32 %v841_v3, %v742_v2  ;;  %v807_v11 = vld [vmem:[%s1284_s1 + $0x94] sm:$0xf0]  ;;  %v670_v12 = vld [vmem:[%s1284_s1 + $0x110] sm:$0xf]  ;;  %v534_v17 = vld [vmem:[%s1284_s1] sm:$0xf] }
  0x13   :  { %462 = vmatpush.bf16.msra.mxu3 %v759_v50  ;;  %v823_v13 = vld [vmem:[%s1284_s1 + $0x114] sm:$0xf0]  ;;  %v734_v14 = vld [vmem:[%s1284_s1 + $0x190] sm:$0xf]  ;;  %v789_v18 = vld [vmem:[%s1284_s1 + $0x4] sm:$0xf0]  ;;  %v607_v20 = vor.u32 %v807_v11, %v606_v9 }
  0x14   :  { %424 = vmatpush.bf16.msra.mxu0 %v559_v56  ;;  %v839_v15 = vld [vmem:[%s1284_s1 + $0x194] sm:$0xf0]  ;;  %v598_v19 = vld [vmem:[%s1284_s1 + $0x80] sm:$0xf]  ;;  %v671_v21 = vor.u32 %v823_v13, %v670_v12  ;;  %v805_v22 = vld [vmem:[%s1284_s1 + $0x84] sm:$0xf0]  ;;  %v535_v32 = vor.u32 %v789_v18, %v534_v17 }
  0x15   :  { %437 = vmatpush.bf16.msra.mxu1 %v623_v57  ;;  %v662_v23 = vld [vmem:[%s1284_s1 + $0x100] sm:$0xf]  ;;  %v821_v24 = vld [vmem:[%s1284_s1 + $0x104] sm:$0xf0]  ;;  %v735_v25 = vor.u32 %v839_v15, %v734_v14  ;;  %v802_v28 = vld [vmem:[%s1284_s1 + $0x74] sm:$0xf]  ;;  %v599_v37 = vor.u32 %v805_v22, %v598_v19 }
  0x16   :  { %450 = vmatpush.bf16.msra.mxu2 %v687_v58  ;;  %v726_v26 = vld [vmem:[%s1284_s1 + $0x180] sm:$0xf]  ;;  %v837_v27 = vld [vmem:[%s1284_s1 + $0x184] sm:$0xf0]  ;;  %v592_v29 = vld [vmem:[%s1284_s1 + $0x78] sm:$0xf0]  ;;  %v663_v38 = vor.u32 %v821_v24, %v662_v23 }
  0x17   :  { %463 = vmatpush.bf16.msra.mxu3 %v751_v62  ;;  %v818_v30 = vld [vmem:[%s1284_s1 + $0xf4] sm:$0xf]  ;;  %v15_v31 = vld [vmem:[%s1285_s0 + $0x8] sm:$0xff]  ;;  %v656_v33 = vld [vmem:[%s1284_s1 + $0xf8] sm:$0xf0]  ;;  %v727_v42 = vor.u32 %v837_v27, %v726_v26  ;;  %v595_v43 = vor.u32 %v802_v28, %v592_v29 }
  0x18   :  { %425 = vmatpush.bf16.msra.mxu0 %v551_v4  ;;  %v834_v34 = vld [vmem:[%s1284_s1 + $0x174] sm:$0xf]  ;;  %v720_v35 = vld [vmem:[%s1284_s1 + $0x178] sm:$0xf0]  ;;  %v90_v36 = vunpack.c.l.b16 %v15_v31  ;;  %v91_v41 = vunpack.c.h.b16 %v15_v31  ;;  %v14_v44 = vld [vmem:[%s1285_s0] sm:$0xff]  ;;  %v659_v45 = vor.u32 %v818_v30, %v656_v33 }
  0x19   :  { %438 = vmatpush.bf16.msra.mxu1 %v615_v5  ;;  %v850_v39 = vld [vmem:[%s1284_s1 + $0x1f4] sm:$0xf]  ;;  %v784_v40 = vld [vmem:[%s1284_s1 + $0x1f8] sm:$0xf0]  ;;  %v723_v46 = vor.u32 %v834_v34, %v720_v35  ;;  %v800_v47 = vld [vmem:[%s1284_s1 + $0x64] sm:$0xf]  ;;  %v88_v50 = vunpack.c.l.b16 %v14_v44  ;;  %v89_v51 = vunpack.c.h.b16 %v14_v44 }
  0x1a   :  { %451 = vmatpush.bf16.msra.mxu2 %v679_v6  ;;  %v584_v48 = vld [vmem:[%s1284_s1 + $0x68] sm:$0xf0]  ;;  %v816_v49 = vld [vmem:[%s1284_s1 + $0xe4] sm:$0xf]  ;;  %v787_v52 = vor.u32 %v850_v39, %v784_v40  ;;  %v1112_v56 = vpack.c.b16 %v90_v36, %v90_v36  ;;  %v1120_v59 = vpack.c.b16 %v91_v41, %v91_v41  ;;  %v798_v1 = vld [vmem:[%s1284_s1 + $0x54] sm:$0xf] }
  0x1b   :  { %464 = vmatpush.bf16.msra.mxu3 %v743_v10  ;;  %v648_v53 = vld [vmem:[%s1284_s1 + $0xe8] sm:$0xf0]  ;;  %v832_v54 = vld [vmem:[%s1284_s1 + $0x164] sm:$0xf]  ;;  %v1122_v60 = vpack.c.b16 %v88_v50, %v88_v50  ;;  %v587_v61 = vor.u32 %v800_v47, %v584_v48  ;;  %v1124_v62 = vpack.c.b16 %v89_v51, %v89_v51  ;;  %v576_v2 = vld [vmem:[%s1284_s1 + $0x58] sm:$0xf0] }
  0x1c   :  { %426 = vmatpush.bf16.msra.mxu0 %v543_v16  ;;  %v712_v55 = vld [vmem:[%s1284_s1 + $0x168] sm:$0xf0]  ;;  %v848_v57 = vld [vmem:[%s1284_s1 + $0x1e4] sm:$0xf]  ;;  %v651_v63 = vor.u32 %v816_v49, %v648_v53  ;;  %v814_v3 = vld [vmem:[%s1284_s1 + $0xd4] sm:$0xf]  ;;  %v579_v10 = vor.u32 %v798_v1, %v576_v2 }
  0x1d   :  { %439 = vmatpush.bf16.msra.mxu1 %v607_v20  ;;  %v776_v58 = vld [vmem:[%s1284_s1 + $0x1e8] sm:$0xf0]  ;;  %v715_v0 = vor.u32 %v832_v54, %v712_v55  ;;  %v640_v5 = vld [vmem:[%s1284_s1 + $0xd8] sm:$0xf0]  ;;  %v830_v6 = vld [vmem:[%s1284_s1 + $0x154] sm:$0xf] }
  0x1e   :  { %452 = vmatpush.bf16.msra.mxu2 %v671_v21  ;;  %v779_v4 = vor.u32 %v848_v57, %v776_v58  ;;  %v704_v7 = vld [vmem:[%s1284_s1 + $0x158] sm:$0xf0]  ;;  %v846_v8 = vld [vmem:[%s1284_s1 + $0x1d4] sm:$0xf]  ;;  %v643_v11 = vor.u32 %v814_v3, %v640_v5  ;;  %v796_v13 = vld [vmem:[%s1284_s1 + $0x44] sm:$0xf] }
  0x1f   :  { %465 = vmatpush.bf16.msra.mxu3 %v735_v25  ;;  %v768_v9 = vld [vmem:[%s1284_s1 + $0x1d8] sm:$0xf0]  ;;  %v707_v12 = vor.u32 %v830_v6, %v704_v7  ;;  %v568_v14 = vld [vmem:[%s1284_s1 + $0x48] sm:$0xf0]  ;;  %v812_v15 = vld [vmem:[%s1284_s1 + $0xc4] sm:$0xf] }
  0x20   :  { %427 = vmatpush.bf16.msra.mxu0 %v535_v32  ;;  %v771_v16 = vor.u32 %v846_v8, %v768_v9  ;;  %v632_v17 = vld [vmem:[%s1284_s1 + $0xc8] sm:$0xf0]  ;;  %v828_v18 = vld [vmem:[%s1284_s1 + $0x144] sm:$0xf]  ;;  %v571_v22 = vor.u32 %v796_v13, %v568_v14  ;;  %v794_v25 = vld [vmem:[%s1284_s1 + $0x34] sm:$0xf] }
  0x21   :  { %440 = vmatpush.bf16.msra.mxu1 %v599_v37  ;;  %v696_v19 = vld [vmem:[%s1284_s1 + $0x148] sm:$0xf0]  ;;  %v844_v20 = vld [vmem:[%s1284_s1 + $0x1c4] sm:$0xf]  ;;  %v635_v23 = vor.u32 %v812_v15, %v632_v17  ;;  %v560_v26 = vld [vmem:[%s1284_s1 + $0x38] sm:$0xf0] }
  0x22   :  { %453 = vmatpush.bf16.msra.mxu2 %v663_v38  ;;  %v760_v21 = vld [vmem:[%s1284_s1 + $0x1c8] sm:$0xf0]  ;;  %v699_v24 = vor.u32 %v828_v18, %v696_v19  ;;  %v810_v27 = vld [vmem:[%s1284_s1 + $0xb4] sm:$0xf]  ;;  %v624_v29 = vld [vmem:[%s1284_s1 + $0xb8] sm:$0xf0]  ;;  %v563_v34 = vor.u32 %v794_v25, %v560_v26 }
  0x23   :  { %466 = vmatpush.bf16.msra.mxu3 %v727_v42  ;;  %428 = vmatmul.bf16.vlgmr.msra.gmra.mxu0 %v1122_v60  ;;  %v763_v28 = vor.u32 %v844_v20, %v760_v21  ;;  %v826_v30 = vld [vmem:[%s1284_s1 + $0x134] sm:$0xf]  ;;  %v688_v31 = vld [vmem:[%s1284_s1 + $0x138] sm:$0xf0]  ;;  %v627_v35 = vor.u32 %v810_v27, %v624_v29  ;;  %v792_v37 = vld [vmem:[%s1284_s1 + $0x24] sm:$0xf] }
  0x24   :  { %472 = vmatpush.bf16.msrb.mxu0 %v595_v43  ;;  %441 = vmatmul.bf16.vlgmr.msra.gmra.mxu1 %v1124_v62  ;;  %v842_v32 = vld [vmem:[%s1284_s1 + $0x1b4] sm:$0xf]  ;;  %v752_v33 = vld [vmem:[%s1284_s1 + $0x1b8] sm:$0xf0]  ;;  %v691_v36 = vor.u32 %v826_v30, %v688_v31  ;;  %v552_v38 = vld [vmem:[%s1284_s1 + $0x28] sm:$0xf0] }
  0x25   :  { %485 = vmatpush.bf16.msrb.mxu1 %v659_v45  ;;  %454 = vmatmul.bf16.vlgmr.msra.gmra.mxu2 %v1112_v56  ;;  %v808_v39 = vld [vmem:[%s1284_s1 + $0xa4] sm:$0xf]  ;;  %v755_v40 = vor.u32 %v842_v32, %v752_v33  ;;  %v616_v41 = vld [vmem:[%s1284_s1 + $0xa8] sm:$0xf0]  ;;  %v790_v49 = vld [vmem:[%s1284_s1 + $0x14] sm:$0xf] }
  0x26   :  { %498 = vmatpush.bf16.msrb.mxu2 %v723_v46  ;;  %467 = vmatmul.bf16.vlgmr.msra.gmra.mxu3 %v1120_v59  ;;  %v824_v42 = vld [vmem:[%s1284_s1 + $0x124] sm:$0xf]  ;;  %v680_v43 = vld [vmem:[%s1284_s1 + $0x128] sm:$0xf0]  ;;  %v555_v46 = vor.u32 %v792_v37, %v552_v38  ;;  %v619_v47 = vor.u32 %v808_v39, %v616_v41  ;;  %v544_v50 = vld [vmem:[%s1284_s1 + $0x18] sm:$0xf0] }
  0x27   :  { %511 = vmatpush.bf16.msrb.mxu3 %v787_v52  ;;  %v840_v44 = vld [vmem:[%s1284_s1 + $0x1a4] sm:$0xf]  ;;  %v744_v45 = vld [vmem:[%s1284_s1 + $0x1a8] sm:$0xf0]  ;;  %v683_v48 = vor.u32 %v824_v42, %v680_v43  ;;  %v806_v51 = vld [vmem:[%s1284_s1 + $0x94] sm:$0xf] }
  0x28   :  { %473 = vmatpush.bf16.msrb.mxu0 %v587_v61  ;;  %v747_v52 = vor.u32 %v840_v44, %v744_v45  ;;  %v608_v53 = vld [vmem:[%s1284_s1 + $0x98] sm:$0xf0]  ;;  %v822_v54 = vld [vmem:[%s1284_s1 + $0x114] sm:$0xf]  ;;  %v547_v61 = vor.u32 %v790_v49, %v544_v50  ;;  %v788_v1 = vld [vmem:[%s1284_s1 + $0x4] sm:$0xf] }
  0x29   :  { %486 = vmatpush.bf16.msrb.mxu1 %v651_v63  ;;  %v672_v55 = vld [vmem:[%s1284_s1 + $0x118] sm:$0xf0]  ;;  %v838_v57 = vld [vmem:[%s1284_s1 + $0x194] sm:$0xf]  ;;  %v611_v63 = vor.u32 %v806_v51, %v608_v53  ;;  %v536_v2 = vld [vmem:[%s1284_s1 + $0x8] sm:$0xf0] }
  0x2a   :  { %499 = vmatpush.bf16.msrb.mxu2 %v715_v0  ;;  %v736_v58 = vld [vmem:[%s1284_s1 + $0x198] sm:$0xf0]  ;;  %v675_v0 = vor.u32 %v822_v54, %v672_v55  ;;  %v804_v3 = vld [vmem:[%s1284_s1 + $0x84] sm:$0xf]  ;;  %v600_v5 = vld [vmem:[%s1284_s1 + $0x88] sm:$0xf0] }
  0x2b   :  { %512 = vmatpush.bf16.msrb.mxu3 %v779_v4  ;;  %v739_v4 = vor.u32 %v838_v57, %v736_v58  ;;  %v820_v6 = vld [vmem:[%s1284_s1 + $0x104] sm:$0xf]  ;;  %v664_v7 = vld [vmem:[%s1284_s1 + $0x108] sm:$0xf0] }
  0x2c   :  { %474 = vmatpush.bf16.msrb.mxu0 %v579_v10  ;;  %v836_v8 = vld [vmem:[%s1284_s1 + $0x184] sm:$0xf]  ;;  %v728_v9 = vld [vmem:[%s1284_s1 + $0x188] sm:$0xf0]  ;;  %v539_v10 = vor.u32 %v788_v1, %v536_v2 }
  0x2d   :  { %487 = vmatpush.bf16.msrb.mxu1 %v643_v11  ;;  %v603_v11 = vor.u32 %v804_v3, %v600_v5  ;;  %v731_v13 = vor.u32 %v836_v8, %v728_v9 }
  0x2e   :  { %500 = vmatpush.bf16.msrb.mxu2 %v707_v12  ;;  %v667_v12 = vor.u32 %v820_v6, %v664_v7 }
  0x2f   :  { %513 = vmatpush.bf16.msrb.mxu3 %v771_v16 }
  0x30   :  { %475 = vmatpush.bf16.msrb.mxu0 %v571_v22  ;;  %v80_v22 = vld [vmem:[%s1286_s2] sm:$0x3] }
  0x31   :  { %488 = vmatpush.bf16.msrb.mxu1 %v635_v23  ;;  %v82_v23 = vperm.slane %v80_v22, 0 }
  0x32   :  { %501 = vmatpush.bf16.msrb.mxu2 %v699_v24  ;;  %v83_v24 = vperm.slane %v80_v22, 1 }
  0x33   :  { %514 = vmatpush.bf16.msrb.mxu3 %v763_v28 }
  0x34   :  { %476 = vmatpush.bf16.msrb.mxu0 %v563_v34 }
  0x35   :  { %489 = vmatpush.bf16.msrb.mxu1 %v627_v35 }
  0x36   :  { %502 = vmatpush.bf16.msrb.mxu2 %v691_v36 }
  0x37   :  { %515 = vmatpush.bf16.msrb.mxu3 %v755_v40 }
  0x38   :  { %477 = vmatpush.bf16.msrb.mxu0 %v555_v46 }
  0x39   :  { %490 = vmatpush.bf16.msrb.mxu1 %v619_v47 }
  0x3a   :  { %503 = vmatpush.bf16.msrb.mxu2 %v683_v48 }
  0x3b   :  { %516 = vmatpush.bf16.msrb.mxu3 %v747_v52 }
  0x3c   :  { %478 = vmatpush.bf16.msrb.mxu0 %v547_v61 }
  0x3d   :  { %491 = vmatpush.bf16.msrb.mxu1 %v611_v63 }
  0x3e   :  { %504 = vmatpush.bf16.msrb.mxu2 %v675_v0 }
  0x3f   :  { %517 = vmatpush.bf16.msrb.mxu3 %v739_v4 }
  0x40   :  { %479 = vmatpush.bf16.msrb.mxu0 %v539_v10 }
  0x41   :  { %492 = vmatpush.bf16.msrb.mxu1 %v603_v11 }
  0x42   :  { %505 = vmatpush.bf16.msrb.mxu2 %v667_v12 }
  0x43   :  { %518 = vmatpush.bf16.msrb.mxu3 %v731_v13  ;;  %480 = vmatmul.bf16.vlgmr.msrb.gmra.mxu0 %v1122_v60 }
  0x44   :  { %493 = vmatmul.bf16.vlgmr.msrb.gmra.mxu1 %v1124_v62 }
  0x45   :  { %506 = vmatmul.bf16.vlgmr.msrb.gmra.mxu2 %v1112_v56 }
  0x46   :  { %519 = vmatmul.bf16.vlgmr.msrb.gmra.mxu3 %v1120_v59 }
  0xa0   :  { %v429_v14 = vpop.f32.mrf.mxu0 }
  0xa1   :  { %v442_v15 = vpop.f32.mrf.mxu1  ;;  %v430_v60 = vadd.f32 %v429_v14, %v82_v23 }
  0xa3   :  { %v443_v62 = vadd.f32 %v442_v15, %v430_v60 }
  0xa8   :  { %v455_v16 = vpop.f32.mrf.mxu2  ;;  %v431_v18 = vpop.f32.mrf.mxu0 }
  0xa9   :  { %v468_v17 = vpop.f32.mrf.mxu3  ;;  %v444_v19 = vpop.f32.mrf.mxu1  ;;  %v456_v59 = vadd.f32 %v455_v16, %v443_v62 }
  0xab   :  { %v469_v29 = vadd.f32 %v468_v17, %v456_v59 }
  0xad   :  { %v524_v35 = vmax.f32 %v469_v29, 0.0 }
  0xb0   :  { %v457_v20 = vpop.f32.mrf.mxu2 }
  0xb1   :  { %v470_v21 = vpop.f32.mrf.mxu3 }
  0xc0   :  { %v481_v25 = vpop.f32.mrf.mxu0 }
  0xc1   :  { %v482_v56 = vadd.f32 %v481_v25, %v83_v24  ;;  %v494_v26 = vpop.f32.mrf.mxu1 }
  0xc3   :  { %v495_v27 = vadd.f32 %v494_v26, %v482_v56 }
  0xc8   :  { %v507_v28 = vpop.f32.mrf.mxu2  ;;  %v483_v32 = vpop.f32.mrf.mxu0 }
  0xc9   :  { %v508_v30 = vadd.f32 %v507_v28, %v495_v27  ;;  %v520_v31 = vpop.f32.mrf.mxu3  ;;  %v496_v33 = vpop.f32.mrf.mxu1 }
  0xcb   :  { %v521_v34 = vadd.f32 %v520_v31, %v508_v30 }
  0xcd   :  { %v525_v36 = vmax.f32 %v521_v34, 0.0 }
  0xcf   :  { %v526_v37 = vpack.c.bf16 %v525_v36, %v524_v35 }
  0xd0   :  { %v509_v38 = vpop.f32.mrf.mxu2 }
  0xd1   :  { %527 = vst [vmem:[%s1287_s3] sm:$0xff] %v526_v37  ;;  %v522_v39 = vpop.f32.mrf.mxu3 }

// kernel: forward.21
= control target key start
LH: loop header
LB: loop body
LE: loop exit
PB: predicated region body
PF: predicated region fallthrough
CT: control target
= control target key end

     0   :  { %s897_s12 = smov 0   ;;  %s1041_s0 = inlined_call_operand.vmem [shape: bf16[32,576], index: 0, kind: input, shape index: {}]   ;;  %s1042_s1 = inlined_call_operand.vmem [shape: bf16[576,128], index: 1, kind: input, shape index: {}]   ;;  %s1043_s2 = inlined_call_operand.vmem [shape: f32[1,128], index: 2, kind: input, shape index: {}]   ;;  %s1044_s3 = inlined_call_operand.vmem [shape: bf16[32,128], index: 3, kind: output, shape index: {}]  }
   0x1 LB: > { %s637_s13 = sadd.s32 4294967295, %s875_s12   ;;  %p641_p0 = scmp.ge.s32.totalorder %s875_s12, 1  ;;  %s875_s12 = sphi %s897_s12, %s13_s12  }
   0x2   : > { %p139_p1 = scmp.lt.s32.totalorder %s875_s12, 3 }
   0x4   : > { %p140_p2 = pnand %p641_p0, %p139_p1 }
   0x5   : > { %s642_s11 = sshll.u32 (!%p140_p2), %s637_s13, 1 }
   0x6   : > { %143 = sbr.rel (%p140_p2) target bundleno = 200 (0xc8), region = 32  ;;  %p165_p3 = scmp.lt.s32.totalorder (!%p140_p2), %s642_s11, 3 }
   0xb   : > { %v825_v0 = vld [vmem:[%s1042_s1 + $0x38] sm:$0xff]  ;;  %v824_v4 = vld [vmem:[%s1042_s1 + $0x30] sm:$0xff]  ;;  %v823_v8 = vld [vmem:[%s1042_s1 + $0x28] sm:$0xff]  ;;  %s1046_s11 = smov (!%p165_p3, %s642_s11), 3  ;;  %vm501_vm0 = vcmask 523264  }
   0xc   : > { %v841_v1 = vld [vmem:[%s1042_s1 + $0xb8] sm:$0xff]  ;;  %505 = vmatpush.bf16.msra.mxu0 %v825_v0  ;;  %v840_v5 = vld [vmem:[%s1042_s1 + $0xb0] sm:$0xff]  ;;  %v839_v9 = vld [vmem:[%s1042_s1 + $0xa8] sm:$0xff]  ;;  %s859_s6 = smul.u32 20, %s1046_s11  ;;  %s645_s18 = sshll.u32 %s1046_s11, 2 }
   0xd   : > { %v849_v2 = vld [vmem:[%s1042_s1 + $0xf8] sm:$0xff]  ;;  %533 = vmatpush.bf16.msra.mxu2 %v841_v1  ;;  %v848_v6 = vld [vmem:[%s1042_s1 + $0xf0] sm:$0xff]  ;;  %v847_v10 = vld [vmem:[%s1042_s1 + $0xe8] sm:$0xff]  ;;  %s175_s21 = scalar_lea.vmem %s1044_s3, %s645_s18 }
   0xe   : > { %v833_v3 = vld [vmem:[%s1042_s1 + $0x78] sm:$0xff]  ;;  %547 = vmatpush.bf16.msra.mxu3 %v849_v2  ;;  %v832_v7 = vld [vmem:[%s1042_s1 + $0x70] sm:$0xff]  ;;  %v831_v11 = vld [vmem:[%s1042_s1 + $0x68] sm:$0xff]  ;;  %s989_s20 = scalar_lea.vmem %s1041_s0, %s859_s6 }
   0xf   : > { %519 = vmatpush.bf16.msra.mxu1 %v833_v3  ;;  %v822_v12 = vld [vmem:[%s1042_s1 + $0x20] sm:$0xff]  ;;  %v821_v16 = vld [vmem:[%s1042_s1 + $0x18] sm:$0xff]  ;;  %v820_v20 = vld [vmem:[%s1042_s1 + $0x10] sm:$0xff] }
  0x10   : > { %506 = vmatpush.bf16.msra.mxu0 %v824_v4  ;;  %v838_v13 = vld [vmem:[%s1042_s1 + $0xa0] sm:$0xff]  ;;  %v837_v17 = vld [vmem:[%s1042_s1 + $0x98] sm:$0xff]  ;;  %v836_v21 = vld [vmem:[%s1042_s1 + $0x90] sm:$0xff] }
  0x11   : > { %534 = vmatpush.bf16.msra.mxu2 %v840_v5  ;;  %v846_v14 = vld [vmem:[%s1042_s1 + $0xe0] sm:$0xff]  ;;  %v845_v18 = vld [vmem:[%s1042_s1 + $0xd8] sm:$0xff]  ;;  %v844_v22 = vld [vmem:[%s1042_s1 + $0xd0] sm:$0xff] }
  0x12   : > { %548 = vmatpush.bf16.msra.mxu3 %v848_v6  ;;  %v830_v15 = vld [vmem:[%s1042_s1 + $0x60] sm:$0xff]  ;;  %v829_v19 = vld [vmem:[%s1042_s1 + $0x58] sm:$0xff]  ;;  %v828_v23 = vld [vmem:[%s1042_s1 + $0x50] sm:$0xff] }
  0x13   : > { %520 = vmatpush.bf16.msra.mxu1 %v832_v7  ;;  %v819_v24 = vld [vmem:[%s1042_s1 + $0x8] sm:$0xff]  ;;  %v818_v28 = vld [vmem:[%s1042_s1] sm:$0xff]  ;;  %v815_v33 = vld [vmem:[%s989_s20 + $0x10] sm:$0xf0] }
  0x14   : > { %507 = vmatpush.bf16.msra.mxu0 %v823_v8  ;;  %v835_v25 = vld [vmem:[%s1042_s1 + $0x88] sm:$0xff]  ;;  %v834_v29 = vld [vmem:[%s1042_s1 + $0x80] sm:$0xff]  ;;  %v816_v35 = vld [vmem:[%s989_s20 + $0x18] sm:$0xf0] }
  0x15   : > { %535 = vmatpush.bf16.msra.mxu2 %v839_v9  ;;  %v843_v26 = vld [vmem:[%s1042_s1 + $0xc8] sm:$0xff]  ;;  %v842_v30 = vld [vmem:[%s1042_s1 + $0xc0] sm:$0xff]  ;;  %v650_v39 = vld [vmem:[%s989_s20 + $0x14] sm:$0xf0] }
  0x16   : > { %549 = vmatpush.bf16.msra.mxu3 %v847_v10  ;;  %v827_v27 = vld [vmem:[%s1042_s1 + $0x48] sm:$0xff]  ;;  %v826_v31 = vld [vmem:[%s1042_s1 + $0x40] sm:$0xff]  ;;  %v853_v40 = vld [vmem:[%s1042_s1 + $0x118] sm:$0xff] }
  0x17   : > { %521 = vmatpush.bf16.msra.mxu1 %v831_v11  ;;  %v648_v32 = vld [vmem:[%s989_s20] sm:$0xf]  ;;  %v656_v34 = vld [vmem:[%s989_s20 + $0x8] sm:$0xf]  ;;  %v814_v36 = vld [vmem:[%s989_s20 + $0xc] sm:$0xf] }
  0x18   : > { %508 = vmatpush.bf16.msra.mxu0 %v822_v12  ;;  %v658_v37 = vld [vmem:[%s989_s20 + $0x1c] sm:$0xf0]  ;;  %v813_v38 = vld [vmem:[%s989_s20 + $0x4] sm:$0xf]  ;;  %v649_v41 = vor.u32 %v815_v33, %v648_v32  ;;  %v657_v42 = vor.u32 %v816_v35, %v656_v34  ;;  %v852_v45 = vld [vmem:[%s1042_s1 + $0x110] sm:$0xff] }
  0x19   : > { %536 = vmatpush.bf16.msra.mxu2 %v838_v13  ;;  %v661_v43 = vor.u32 %v814_v36, %v658_v37  ;;  %v653_v44 = vor.u32 %v813_v38, %v650_v39  ;;  %v851_v46 = vld [vmem:[%s1042_s1 + $0x108] sm:$0xff]  ;;  %v850_v47 = vld [vmem:[%s1042_s1 + $0x100] sm:$0xff]  ;;  %v664_v48 = vld [vmem:[%s989_s20 + $0x10] sm:$0xf] }
  0x1a   : > { %550 = vmatpush.bf16.msra.mxu3 %v846_v14  ;;  %v817_v49 = vld [vmem:[%s989_s20 + $0x20] sm:$0xf0]  ;;  %v868_v54 = vld [vmem:[%s1043_s2] ss:$0 sm:$0xff] }
  0x1b   : > { %522 = vmatpush.bf16.msra.mxu1 %v830_v15  ;;  %v665_v50 = vor.u32 %v817_v49, %v664_v48 }
  0x1c   : > { %509 = vmatpush.bf16.msra.mxu0 %v821_v16 }
  0x1d   : > { %537 = vmatpush.bf16.msra.mxu2 %v837_v17 }
  0x1e   : > { %551 = vmatpush.bf16.msra.mxu3 %v845_v18 }
  0x1f   : > { %523 = vmatpush.bf16.msra.mxu1 %v829_v19 }
  0x20   : > { %510 = vmatpush.bf16.msra.mxu0 %v820_v20 }
  0x21   : > { %538 = vmatpush.bf16.msra.mxu2 %v836_v21 }
  0x22   : > { %552 = vmatpush.bf16.msra.mxu3 %v844_v22 }
  0x23   : > { %524 = vmatpush.bf16.msra.mxu1 %v828_v23 }
  0x24   : > { %511 = vmatpush.bf16.msra.mxu0 %v819_v24 }
  0x25   : > { %539 = vmatpush.bf16.msra.mxu2 %v835_v25 }
  0x26   : > { %553 = vmatpush.bf16.msra.mxu3 %v843_v26 }
  0x27   : > { %525 = vmatpush.bf16.msra.mxu1 %v827_v27 }
  0x28   : > { %512 = vmatpush.bf16.msra.mxu0 %v818_v28 }
  0x29   : > { %540 = vmatpush.bf16.msra.mxu2 %v834_v29 }
  0x2a   : > { %554 = vmatpush.bf16.msra.mxu3 %v842_v30 }
  0x2b   : > { %526 = vmatpush.bf16.msra.mxu1 %v826_v31  ;;  %513 = vmatmul.bf16.vlgmr.msra.gmra.mxu0 %v649_v41 }
  0x2c   : > { %565 = vmatpush.bf16.msrb.mxu0 %v853_v40  ;;  %541 = vmatmul.bf16.vlgmr.msra.gmra.mxu2 %v657_v42 }
  0x2d   : > { %555 = vmatmul.bf16.vlgmr.msra.gmra.mxu3 %v661_v43 }
  0x2e   : > { %527 = vmatmul.bf16.vlgmr.msra.gmra.mxu1 %v653_v44 }
  0x30   : > { %566 = vmatpush.bf16.msrb.mxu0 %v852_v45 }
  0x34   : > { %567 = vmatpush.bf16.msrb.mxu0 %v851_v46 }
  0x38   : > { %568 = vmatpush.bf16.msrb.mxu0 %v850_v47 }
  0x3b   : > { %810 = vmatmul.msk.bf16.vlgmr.msrb.gmra.mxu0 %vm501_vm0, %v665_v50 }
  0xa8   : > { %v514_v51 = vpop.f32.mrf.mxu0 }
  0xa9   : > { %v515_v56 = vadd.f32 %v868_v54, %v514_v51 }
  0xab   : > { %v528_v52 = vpop.f32.mrf.mxu1 }
  0xac   : > { %v529_v60 = vadd.f32 %v528_v52, %v515_v56 }
  0xaf   : > { %v542_v53 = vpop.f32.mrf.mxu2 }
  0xb0   : > { %v516_v55 = vpop.f32.mrf.mxu0  ;;  %v556_v57 = vpop.f32.mrf.mxu3  ;;  %v543_v63 = vadd.f32 %v542_v53, %v529_v60 }
  0xb1   : > { %v517_v58 = vadd.f32 %v868_v54, %v516_v55 }
  0xb2   : > { %v557_v2 = vadd.f32 %v556_v57, %v543_v63 }
  0xb3   : > { %v530_v59 = vpop.f32.mrf.mxu1 }
  0xb4   : > { %v531_v0 = vadd.f32 %v530_v59, %v517_v58 }
  0xb7   : > { %v544_v61 = vpop.f32.mrf.mxu2 }
  0xb8   : > { %v570_v62 = vpop.f32.mrf.mxu0  ;;  %v545_v1 = vadd.f32 %v544_v61, %v531_v0  ;;  %v558_v3 = vpop.f32.mrf.mxu3 }
  0xb9   : > { %v571_v5 = vadd.f32 %v570_v62, %v557_v2 }
  0xba   : > { %v559_v4 = vadd.f32 %v558_v3, %v545_v1 }
  0xbb   : > { %v575_v8 = vmax.f32 %v571_v5, 0.0 }
  0xc0   : > { %v572_v6 = vpop.f32.mrf.mxu0 }
  0xc1   : > { %v573_v7 = vadd.f32 %v572_v6, %v559_v4 }
  0xc3   : > { %v576_v9 = vmax.f32 %v573_v7, 0.0 }
  0xc5   : > { %v857_v10 = vpack.c.bf16 %v576_v9, %v575_v8 }
  0xc7   : > { %858 = vst [vmem:[%s175_s21] sm:$0xff] %v857_v10  }
  0xc8 PF: > { %s13_s12 = sadd.s32 1, %s875_s12  }
  0xc9   : > { %p10_p4 = scmp.ge.s32.totalorder %s13_s12, 4  }
  0xcb   :  { %12 = sbr.rel (!%p10_p4) target bundleno = 1 (0x1), region = 62 }

// kernel: forward.22
= control target key start
LH: loop header
LB: loop body
LE: loop exit
PB: predicated region body
PF: predicated region fallthrough
CT: control target
= control target key end

     0   :  { %s1688_s12 = smov 0   ;;  %s2068_s0 = inlined_call_operand.vmem [shape: bf16[128,800], index: 0, kind: input, shape index: {}]   ;;  %s2069_s1 = inlined_call_operand.vmem [shape: bf16[800,16], index: 1, kind: input, shape index: {}]   ;;  %s2070_s2 = inlined_call_operand.vmem [shape: f32[1,16], index: 2, kind: input, shape index: {}]   ;;  %s2071_s3 = inlined_call_operand.vmem [shape: f32[128,16], index: 3, kind: output, shape index: {}]  }
   0x1 LB: > { %s1187_s13 = sadd.s32 4294967295, %s1666_s12   ;;  %p1191_p0 = scmp.ge.s32.totalorder %s1666_s12, 1  ;;  %s1666_s12 = sphi %s1688_s12, %s13_s12  }
   0x2   : > { %p139_p1 = scmp.lt.s32.totalorder %s1666_s12, 3 }
   0x4   : > { %p140_p2 = pnand %p1191_p0, %p139_p1 }
   0x5   : > { %s1192_s5 = sshll.u32 (!%p140_p2), %s1187_s13, 3 }
   0x6   : > { %143 = sbr.rel (%p140_p2) target bundleno = 315 (0x13b), region = 32  ;;  %p165_p3 = scmp.lt.s32.totalorder (!%p140_p2), %s1192_s5, 15 }
   0xb   : > { %v1557_v0 = vld [vmem:[%s2069_s1 + $0x38] sm:$0xff]  ;;  %v1556_v3 = vld [vmem:[%s2069_s1 + $0x30] sm:$0xff]  ;;  %v1555_v6 = vld [vmem:[%s2069_s1 + $0x28] sm:$0xff]  ;;  %s2077_s5 = smov (!%p165_p3, %s1192_s5), 15  ;;  %vm754_vm0 = vcmask 261120   ;;  %vm1122_vm5 = vcmask 130048  }
   0xc   : > { %v1565_v1 = vld [vmem:[%s2069_s1 + $0x78] sm:$0xff]  ;;  %767 = vmatpush.bf16.msra.mxu0 %v1557_v0  ;;  %1600 = vmatpush.bf16.msra.mxu3 %v1557_v0  ;;  %v1564_v4 = vld [vmem:[%s2069_s1 + $0x70] sm:$0xff]  ;;  %v1563_v7 = vld [vmem:[%s2069_s1 + $0x68] sm:$0xff]  ;;  %s1618_s21 = smul.u32 28, %s2077_s5 }
   0xd   : > { %v1573_v2 = vld [vmem:[%s2069_s1 + $0xb8] sm:$0xff]  ;;  %796 = vmatpush.bf16.msra.mxu1 %v1565_v1  ;;  %v1572_v5 = vld [vmem:[%s2069_s1 + $0xb0] sm:$0xff]  ;;  %v1571_v8 = vld [vmem:[%s2069_s1 + $0xa8] sm:$0xff] }
   0xe   : > { %825 = vmatpush.bf16.msra.mxu2 %v1573_v2  ;;  %v1554_v9 = vld [vmem:[%s2069_s1 + $0x20] sm:$0xff]  ;;  %v1553_v12 = vld [vmem:[%s2069_s1 + $0x18] sm:$0xff]  ;;  %v1552_v15 = vld [vmem:[%s2069_s1 + $0x10] sm:$0xff]  ;;  %s1759_s30 = scalar_lea.vmem %s2068_s0, %s1618_s21 }
   0xf   : > { %v1562_v10 = vld [vmem:[%s2069_s1 + $0x60] sm:$0xff]  ;;  %v1561_v13 = vld [vmem:[%s2069_s1 + $0x58] sm:$0xff]  ;;  %v1560_v16 = vld [vmem:[%s2069_s1 + $0x50] sm:$0xff] }
  0x10   : > { %768 = vmatpush.bf16.msra.mxu0 %v1556_v3  ;;  %1601 = vmatpush.bf16.msra.mxu3 %v1556_v3  ;;  %v1570_v11 = vld [vmem:[%s2069_s1 + $0xa0] sm:$0xff]  ;;  %v1569_v14 = vld [vmem:[%s2069_s1 + $0x98] sm:$0xff]  ;;  %v1568_v17 = vld [vmem:[%s2069_s1 + $0x90] sm:$0xff] }
  0x11   : > { %797 = vmatpush.bf16.msra.mxu1 %v1564_v4  ;;  %v1551_v18 = vld [vmem:[%s2069_s1 + $0x8] sm:$0xff]  ;;  %v1550_v21 = vld [vmem:[%s2069_s1] sm:$0xff]  ;;  %v1525_v25 = vld [vmem:[%s1759_s30 + $0x18] sm:$0xf0] }
  0x12   : > { %826 = vmatpush.bf16.msra.mxu2 %v1572_v5  ;;  %v1559_v19 = vld [vmem:[%s2069_s1 + $0x48] sm:$0xff]  ;;  %v1558_v22 = vld [vmem:[%s2069_s1 + $0x40] sm:$0xff]  ;;  %v1254_v26 = vld [vmem:[%s1759_s30 + $0x70] sm:$0xf] }
  0x13   : > { %v1567_v20 = vld [vmem:[%s2069_s1 + $0x88] sm:$0xff]  ;;  %v1566_v23 = vld [vmem:[%s2069_s1 + $0x80] sm:$0xff]  ;;  %v1581_v32 = vld [vmem:[%s2069_s1 + $0xf8] sm:$0xff] }
  0x14   : > { %769 = vmatpush.bf16.msra.mxu0 %v1555_v6  ;;  %1602 = vmatpush.bf16.msra.mxu3 %v1555_v6  ;;  %v1198_v24 = vld [vmem:[%s1759_s30] sm:$0xf]  ;;  %v1539_v27 = vld [vmem:[%s1759_s30 + $0x88] sm:$0xf0]  ;;  %v1522_v28 = vld [vmem:[%s1759_s30 + $0x4] sm:$0xf] }
  0x15   : > { %798 = vmatpush.bf16.msra.mxu1 %v1563_v7  ;;  %v1200_v29 = vld [vmem:[%s1759_s30 + $0x1c] sm:$0xf0]  ;;  %v1206_v30 = vld [vmem:[%s1759_s30 + $0x8] sm:$0xf]  ;;  %v1526_v31 = vld [vmem:[%s1759_s30 + $0x20] sm:$0xf0]  ;;  %v1199_v34 = vor.u32 %v1525_v25, %v1198_v24  ;;  %v1255_v35 = vor.u32 %v1539_v27, %v1254_v26 }
  0x16   : > { %827 = vmatpush.bf16.msra.mxu2 %v1571_v8  ;;  %v1790_v33 = vld [vmem:[%s2069_s1 + $0x188] sm:$0xff]  ;;  %v1203_v36 = vor.u32 %v1522_v28, %v1200_v29  ;;  %v1207_v37 = vor.u32 %v1526_v31, %v1206_v30  ;;  %v1589_v38 = vld [vmem:[%s2069_s1 + $0x138] sm:$0xff]  ;;  %v1580_v40 = vld [vmem:[%s2069_s1 + $0xf0] sm:$0xff] }
  0x17   : > { %v1798_v39 = vld [vmem:[%s2069_s1 + $0x178] sm:$0xff]  ;;  %v1588_v41 = vld [vmem:[%s2069_s1 + $0x130] sm:$0xff]  ;;  %v1816_v43 = vld [vmem:[%s2069_s1 + $0x180] sm:$0xff] }
  0x18   : > { %770 = vmatpush.bf16.msra.mxu0 %v1554_v9  ;;  %1603 = vmatpush.bf16.msra.mxu3 %v1554_v9  ;;  %v1811_v42 = vld [vmem:[%s2069_s1 + $0x170] sm:$0xff]  ;;  %v1579_v44 = vld [vmem:[%s2069_s1 + $0xe8] sm:$0xff]  ;;  %v1578_v47 = vld [vmem:[%s2069_s1 + $0xe0] sm:$0xff] }
  0x19   : > { %799 = vmatpush.bf16.msra.mxu1 %v1562_v10  ;;  %v1587_v45 = vld [vmem:[%s2069_s1 + $0x128] sm:$0xff]  ;;  %v1586_v48 = vld [vmem:[%s2069_s1 + $0x120] sm:$0xff]  ;;  %v1226_v49 = vld [vmem:[%s1759_s30 + $0x38] sm:$0xf] }
  0x1a   : > { %828 = vmatpush.bf16.msra.mxu2 %v1570_v11  ;;  %v1829_v46 = vld [vmem:[%s2069_s1 + $0x168] sm:$0xff]  ;;  %v1532_v50 = vld [vmem:[%s1759_s30 + $0x50] sm:$0xf0]  ;;  %v1546_v52 = vld [vmem:[%s1759_s30 + $0xc0] sm:$0xf0] }
  0x1b   : > { %v1282_v51 = vld [vmem:[%s1759_s30 + $0xa8] sm:$0xf]  ;;  %v1529_v53 = vld [vmem:[%s1759_s30 + $0x3c] sm:$0xf]  ;;  %v1228_v54 = vld [vmem:[%s1759_s30 + $0x54] sm:$0xf0]  ;;  %v1227_v59 = vor.u32 %v1532_v50, %v1226_v49 }
  0x1c   : > { %771 = vmatpush.bf16.msra.mxu0 %v1553_v12  ;;  %1604 = vmatpush.bf16.msra.mxu3 %v1553_v12  ;;  %v1234_v55 = vld [vmem:[%s1759_s30 + $0x40] sm:$0xf]  ;;  %v1533_v56 = vld [vmem:[%s1759_s30 + $0x58] sm:$0xf0]  ;;  %v1283_v60 = vor.u32 %v1546_v52, %v1282_v51  ;;  %v1231_v61 = vor.u32 %v1529_v53, %v1228_v54  ;;  %v1576_v1 = vld [vmem:[%s2069_s1 + $0xd0] sm:$0xff] }
  0x1d   : > { %800 = vmatpush.bf16.msra.mxu1 %v1561_v13  ;;  %v1849_v57 = vld [vmem:[%s2069_s1 + $0x160] sm:$0xff]  ;;  %v1577_v58 = vld [vmem:[%s2069_s1 + $0xd8] sm:$0xff]  ;;  %v1235_v62 = vor.u32 %v1533_v56, %v1234_v55  ;;  %v1584_v2 = vld [vmem:[%s2069_s1 + $0x110] sm:$0xff] }
  0x1e   : > { %829 = vmatpush.bf16.msra.mxu2 %v1569_v14  ;;  %v1585_v63 = vld [vmem:[%s2069_s1 + $0x118] sm:$0xff]  ;;  %v1592_v3 = vld [vmem:[%s2069_s1 + $0x150] sm:$0xff]  ;;  %v1575_v4 = vld [vmem:[%s2069_s1 + $0xc8] sm:$0xff] }
  0x1f   : > { %v1593_v0 = vld [vmem:[%s2069_s1 + $0x158] sm:$0xff]  ;;  %v1583_v5 = vld [vmem:[%s2069_s1 + $0x108] sm:$0xff]  ;;  %v1574_v7 = vld [vmem:[%s2069_s1 + $0xc0] sm:$0xff] }
  0x20   : > { %772 = vmatpush.bf16.msra.mxu0 %v1552_v15  ;;  %1605 = vmatpush.bf16.msra.mxu3 %v1552_v15  ;;  %v1591_v6 = vld [vmem:[%s2069_s1 + $0x148] sm:$0xff]  ;;  %v1582_v8 = vld [vmem:[%s2069_s1 + $0x100] sm:$0xff]  ;;  %v1536_v9 = vld [vmem:[%s1759_s30 + $0x74] sm:$0xf] }
  0x21   : > { %801 = vmatpush.bf16.msra.mxu1 %v1560_v16  ;;  %v1256_v10 = vld [vmem:[%s1759_s30 + $0x8c] sm:$0xf0]  ;;  %v1523_v11 = vld [vmem:[%s1759_s30 + $0xc] sm:$0xf]  ;;  %v1208_v12 = vld [vmem:[%s1759_s30 + $0x24] sm:$0xf0] }
  0x22   : > { %830 = vmatpush.bf16.msra.mxu2 %v1568_v17  ;;  %v1262_v13 = vld [vmem:[%s1759_s30 + $0x78] sm:$0xf]  ;;  %v1540_v14 = vld [vmem:[%s1759_s30 + $0x90] sm:$0xf0]  ;;  %v1590_v15 = vld [vmem:[%s2069_s1 + $0x140] sm:$0xff] }
  0x23   : > { %v1214_v16 = vld [vmem:[%s1759_s30 + $0x10] sm:$0xf]  ;;  %v1527_v17 = vld [vmem:[%s1759_s30 + $0x28] sm:$0xf0]  ;;  %v1236_v24 = vld [vmem:[%s1759_s30 + $0x5c] sm:$0xf0] }
  0x24   : > { %773 = vmatpush.bf16.msra.mxu0 %v1551_v18  ;;  %1606 = vmatpush.bf16.msra.mxu3 %v1551_v18  ;;  %v1211_v18 = vor.u32 %v1523_v11, %v1208_v12  ;;  %v1284_v25 = vld [vmem:[%s1759_s30 + $0xc4] sm:$0xf0]  ;;  %v1290_v26 = vld [vmem:[%s1759_s30 + $0xb0] sm:$0xf]  ;;  %v1547_v27 = vld [vmem:[%s1759_s30 + $0xc8] sm:$0xf0] }
  0x25   : > { %802 = vmatpush.bf16.msra.mxu1 %v1559_v19  ;;  %v1259_v19 = vor.u32 %v1536_v9, %v1256_v10  ;;  %v1242_v28 = vld [vmem:[%s1759_s30 + $0x48] sm:$0xf]  ;;  %v1534_v29 = vld [vmem:[%s1759_s30 + $0x60] sm:$0xf0]  ;;  %v1272_v49 = vld [vmem:[%s1759_s30 + $0x9c] sm:$0xf0] }
  0x26   : > { %831 = vmatpush.bf16.msra.mxu2 %v1567_v20  ;;  %v1263_v20 = vor.u32 %v1540_v14, %v1262_v13  ;;  %v1250_v50 = vld [vmem:[%s1759_s30 + $0x50] sm:$0xf]  ;;  %v1535_v51 = vld [vmem:[%s1759_s30 + $0x68] sm:$0xf0]  ;;  %v1298_v52 = vld [vmem:[%s1759_s30 + $0xb8] sm:$0xf] }
  0x27   : > { %v1548_v53 = vld [vmem:[%s1759_s30 + $0xd0] sm:$0xf0]  ;;  %v1251_v56 = vor.u32 %v1535_v51, %v1250_v50 }
  0x28   : > { %774 = vmatpush.bf16.msra.mxu0 %v1550_v21  ;;  %1607 = vmatpush.bf16.msra.mxu3 %v1550_v21  ;;  %v1215_v21 = vor.u32 %v1527_v17, %v1214_v16 }
  0x29   : > { %803 = vmatpush.bf16.msra.mxu1 %v1558_v22  ;;  %v1543_v22 = vld [vmem:[%s1759_s30 + $0xac] sm:$0xf] }
  0x2a   : > { %832 = vmatpush.bf16.msra.mxu2 %v1566_v23  ;;  %v1530_v23 = vld [vmem:[%s1759_s30 + $0x44] sm:$0xf]  ;;  %v1287_v31 = vor.u32 %v1543_v22, %v1284_v25 }
  0x2b   : > { %775 = vmatmul.bf16.vlgmr.msra.gmra.mxu0 %v1199_v34  ;;  %785 = vmatmul.bf16.vlgmr.msra.gmra.mxu3 %v1255_v35  ;;  %v1239_v30 = vor.u32 %v1530_v23, %v1236_v24  ;;  %v1537_v34 = vld [vmem:[%s1759_s30 + $0x7c] sm:$0xf]  ;;  %v1264_v35 = vld [vmem:[%s1759_s30 + $0x94] sm:$0xf0] }
  0x2c   : > { %854 = vmatpush.bf16.msrb.mxu3 %v1581_v32  ;;  %804 = vmatmul.bf16.vlgmr.msra.gmra.mxu1 %v1203_v36  ;;  %v1291_v32 = vor.u32 %v1547_v27, %v1290_v26  ;;  %v1531_v36 = vld [vmem:[%s1759_s30 + $0x4c] sm:$0xf] }
  0x2d   : > { %833 = vmatmul.bf16.vlgmr.msra.gmra.mxu2 %v1207_v37  ;;  %883 = vmatpush.bf16.msrb.mxu0 %v1589_v38  ;;  %v1244_v37 = vld [vmem:[%s1759_s30 + $0x64] sm:$0xf0]  ;;  %v1222_v38 = vld [vmem:[%s1759_s30 + $0x18] sm:$0xf] }
  0x2e   : > { %947 = vmatpush.bf16.msrb.mxu2 %v1790_v33  ;;  %1608 = vmatpush.bf16.msrb.mxu1 %v1798_v39 }
  0x30   : > { %855 = vmatpush.bf16.msrb.mxu3 %v1580_v40  ;;  %v1270_v40 = vld [vmem:[%s1759_s30 + $0x80] sm:$0xf] }
  0x31   : > { %884 = vmatpush.bf16.msrb.mxu0 %v1588_v41  ;;  %v1541_v41 = vld [vmem:[%s1759_s30 + $0x98] sm:$0xf0] }
  0x32   : > { %948 = vmatpush.bf16.msrb.mxu2 %v1816_v43  ;;  %1609 = vmatpush.bf16.msrb.mxu1 %v1811_v42 }
  0x34   : > { %856 = vmatpush.bf16.msrb.mxu3 %v1579_v44 }
  0x35   : > { %885 = vmatpush.bf16.msrb.mxu0 %v1587_v45  ;;  %v1271_v45 = vor.u32 %v1541_v41, %v1270_v40 }
  0x36   : > { %1610 = vmatpush.bf16.msrb.mxu1 %v1829_v46 }
  0x38   : > { %857 = vmatpush.bf16.msrb.mxu3 %v1578_v47  ;;  %v1292_v47 = vld [vmem:[%s1759_s30 + $0xcc] sm:$0xf0] }
  0x39   : > { %886 = vmatpush.bf16.msrb.mxu0 %v1586_v48  ;;  %v1538_v48 = vld [vmem:[%s1759_s30 + $0x84] sm:$0xf] }
  0x3a   : > { %1611 = vmatpush.bf16.msrb.mxu1 %v1849_v57  ;;  %v1275_v55 = vor.u32 %v1538_v48, %v1272_v49 }
  0x3b   : > { %780 = vmatmul.bf16.gmra.mxu0 %v1227_v59  ;;  %790 = vmatmul.bf16.gmra.mxu3 %v1283_v60  ;;  %v1306_v59 = vld [vmem:[%s1759_s30 + $0xc0] sm:$0xf]  ;;  %v1549_v60 = vld [vmem:[%s1759_s30 + $0xd8] sm:$0xf0] }
  0x3c   : > { %858 = vmatpush.bf16.msrb.mxu3 %v1577_v58  ;;  %809 = vmatmul.bf16.gmra.mxu1 %v1231_v61  ;;  %v1545_v58 = vld [vmem:[%s1759_s30 + $0xbc] sm:$0xf]  ;;  %v1300_v61 = vld [vmem:[%s1759_s30 + $0xd4] sm:$0xf0] }
  0x3d   : > { %838 = vmatmul.bf16.gmra.mxu2 %v1235_v62  ;;  %887 = vmatpush.bf16.msrb.mxu0 %v1585_v63  ;;  %v1278_v62 = vld [vmem:[%s1759_s30 + $0x88] sm:$0xf]  ;;  %v1542_v63 = vld [vmem:[%s1759_s30 + $0xa0] sm:$0xf0] }
  0x3e   : > { %1612 = vmatpush.bf16.msrb.mxu1 %v1593_v0 }
  0x40   : > { %859 = vmatpush.bf16.msrb.mxu3 %v1576_v1  ;;  %v1216_v1 = vld [vmem:[%s1759_s30 + $0x2c] sm:$0xf0] }
  0x41   : > { %888 = vmatpush.bf16.msrb.mxu0 %v1584_v2  ;;  %v1307_v2 = vor.u32 %v1549_v60, %v1306_v59 }
  0x42   : > { %1613 = vmatpush.bf16.msrb.mxu1 %v1592_v3 }
  0x44   : > { %860 = vmatpush.bf16.msrb.mxu3 %v1575_v4  ;;  %v1279_v4 = vor.u32 %v1542_v63, %v1278_v62 }
  0x45   : > { %889 = vmatpush.bf16.msrb.mxu0 %v1583_v5 }
  0x46   : > { %1614 = vmatpush.bf16.msrb.mxu1 %v1591_v6 }
  0x48   : > { %861 = vmatpush.bf16.msrb.mxu3 %v1574_v7 }
  0x49   : > { %890 = vmatpush.bf16.msrb.mxu0 %v1582_v8 }
  0x4a   : > { %1615 = vmatpush.bf16.msrb.mxu1 %v1590_v15 }
  0x4b   : > { %862 = vmatmul.bf16.vlgmr.msrb.gmra.mxu3 %v1211_v18 }
  0x4c   : > { %1616 = vmatpush.bf16.msra.mxu3 %v1790_v33  ;;  %814 = vmatmul.bf16.gmra.mxu1 %v1259_v19  ;;  %v1243_v33 = vor.u32 %v1534_v29, %v1242_v28 }
  0x4d   : > { %912 = vmatpush.bf16.msra.mxu0 %v1798_v39  ;;  %843 = vmatmul.bf16.gmra.mxu2 %v1263_v20  ;;  %v1528_v39 = vld [vmem:[%s1759_s30 + $0x30] sm:$0xf0] }
  0x4e   : > { %891 = vmatmul.bf16.vlgmr.msrb.gmra.mxu0 %v1215_v21  ;;  %v1223_v44 = vor.u32 %v1528_v39, %v1222_v38 }
  0x50   : > { %1617 = vmatpush.bf16.msra.mxu3 %v1816_v43  ;;  %v1247_v43 = vor.u32 %v1531_v36, %v1244_v37 }
  0x51   : > { %913 = vmatpush.bf16.msra.mxu0 %v1811_v42  ;;  %v1267_v42 = vor.u32 %v1537_v34, %v1264_v35 }
  0x55   : > { %914 = vmatpush.bf16.msra.mxu0 %v1829_v46  ;;  %v1544_v46 = vld [vmem:[%s1759_s30 + $0xb4] sm:$0xf] }
  0x56   : > { %v1295_v54 = vor.u32 %v1544_v46, %v1292_v47 }
  0x59   : > { %915 = vmatpush.bf16.msra.mxu0 %v1849_v57  ;;  %v1299_v57 = vor.u32 %v1548_v53, %v1298_v52 }
  0x5b   : > { %867 = vmatmul.bf16.gmra.mxu3 %v1239_v30 }
  0x5c   : > { %819 = vmatmul.bf16.gmra.mxu1 %v1287_v31 }
  0x5d   : > { %916 = vmatpush.bf16.msra.mxu0 %v1593_v0  ;;  %848 = vmatmul.bf16.gmra.mxu2 %v1291_v32  ;;  %v1524_v0 = vld [vmem:[%s1759_s30 + $0x14] sm:$0xf]  ;;  %s1195_s30 = sshll.u32 %s2077_s5, 3 }
  0x5e   : > { %896 = vmatmul.bf16.gmra.mxu0 %v1243_v33  ;;  %v1219_v5 = vor.u32 %v1524_v0, %v1216_v1  ;;  %s2002_s5 = scalar_lea.vmem %s2071_s3, %s1195_s30 }
  0x61   : > { %917 = vmatpush.bf16.msra.mxu0 %v1592_v3  ;;  %v1303_v3 = vor.u32 %v1545_v58, %v1300_v61 }
  0x65   : > { %918 = vmatpush.bf16.msra.mxu0 %v1591_v6  ;;  %v1941_v6 = vld [vmem:[%s2070_s2] ss:$0 sm:$0xff] }
  0x69   : > { %919 = vmatpush.bf16.msra.mxu0 %v1590_v15 }
  0x6b   : > { %872 = vmatmul.bf16.gmra.mxu3 %v1267_v42 }
  0x6c   : > { %925 = vmatmul.bf16.vlgmr.msrb.gmra.mxu1 %v1247_v43 }
  0x6d   : > { %1508 = vmatmul.msk.bf16.vlgmr.msrb.gmra.mxu2 %vm754_vm0, %v1223_v44 }
  0x6e   : > { %901 = vmatmul.bf16.gmra.mxu0 %v1271_v45 }
  0x7b   : > { %877 = vmatmul.bf16.gmra.mxu3 %v1295_v54 }
  0x7c   : > { %930 = vmatmul.bf16.gmra.mxu1 %v1275_v55 }
  0x7d   : > { %1509 = vmatmul.msk.bf16.gmra.mxu2 %vm754_vm0, %v1251_v56 }
  0x7e   : > { %906 = vmatmul.bf16.gmra.mxu0 %v1299_v57 }
  0x8b   : > { %1511 = vmatmul.msk.bf16.vlgmr.msra.gmra.mxu3 %vm754_vm0, %v1307_v2 }
  0x8c   : > { %935 = vmatmul.bf16.gmra.mxu1 %v1303_v3 }
  0x8d   : > { %1510 = vmatmul.msk.bf16.gmra.mxu2 %vm754_vm0, %v1279_v4 }
  0x8e   : > { %920 = vmatmul.bf16.vlgmr.msra.gmra.mxu0 %v1219_v5 }
  0xa8   : > { %v776_v7 = vpop.f32.mrf.mxu0 }
  0xa9   : > { %v777_v8 = vadd.f32 %v1941_v6, %v776_v7  ;;  %v805_v9 = vpop.f32.mrf.mxu1 }
  0xab   : > { %v806_v10 = vadd.f32 %v805_v9, %v777_v8 }
  0xae   : > { %v786_v11 = vpop.f32.mrf.mxu3 }
  0xaf   : > { %v787_v7 = vadd.f32 %v1941_v6, %v786_v11 }
  0xb0   : > { %v834_v12 = vpop.f32.mrf.mxu2  ;;  %v778_v14 = vpop.f32.mrf.mxu0 }
  0xb1   : > { %v1944_v13 = vadd.f32 %v834_v12, %v806_v10  ;;  %v779_v15 = vadd.f32 %v1941_v6, %v778_v14  ;;  %v807_v16 = vpop.f32.mrf.mxu1 }
  0xb3   : > { %v808_v17 = vadd.f32 %v807_v16, %v779_v15 }
  0xb6   : > { %v1947_v18 = vpop.f32.mrf.mxu3 }
  0xb7   : > { %v789_v11 = vadd.f32 %v1941_v6, %v1947_v18 }
  0xb8   : > { %v836_v19 = vpop.f32.mrf.mxu2  ;;  %v781_v21 = vpop.f32.mrf.mxu0 }
  0xb9   : > { %v1949_v20 = vadd.f32 %v836_v19, %v808_v17  ;;  %v810_v22 = vpop.f32.mrf.mxu1  ;;  %v782_v47 = vadd.f32 %v1941_v6, %v781_v21 }
  0xbb   : > { %v811_v51 = vadd.f32 %v810_v22, %v782_v47 }
  0xbe   : > { %v791_v23 = vpop.f32.mrf.mxu3 }
  0xbf   : > { %v792_v4 = vadd.f32 %v1941_v6, %v791_v23 }
  0xc0   : > { %v839_v24 = vpop.f32.mrf.mxu2  ;;  %v783_v25 = vpop.f32.mrf.mxu0 }
  0xc1   : > { %v812_v26 = vpop.f32.mrf.mxu1  ;;  %v840_v53 = vadd.f32 %v839_v24, %v811_v51  ;;  %v784_v56 = vadd.f32 %v1941_v6, %v783_v25 }
  0xc3   : > { %v813_v60 = vadd.f32 %v812_v26, %v784_v56 }
  0xc6   : > { %v1951_v27 = vpop.f32.mrf.mxu3 }
  0xc8   : > { %v841_v28 = vpop.f32.mrf.mxu2 }
  0xc9   : > { %v815_v29 = vpop.f32.mrf.mxu1  ;;  %v842_v62 = vadd.f32 %v841_v28, %v813_v60 }
  0xca   : > { %v816_v12 = vadd.f32 %v815_v29, %v787_v7 }
  0xcb   : > { %v892_v30 = vpop.f32.mrf.mxu0 }
  0xce   : > { %v863_v31 = vpop.f32.mrf.mxu3 }
  0xcf   : > { %v864_v15 = vadd.f32 %v863_v31, %v1944_v13 }
  0xd0   : > { %v844_v32 = vpop.f32.mrf.mxu2 }
  0xd1   : > { %v1953_v33 = vpop.f32.mrf.mxu1  ;;  %v845_v17 = vadd.f32 %v844_v32, %v816_v12  ;;  %v893_v23 = vadd.f32 %v892_v30, %v864_v15 }
  0xd3   : > { %v1955_v34 = vpop.f32.mrf.mxu0 }
  0xd6   : > { %v1957_v35 = vpop.f32.mrf.mxu3 }
  0xd7   : > { %v866_v30 = vadd.f32 %v1957_v35, %v1949_v20 }
  0xd8   : > { %v1959_v36 = vpop.f32.mrf.mxu2 }
  0xd9   : > { %v820_v37 = vpop.f32.mrf.mxu1  ;;  %v895_v20 = vadd.f32 %v1955_v34, %v866_v30 }
  0xda   : > { %v821_v10 = vadd.f32 %v820_v37, %v792_v4 }
  0xdb   : > { %v897_v38 = vpop.f32.mrf.mxu0 }
  0xde   : > { %v868_v39 = vpop.f32.mrf.mxu3 }
  0xdf   : > { %v869_v57 = vadd.f32 %v868_v39, %v840_v53  ;;  %v794_v39 = vadd.f32 %v1941_v6, %v1951_v27 }
  0xe0   : > { %v849_v40 = vpop.f32.mrf.mxu2 }
  0xe1   : > { %v822_v41 = vpop.f32.mrf.mxu1  ;;  %v898_v61 = vadd.f32 %v897_v38, %v869_v57  ;;  %v850_v16 = vadd.f32 %v849_v40, %v821_v10  ;;  %v818_v40 = vadd.f32 %v1953_v33, %v789_v11 }
  0xe3   : > { %v899_v42 = vpop.f32.mrf.mxu0 }
  0xe6   : > { %v870_v43 = vpop.f32.mrf.mxu3 }
  0xe7   : > { %v871_v2 = vadd.f32 %v870_v43, %v842_v62  ;;  %v823_v43 = vadd.f32 %v822_v41, %v794_v39 }
  0xe8   : > { %v1961_v44 = vpop.f32.mrf.mxu2 }
  0xe9   : > { %v926_v45 = vpop.f32.mrf.mxu1  ;;  %v900_v14 = vadd.f32 %v899_v42, %v871_v2  ;;  %v852_v27 = vadd.f32 %v1961_v44, %v823_v43 }
  0xea   : > { %v927_v63 = vadd.f32 %v926_v45, %v898_v61  ;;  %v847_v45 = vadd.f32 %v1959_v36, %v818_v40 }
  0xeb   : > { %v902_v46 = vpop.f32.mrf.mxu0 }
  0xee   : > { %v873_v48 = vpop.f32.mrf.mxu3 }
  0xef   : > { %v874_v25 = vadd.f32 %v873_v48, %v845_v17 }
  0xf0   : > { %v950_v49 = vpop.f32.mrf.mxu2 }
  0xf1   : > { %v928_v50 = vpop.f32.mrf.mxu1  ;;  %v903_v42 = vadd.f32 %v902_v46, %v874_v25 }
  0xf2   : > { %v929_v19 = vadd.f32 %v928_v50, %v900_v14 }
  0xf3   : > { %v1964_v52 = vpop.f32.mrf.mxu0 }
  0xf6   : > { %v875_v54 = vpop.f32.mrf.mxu3 }
  0xf7   : > { %v876_v53 = vadd.f32 %v875_v54, %v847_v45 }
  0xf8   : > { %v1966_v55 = vpop.f32.mrf.mxu2 }
  0xf9   : > { %v931_v58 = vpop.f32.mrf.mxu1  ;;  %v905_v54 = vadd.f32 %v1964_v52, %v876_v53 }
  0xfa   : > { %v932_v47 = vadd.f32 %v931_v58, %v903_v42 }
  0xfb   : > { %v907_v59 = vpop.f32.mrf.mxu0 }
  0xfe   : > { %v878_v0 = vpop.f32.mrf.mxu3 }
  0xff   : > { %v879_v22 = vadd.f32 %v878_v0, %v850_v16 }
 0x100   : > { %v955_v1 = vpop.f32.mrf.mxu2 }
 0x101   : > { %v956_v3 = vadd.f32 %v955_v1, %v927_v63  ;;  %v933_v5 = vpop.f32.mrf.mxu1  ;;  %v908_v32 = vadd.f32 %v907_v59, %v879_v22 }
 0x102   : > { %v934_v62 = vadd.f32 %v933_v5, %v905_v54 }
 0x103   : > { %v1514_v8 = vmul.f32 -1.442695, %v956_v3  ;;  %v909_v9 = vpop.f32.mrf.mxu0 }
 0x105   : > { %1628 = vpow2.f32 %v1514_v8 }
 0x106   : > { %v880_v21 = vpop.f32.mrf.mxu3 }
 0x107   : > { %v881_v56 = vadd.f32 %v880_v21, %v852_v27 }
 0x108   : > { %v957_v24 = vpop.f32.mrf.mxu2 }
 0x109   : > { %v958_v26 = vadd.f32 %v957_v24, %v929_v19  ;;  %v936_v29 = vpop.f32.mrf.mxu1  ;;  %v910_v61 = vadd.f32 %v909_v9, %v881_v56 }
 0x10a   : > { %v937_v18 = vadd.f32 %v936_v29, %v908_v32 }
 0x10b   : > { %v1629_v28 = vpop.eup %1628  ;;  %v1515_v38 = vmul.f32 -1.442695, %v958_v26  ;;  %v921_v37 = vpop.f32.mrf.mxu0 }
 0x10c   : > { %v1976_v13 = vadd.f32 1.0, %v1629_v28  ;;  %v922_v31 = vadd.f32 %v921_v37, %v893_v23 }
 0x10d   : > { %1630 = vpow2.f32 %v1515_v38 }
 0x10e   : > { %1632 = vrcp.f32 %v1976_v13  ;;  %v951_v48 = vadd.f32 %v950_v49, %v922_v31  ;;  %v965_v6 = vpop.f32.mrf.mxu3  ;;  %v1041_v0 = vand.u32 2147483647, %v1976_v13  ;;  %v1043_v1 = vand.u32 2147483648, %v1976_v13 }
 0x10f   : > { %v966_v51 = vadd.f32 %v965_v6, %v937_v18  ;;  %vm1037_vm2 = vweird.f32 %v1976_v13 }
 0x110   : > { %v960_v50 = vpop.f32.mrf.mxu2  ;;  %v1512_v33 = vmul.f32 -1.442695, %v951_v48  ;;  %vm1042_vm4 = vcmp.eq.f32.partialorder %v1041_v0, 8.507059e+37  ;;  %v1044_v17 = vor.u32 1.1754944e-38, %v1043_v1 }
 0x111   : > { %v961_v46 = vadd.f32 %v960_v50, %v932_v47  ;;  %v1518_v57 = vmul.f32 -1.442695, %v966_v51  ;;  %v938_v58 = vpop.f32.mrf.mxu1 }
 0x112   : > { %1634 = vpow2.f32 %v1512_v33  ;;  %v939_v2 = vadd.f32 %v938_v58, %v910_v61 }
 0x113   : > { %v1631_v35 = vpop.eup %1630  ;;  %v1516_v41 = vmul.f32 -1.442695, %v961_v46  ;;  %v923_v59 = vpop.f32.mrf.mxu0  ;;  %1636 = vpow2.f32 %v1518_v57 }
 0x114   : > { %v1633_v60 = vpop.eup %1632  ;;  %v1985_v36 = vadd.f32 1.0, %v1631_v35  ;;  %v924_v49 = vadd.f32 %v923_v59, %v895_v20 }
 0x115   : > { %v1033_v44 = vmul.f32 %v1633_v60, %v1976_v13  ;;  %1638 = vpow2.f32 %v1516_v41  ;;  %vm1038_vm1 = vweird.f32 %v1633_v60 }
 0x116   : > { %1640 = vrcp.f32 %v1985_v36  ;;  %v953_v63 = vadd.f32 %v1966_v55, %v924_v49  ;;  %v967_v4 = vpop.f32.mrf.mxu3  ;;  %vm1039_vm3 = vmor %vm1037_vm2, %vm1038_vm1  ;;  %v1056_v28 = vand.u32 2147483647, %v1985_v36  ;;  %v1058_v11 = vand.u32 2147483648, %v1985_v36 }
 0x117   : > { %v1034_v34 = vsub.f32 1.0, %v1033_v44  ;;  %v968_v15 = vadd.f32 %v967_v4, %v939_v2  ;;  %vm1052_vm7 = vweird.f32 %v1985_v36 }
 0x118   : > { %v962_v3 = vpop.f32.mrf.mxu2  ;;  %v1635_v7 = vpop.eup %1634  ;;  %v1513_v52 = vmul.f32 -1.442695, %v953_v63  ;;  %vm1057_vm9 = vcmp.eq.f32.partialorder %v1056_v28, 8.507059e+37  ;;  %v1059_v30 = vor.u32 1.1754944e-38, %v1058_v11 }
 0x119   : > { %v1035_v8 = vmul.f32 %v1633_v60, %v1034_v34  ;;  %v963_v10 = vadd.f32 %v962_v3, %v934_v62  ;;  %v1637_v12 = vpop.eup %1636  ;;  %v1995_v9 = vadd.f32 1.0, %v1635_v7  ;;  %v1519_v23 = vmul.f32 -1.442695, %v968_v15 }
 0x11a   : > { %v1997_v14 = vadd.f32 1.0, %v1637_v12  ;;  %1642 = vpow2.f32 %v1513_v52 }
 0x11b   : > { %v1639_v5 = vpop.eup %1638  ;;  %v1036_v55 = vadd.f32 %v1633_v60, %v1035_v8  ;;  %1644 = vrcp.f32 %v1995_v9  ;;  %v1517_v24 = vmul.f32 -1.442695, %v963_v10  ;;  %v1011_v29 = vand.u32 2147483647, %v1995_v9 }
 0x11c   : > { %v1641_v16 = vpop.eup %1640  ;;  %v2006_v22 = vadd.f32 1.0, %v1639_v5  ;;  %1646 = vrcp.f32 %v1997_v14  ;;  %v1013_v13 = vand.u32 2147483648, %v1995_v9  ;;  %vm1007_vm10 = vweird.f32 %v1995_v9 }
 0x11d   : > { %v1040_v19 = vsel %vm1039_vm3, %v1633_v60, %v1036_v55  ;;  %v1048_v21 = vmul.f32 %v1641_v16, %v1985_v36  ;;  %vm1053_vm6 = vweird.f32 %v1641_v16  ;;  %vm2022_vm11 = vcmp.eq.f32.partialorder %v1011_v29, 8.507059e+37 }
 0x11e   : > { %v1045_v25 = vsel %vm1042_vm4, %v1044_v17, %v1040_v19  ;;  %1648 = vrcp.f32 %v2006_v22  ;;  %vm1054_vm8 = vmor %vm1052_vm7, %vm1053_vm6  ;;  %v1014_v27 = vor.u32 1.1754944e-38, %v1013_v13  ;;  %vm1067_vm12 = vweird.f32 %v2006_v22 }
 0x11f   : > { %1125 = vst.msk [vmem:[%s2002_s5 + $0x10] sm:$0xff] %vm1122_vm5, %v1045_v25  ;;  %v1049_v26 = vsub.f32 1.0, %v1048_v21  ;;  %1650 = vpow2.f32 %v1517_v24  ;;  %v1071_v33 = vand.u32 2147483647, %v2006_v22  ;;  %v1073_v57 = vand.u32 2147483648, %v2006_v22 }
 0x120   : > { %v1643_v38 = vpop.eup %1642  ;;  %1652 = vpow2.f32 %v1519_v23  ;;  %v1103_v20 = vand.u32 2147483648, %v1997_v14  ;;  %v1101_v36 = vand.u32 2147483647, %v1997_v14  ;;  %vm1097_vm1 = vweird.f32 %v1997_v14 }
 0x121   : > { %v1050_v37 = vmul.f32 %v1641_v16, %v1049_v26  ;;  %v1645_v39 = vpop.eup %1644  ;;  %v2016_v31 = vadd.f32 1.0, %v1643_v38  ;;  %vm2038_vm2 = vcmp.eq.f32.partialorder %v1071_v33, 8.507059e+37  ;;  %v1074_v0 = vor.u32 1.1754944e-38, %v1073_v57 }
 0x122   : > { %v1003_v40 = vmul.f32 %v1645_v39, %v1995_v9  ;;  %v1647_v42 = vpop.eup %1646  ;;  %vm1008_vm13 = vweird.f32 %v1645_v39  ;;  %v1104_v1 = vor.u32 1.1754944e-38, %v1103_v20  ;;  %vm1102_vm6 = vcmp.eq.f32.partialorder %v1101_v36, 8.507059e+37 }
 0x123   : > { %v1051_v32 = vadd.f32 %v1641_v16, %v1050_v37  ;;  %1654 = vrcp.f32 %v2016_v31  ;;  %v1093_v48 = vmul.f32 %v1647_v42, %v1997_v14  ;;  %vm1098_vm14 = vweird.f32 %v1647_v42  ;;  %vm1009_vm15 = vmor %vm1007_vm10, %vm1008_vm13 }
 0x124   : > { %v1649_v43 = vpop.eup %1648  ;;  %v1004_v45 = vsub.f32 1.0, %v1003_v40  ;;  %vm1099_vm3 = vmor %vm1097_vm1, %vm1098_vm14  ;;  %v1026_v52 = vand.u32 2147483647, %v2016_v31  ;;  %v1028_v10 = vand.u32 2147483648, %v2016_v31 }
 0x125   : > { %v1055_v18 = vsel %vm1054_vm8, %v1641_v16, %v1051_v32  ;;  %v1063_v50 = vmul.f32 %v1649_v43, %v2006_v22  ;;  %v1651_v51 = vpop.eup %1650  ;;  %v1094_v46 = vsub.f32 1.0, %v1093_v48  ;;  %vm1068_vm0 = vweird.f32 %v1649_v43 }
 0x126   : > { %v1060_v6 = vsel %vm1057_vm9, %v1059_v30, %v1055_v18  ;;  %v1005_v53 = vmul.f32 %v1645_v39, %v1004_v45  ;;  %v999_v35 = vadd.f32 1.0, %v1651_v51  ;;  %v1653_v41 = vpop.eup %1652  ;;  %vm1069_vm4 = vmor %vm1067_vm12, %vm1068_vm0  ;;  %vm1022_vm8 = vweird.f32 %v2016_v31 }
 0x127   : > { %1126 = vst.msk [vmem:[%s2002_s5 + $0x18] sm:$0xff] %vm1122_vm5, %v1060_v6  ;;  %v1064_v56 = vsub.f32 1.0, %v1063_v50  ;;  %v1095_v60 = vmul.f32 %v1647_v42, %v1094_v46  ;;  %v1001_v4 = vadd.f32 1.0, %v1653_v41  ;;  %v1029_v15 = vor.u32 1.1754944e-38, %v1028_v10 }
 0x128   : > { %v1006_v59 = vadd.f32 %v1645_v39, %v1005_v53  ;;  %1656 = vrcp.f32 %v999_v35  ;;  %vm1027_vm10 = vcmp.eq.f32.partialorder %v1026_v52, 8.507059e+37  ;;  %v1088_v21 = vand.u32 2147483648, %v999_v35 }
 0x129   : > { %v1655_v49 = vpop.eup %1654  ;;  %v1065_v44 = vmul.f32 %v1649_v43, %v1064_v56  ;;  %v1096_v61 = vadd.f32 %v1647_v42, %v1095_v60  ;;  %1658 = vrcp.f32 %v1001_v4  ;;  %v1086_v25 = vand.u32 2147483647, %v999_v35 }
 0x12a   : > { %v1010_v54 = vsel %vm1009_vm15, %v1645_v39, %v1006_v59  ;;  %v1018_v34 = vmul.f32 %v1655_v49, %v2016_v31  ;;  %vm1023_vm7 = vweird.f32 %v1655_v49  ;;  %vm1082_vm12 = vweird.f32 %v999_v35 }
 0x12b   : > { %v1015_v62 = vsel %vm2022_vm11, %v1014_v27, %v1010_v54  ;;  %v1066_v63 = vadd.f32 %v1649_v43, %v1065_v44  ;;  %v1100_v2 = vsel %vm1099_vm3, %v1647_v42, %v1096_v61  ;;  %vm1024_vm9 = vmor %vm1022_vm8, %vm1023_vm7  ;;  %v1089_v28 = vor.u32 1.1754944e-38, %v1088_v21 }
 0x12c   : > { %1123 = vst.msk [vmem:[%s2002_s5] sm:$0xff] %vm1122_vm5, %v1015_v62  ;;  %v1019_v3 = vsub.f32 1.0, %v1018_v34  ;;  %v1105_v8 = vsel %vm1102_vm6, %v1104_v1, %v1100_v2  ;;  %vm1087_vm14 = vcmp.eq.f32.partialorder %v1086_v25, 8.507059e+37  ;;  %v1118_v37 = vand.u32 2147483648, %v1001_v4 }
 0x12d   : > { %v1070_v7 = vsel %vm1069_vm4, %v1649_v43, %v1066_v63  ;;  %1129 = vst.msk [vmem:[%s2002_s5 + $0x30] sm:$0xff] %vm1122_vm5, %v1105_v8  ;;  %v1116_v13 = vand.u32 2147483647, %v1001_v4  ;;  %vm1112_vm0 = vweird.f32 %v1001_v4 }
 0x12e   : > { %v1075_v12 = vsel %vm2038_vm2, %v1074_v0, %v1070_v7  ;;  %v1020_v9 = vmul.f32 %v1655_v49, %v1019_v3  ;;  %v1657_v5 = vpop.eup %1656  ;;  %v1119_v32 = vor.u32 1.1754944e-38, %v1118_v37 }
 0x12f   : > { %1127 = vst.msk [vmem:[%s2002_s5 + $0x20] sm:$0xff] %vm1122_vm5, %v1075_v12  ;;  %v1078_v14 = vmul.f32 %v1657_v5, %v999_v35  ;;  %v1659_v22 = vpop.eup %1658  ;;  %vm1083_vm11 = vweird.f32 %v1657_v5  ;;  %vm1117_vm2 = vcmp.eq.f32.partialorder %v1116_v13, 8.507059e+37 }
 0x130   : > { %v1021_v55 = vadd.f32 %v1655_v49, %v1020_v9  ;;  %v1108_v26 = vmul.f32 %v1659_v22, %v1001_v4  ;;  %vm1084_vm13 = vmor %vm1082_vm12, %vm1083_vm11  ;;  %vm1113_vm15 = vweird.f32 %v1659_v22 }
 0x131   : > { %v1079_v17 = vsub.f32 1.0, %v1078_v14  ;;  %vm1114_vm1 = vmor %vm1112_vm0, %vm1113_vm15 }
 0x132   : > { %v1025_v16 = vsel %vm1024_vm9, %v1655_v49, %v1021_v55  ;;  %v1109_v11 = vsub.f32 1.0, %v1108_v26 }
 0x133   : > { %v1030_v19 = vsel %vm1027_vm10, %v1029_v15, %v1025_v16  ;;  %v1080_v24 = vmul.f32 %v1657_v5, %v1079_v17 }
 0x134   : > { %1124 = vst.msk [vmem:[%s2002_s5 + $0x8] sm:$0xff] %vm1122_vm5, %v1030_v19  ;;  %v1110_v39 = vmul.f32 %v1659_v22, %v1109_v11 }
 0x135   : > { %v1081_v23 = vadd.f32 %v1657_v5, %v1080_v24 }
 0x136   : > { %v1111_v31 = vadd.f32 %v1659_v22, %v1110_v39 }
 0x137   : > { %v1085_v38 = vsel %vm1084_vm13, %v1657_v5, %v1081_v23 }
 0x138   : > { %v1090_v29 = vsel %vm1087_vm14, %v1089_v28, %v1085_v38  ;;  %v1115_v40 = vsel %vm1114_vm1, %v1659_v22, %v1111_v31 }
 0x139   : > { %1128 = vst.msk [vmem:[%s2002_s5 + $0x28] sm:$0xff] %vm1122_vm5, %v1090_v29  ;;  %v1120_v42 = vsel %vm1117_vm2, %v1119_v32, %v1115_v40 }
 0x13a   : > { %1130 = vst.msk [vmem:[%s2002_s5 + $0x38] sm:$0xff] %vm1122_vm5, %v1120_v42 }
 0x13b PF: > { %s13_s12 = sadd.s32 1, %s1666_s12  }
 0x13c   : > { %p10_p4 = scmp.ge.s32.totalorder %s13_s12, 4  }
 0x13e   :  { %12 = sbr.rel (!%p10_p4) target bundleno = 1 (0x1), region = 62 }

// kernel: forward.25
= control target key start
LH: loop header
LB: loop body
LE: loop exit
PB: predicated region body
PF: predicated region fallthrough
CT: control target
= control target key end

     0   :  { %s1169_s12 = smov 0   ;;  %s1361_s0 = inlined_call_operand.vmem [shape: bf16[32,800], index: 0, kind: input, shape index: {}]   ;;  %s1362_s1 = inlined_call_operand.vmem [shape: bf16[800,16], index: 1, kind: input, shape index: {}]   ;;  %s1363_s2 = inlined_call_operand.vmem [shape: f32[1,16], index: 2, kind: input, shape index: {}]   ;;  %s1364_s3 = inlined_call_operand.vmem [shape: f32[32,16], index: 3, kind: output, shape index: {}]  }
   0x1 LB: > { %s824_s13 = sadd.s32 4294967295, %s1147_s12   ;;  %p828_p0 = scmp.ge.s32.totalorder %s1147_s12, 1  ;;  %s1147_s12 = sphi %s1169_s12, %s13_s12  }
   0x2   : > { %p139_p1 = scmp.lt.s32.totalorder %s1147_s12, 3 }
   0x4   : > { %p140_p2 = pnand %p828_p0, %p139_p1 }
   0x5   : > { %s829_s11 = sshll.u32 (!%p140_p2), %s824_s13, 1 }
   0x6   : > { %143 = sbr.rel (%p140_p2) target bundleno = 244 (0xf4), region = 32  ;;  %p165_p3 = scmp.lt.s32.totalorder (!%p140_p2), %s829_s11, 3 }
   0xb   : > { %v1080_v0 = vld [vmem:[%s1362_s1 + $0x38] sm:$0xff]  ;;  %v1079_v4 = vld [vmem:[%s1362_s1 + $0x30] sm:$0xff]  ;;  %v1078_v8 = vld [vmem:[%s1362_s1 + $0x28] sm:$0xff]  ;;  %s1366_s11 = smov (!%p165_p3, %s829_s11), 3  ;;  %vm625_vm0 = vcmask 261120   ;;  %vm765_vm4 = vcmask 130048  }
   0xc   : > { %v1088_v1 = vld [vmem:[%s1362_s1 + $0x78] sm:$0xff]  ;;  %629 = vmatpush.bf16.msra.mxu0 %v1080_v0  ;;  %v1087_v5 = vld [vmem:[%s1362_s1 + $0x70] sm:$0xff]  ;;  %v1086_v9 = vld [vmem:[%s1362_s1 + $0x68] sm:$0xff]  ;;  %s1123_s10 = smul.u32 28, %s1366_s11 }
   0xd   : > { %v1096_v2 = vld [vmem:[%s1362_s1 + $0xb8] sm:$0xff]  ;;  %643 = vmatpush.bf16.msra.mxu1 %v1088_v1  ;;  %v1095_v6 = vld [vmem:[%s1362_s1 + $0xb0] sm:$0xff]  ;;  %v1094_v10 = vld [vmem:[%s1362_s1 + $0xa8] sm:$0xff] }
   0xe   : > { %v1104_v3 = vld [vmem:[%s1362_s1 + $0xf8] sm:$0xff]  ;;  %657 = vmatpush.bf16.msra.mxu2 %v1096_v2  ;;  %v1103_v7 = vld [vmem:[%s1362_s1 + $0xf0] sm:$0xff]  ;;  %v1102_v11 = vld [vmem:[%s1362_s1 + $0xe8] sm:$0xff]  ;;  %s1267_s23 = scalar_lea.vmem %s1361_s0, %s1123_s10 }
   0xf   : > { %671 = vmatpush.bf16.msra.mxu3 %v1104_v3  ;;  %v1077_v12 = vld [vmem:[%s1362_s1 + $0x20] sm:$0xff]  ;;  %v1076_v16 = vld [vmem:[%s1362_s1 + $0x18] sm:$0xff]  ;;  %v1075_v20 = vld [vmem:[%s1362_s1 + $0x10] sm:$0xff] }
  0x10   : > { %630 = vmatpush.bf16.msra.mxu0 %v1079_v4  ;;  %v1085_v13 = vld [vmem:[%s1362_s1 + $0x60] sm:$0xff]  ;;  %v1084_v17 = vld [vmem:[%s1362_s1 + $0x58] sm:$0xff]  ;;  %v1083_v21 = vld [vmem:[%s1362_s1 + $0x50] sm:$0xff] }
  0x11   : > { %644 = vmatpush.bf16.msra.mxu1 %v1087_v5  ;;  %v1093_v14 = vld [vmem:[%s1362_s1 + $0xa0] sm:$0xff]  ;;  %v1092_v18 = vld [vmem:[%s1362_s1 + $0x98] sm:$0xff]  ;;  %v1091_v22 = vld [vmem:[%s1362_s1 + $0x90] sm:$0xff] }
  0x12   : > { %658 = vmatpush.bf16.msra.mxu2 %v1095_v6  ;;  %v1101_v15 = vld [vmem:[%s1362_s1 + $0xe0] sm:$0xff]  ;;  %v1100_v19 = vld [vmem:[%s1362_s1 + $0xd8] sm:$0xff]  ;;  %v1099_v23 = vld [vmem:[%s1362_s1 + $0xd0] sm:$0xff] }
  0x13   : > { %672 = vmatpush.bf16.msra.mxu3 %v1103_v7  ;;  %v1074_v24 = vld [vmem:[%s1362_s1 + $0x8] sm:$0xff]  ;;  %v1073_v28 = vld [vmem:[%s1362_s1] sm:$0xff]  ;;  %v1069_v31 = vld [vmem:[%s1267_s23 + $0x18] sm:$0xf0] }
  0x14   : > { %631 = vmatpush.bf16.msra.mxu0 %v1078_v8  ;;  %v1082_v25 = vld [vmem:[%s1362_s1 + $0x48] sm:$0xff]  ;;  %v1081_v29 = vld [vmem:[%s1362_s1 + $0x40] sm:$0xff]  ;;  %v1112_v34 = vld [vmem:[%s1362_s1 + $0x138] sm:$0xff] }
  0x15   : > { %645 = vmatpush.bf16.msra.mxu1 %v1086_v9  ;;  %v1090_v26 = vld [vmem:[%s1362_s1 + $0x88] sm:$0xff]  ;;  %v835_v30 = vld [vmem:[%s1267_s23] sm:$0xf]  ;;  %v1066_v32 = vld [vmem:[%s1267_s23 + $0x4] sm:$0xf] }
  0x16   : > { %659 = vmatpush.bf16.msra.mxu2 %v1094_v10  ;;  %v1098_v27 = vld [vmem:[%s1362_s1 + $0xc8] sm:$0xff]  ;;  %v837_v33 = vld [vmem:[%s1267_s23 + $0x1c] sm:$0xf0]  ;;  %v1120_v35 = vld [vmem:[%s1362_s1 + $0x178] sm:$0xff]  ;;  %v836_v40 = vor.u32 %v1069_v31, %v835_v30 }
  0x17   : > { %673 = vmatpush.bf16.msra.mxu3 %v1102_v11  ;;  %v1089_v36 = vld [vmem:[%s1362_s1 + $0x80] sm:$0xff]  ;;  %v843_v38 = vld [vmem:[%s1267_s23 + $0x8] sm:$0xf]  ;;  %v1067_v41 = vld [vmem:[%s1267_s23 + $0xc] sm:$0xf]  ;;  %v840_v43 = vor.u32 %v1066_v32, %v837_v33 }
  0x18   : > { %632 = vmatpush.bf16.msra.mxu0 %v1077_v12  ;;  %v1097_v37 = vld [vmem:[%s1362_s1 + $0xc0] sm:$0xff]  ;;  %v845_v42 = vld [vmem:[%s1267_s23 + $0x24] sm:$0xf0]  ;;  %v1111_v45 = vld [vmem:[%s1362_s1 + $0x130] sm:$0xff] }
  0x19   : > { %646 = vmatpush.bf16.msra.mxu1 %v1085_v13  ;;  %v1070_v39 = vld [vmem:[%s1267_s23 + $0x20] sm:$0xf0]  ;;  %v1122_v44 = vld [vmem:[%s1362_s1 + $0x188] sm:$0xff]  ;;  %v1119_v46 = vld [vmem:[%s1362_s1 + $0x170] sm:$0xff]  ;;  %v848_v48 = vor.u32 %v1067_v41, %v845_v42 }
  0x1a   : > { %660 = vmatpush.bf16.msra.mxu2 %v1093_v14  ;;  %v844_v47 = vor.u32 %v1070_v39, %v843_v38  ;;  %v1121_v49 = vld [vmem:[%s1362_s1 + $0x180] sm:$0xff]  ;;  %v1110_v50 = vld [vmem:[%s1362_s1 + $0x128] sm:$0xff]  ;;  %v1108_v54 = vld [vmem:[%s1362_s1 + $0x118] sm:$0xff] }
  0x1b   : > { %674 = vmatpush.bf16.msra.mxu3 %v1101_v15  ;;  %v1118_v51 = vld [vmem:[%s1362_s1 + $0x168] sm:$0xff]  ;;  %v1109_v52 = vld [vmem:[%s1362_s1 + $0x120] sm:$0xff]  ;;  %v1116_v55 = vld [vmem:[%s1362_s1 + $0x158] sm:$0xff] }
  0x1c   : > { %633 = vmatpush.bf16.msra.mxu0 %v1076_v16  ;;  %v1117_v53 = vld [vmem:[%s1362_s1 + $0x160] sm:$0xff]  ;;  %v859_v56 = vld [vmem:[%s1267_s23 + $0x18] sm:$0xf]  ;;  %v1072_v57 = vld [vmem:[%s1267_s23 + $0x30] sm:$0xf0] }
  0x1d   : > { %647 = vmatpush.bf16.msra.mxu1 %v1084_v17  ;;  %v1107_v58 = vld [vmem:[%s1362_s1 + $0x110] sm:$0xff]  ;;  %v860_v60 = vor.u32 %v1072_v57, %v859_v56  ;;  %v1106_v61 = vld [vmem:[%s1362_s1 + $0x108] sm:$0xff]  ;;  %v1105_v63 = vld [vmem:[%s1362_s1 + $0x100] sm:$0xff] }
  0x1e   : > { %661 = vmatpush.bf16.msra.mxu2 %v1092_v18  ;;  %v1115_v59 = vld [vmem:[%s1362_s1 + $0x150] sm:$0xff]  ;;  %v1114_v62 = vld [vmem:[%s1362_s1 + $0x148] sm:$0xff]  ;;  %v1113_v0 = vld [vmem:[%s1362_s1 + $0x140] sm:$0xff] }
  0x1f   : > { %675 = vmatpush.bf16.msra.mxu3 %v1100_v19  ;;  %v851_v1 = vld [vmem:[%s1267_s23 + $0x10] sm:$0xf]  ;;  %v1071_v2 = vld [vmem:[%s1267_s23 + $0x28] sm:$0xf0]  ;;  %v1068_v3 = vld [vmem:[%s1267_s23 + $0x14] sm:$0xf] }
  0x20   : > { %634 = vmatpush.bf16.msra.mxu0 %v1075_v20  ;;  %v853_v4 = vld [vmem:[%s1267_s23 + $0x2c] sm:$0xf0]  ;;  %v852_v5 = vor.u32 %v1071_v2, %v851_v1  ;;  %v1132_v10 = vld [vmem:[%s1363_s2] ss:$0 sm:$0xff]  ;;  %s832_s23 = sshll.u32 %s1366_s11, 3 }
  0x21   : > { %648 = vmatpush.bf16.msra.mxu1 %v1083_v21  ;;  %v856_v6 = vor.u32 %v1068_v3, %v853_v4  ;;  %s175_s24 = scalar_lea.vmem %s1364_s3, %s832_s23 }
  0x22   : > { %662 = vmatpush.bf16.msra.mxu2 %v1091_v22 }
  0x23   : > { %676 = vmatpush.bf16.msra.mxu3 %v1099_v23 }
  0x24   : > { %635 = vmatpush.bf16.msra.mxu0 %v1074_v24 }
  0x25   : > { %649 = vmatpush.bf16.msra.mxu1 %v1082_v25 }
  0x26   : > { %663 = vmatpush.bf16.msra.mxu2 %v1090_v26 }
  0x27   : > { %677 = vmatpush.bf16.msra.mxu3 %v1098_v27 }
  0x28   : > { %636 = vmatpush.bf16.msra.mxu0 %v1073_v28 }
  0x29   : > { %650 = vmatpush.bf16.msra.mxu1 %v1081_v29 }
  0x2a   : > { %664 = vmatpush.bf16.msra.mxu2 %v1089_v36 }
  0x2b   : > { %678 = vmatpush.bf16.msra.mxu3 %v1097_v37  ;;  %637 = vmatmul.bf16.vlgmr.msra.gmra.mxu0 %v836_v40 }
  0x2c   : > { %685 = vmatpush.bf16.msrb.mxu0 %v1112_v34  ;;  %651 = vmatmul.bf16.vlgmr.msra.gmra.mxu1 %v840_v43 }
  0x2d   : > { %699 = vmatpush.bf16.msrb.mxu1 %v1120_v35  ;;  %665 = vmatmul.bf16.vlgmr.msra.gmra.mxu2 %v844_v47 }
  0x2e   : > { %719 = vmatpush.bf16.msrb.mxu2 %v1122_v44  ;;  %679 = vmatmul.bf16.vlgmr.msra.gmra.mxu3 %v848_v48 }
  0x30   : > { %686 = vmatpush.bf16.msrb.mxu0 %v1111_v45 }
  0x31   : > { %700 = vmatpush.bf16.msrb.mxu1 %v1119_v46 }
  0x32   : > { %720 = vmatpush.bf16.msrb.mxu2 %v1121_v49 }
  0x34   : > { %687 = vmatpush.bf16.msrb.mxu0 %v1110_v50 }
  0x35   : > { %701 = vmatpush.bf16.msrb.mxu1 %v1118_v51 }
  0x38   : > { %688 = vmatpush.bf16.msrb.mxu0 %v1109_v52 }
  0x39   : > { %702 = vmatpush.bf16.msrb.mxu1 %v1117_v53 }
  0x3c   : > { %689 = vmatpush.bf16.msrb.mxu0 %v1108_v54 }
  0x3d   : > { %703 = vmatpush.bf16.msrb.mxu1 %v1116_v55  ;;  %1061 = vmatmul.msk.bf16.vlgmr.msrb.gmra.mxu2 %vm625_vm0, %v860_v60 }
  0x40   : > { %690 = vmatpush.bf16.msrb.mxu0 %v1107_v58 }
  0x41   : > { %704 = vmatpush.bf16.msrb.mxu1 %v1115_v59 }
  0x44   : > { %691 = vmatpush.bf16.msrb.mxu0 %v1106_v61 }
  0x45   : > { %705 = vmatpush.bf16.msrb.mxu1 %v1114_v62 }
  0x48   : > { %692 = vmatpush.bf16.msrb.mxu0 %v1105_v63 }
  0x49   : > { %706 = vmatpush.bf16.msrb.mxu1 %v1113_v0 }
  0x4b   : > { %693 = vmatmul.bf16.vlgmr.msrb.gmra.mxu0 %v852_v5 }
  0x4c   : > { %707 = vmatmul.bf16.vlgmr.msrb.gmra.mxu1 %v856_v6 }
  0xa8   : > { %v638_v7 = vpop.f32.mrf.mxu0 }
  0xa9   : > { %v652_v8 = vpop.f32.mrf.mxu1  ;;  %v639_v11 = vadd.f32 %v1132_v10, %v638_v7 }
  0xab   : > { %v653_v12 = vadd.f32 %v652_v8, %v639_v11 }
  0xb0   : > { %v666_v9 = vpop.f32.mrf.mxu2  ;;  %v640_v13 = vpop.f32.mrf.mxu0 }
  0xb1   : > { %v654_v14 = vpop.f32.mrf.mxu1  ;;  %v680_v16 = vpop.f32.mrf.mxu3  ;;  %v667_v17 = vadd.f32 %v666_v9, %v653_v12  ;;  %v641_v18 = vadd.f32 %v1132_v10, %v640_v13 }
  0xb3   : > { %v681_v19 = vadd.f32 %v680_v16, %v667_v17  ;;  %v655_v20 = vadd.f32 %v654_v14, %v641_v18 }
  0xb8   : > { %v668_v15 = vpop.f32.mrf.mxu2 }
  0xb9   : > { %v669_v25 = vadd.f32 %v668_v15, %v655_v20  ;;  %v682_v27 = vpop.f32.mrf.mxu3 }
  0xbb   : > { %v683_v29 = vadd.f32 %v682_v27, %v669_v25 }
  0xc0   : > { %v722_v24 = vpop.f32.mrf.mxu2 }
  0xc8   : > { %v694_v21 = vpop.f32.mrf.mxu0  ;;  %v724_v35 = vpop.f32.mrf.mxu2 }
  0xc9   : > { %v708_v22 = vpop.f32.mrf.mxu1  ;;  %v695_v23 = vadd.f32 %v694_v21, %v681_v19 }
  0xcb   : > { %v709_v26 = vadd.f32 %v708_v22, %v695_v23 }
  0xcd   : > { %v723_v28 = vadd.f32 %v722_v24, %v709_v26 }
  0xcf   : > { %v1062_v30 = vmul.f32 -1.442695, %v723_v28 }
  0xd0   : > { %v696_v31 = vpop.f32.mrf.mxu0 }
  0xd1   : > { %1133 = vpow2.f32 %v1062_v30  ;;  %v697_v32 = vadd.f32 %v696_v31, %v683_v29  ;;  %v710_v33 = vpop.f32.mrf.mxu1 }
  0xd3   : > { %v711_v34 = vadd.f32 %v710_v33, %v697_v32 }
  0xd5   : > { %v725_v36 = vadd.f32 %v724_v35, %v711_v34 }
  0xd7   : > { %v1134_v37 = vpop.eup %1133  ;;  %v1063_v38 = vmul.f32 -1.442695, %v725_v36 }
  0xd8   : > { %v733_v39 = vadd.f32 1.0, %v1134_v37 }
  0xd9   : > { %1135 = vpow2.f32 %v1063_v38 }
  0xda   : > { %1137 = vrcp.f32 %v733_v39  ;;  %v746_v45 = vand.u32 2147483648, %v733_v39  ;;  %v744_v47 = vand.u32 2147483647, %v733_v39  ;;  %vm740_vm2 = vweird.f32 %v733_v39 }
  0xdc   : > { %v747_v50 = vor.u32 1.1754944e-38, %v746_v45  ;;  %vm745_vm5 = vcmp.eq.f32.partialorder %v744_v47, 8.507059e+37 }
  0xdf   : > { %v1136_v40 = vpop.eup %1135 }
  0xe0   : > { %v1138_v41 = vpop.eup %1137  ;;  %v734_v42 = vadd.f32 1.0, %v1136_v40 }
  0xe1   : > { %v736_v43 = vmul.f32 %v1138_v41, %v733_v39  ;;  %vm741_vm1 = vweird.f32 %v1138_v41 }
  0xe2   : > { %1139 = vrcp.f32 %v734_v42  ;;  %vm742_vm3 = vmor %vm740_vm2, %vm741_vm1  ;;  %v761_v55 = vand.u32 2147483648, %v734_v42  ;;  %v759_v57 = vand.u32 2147483647, %v734_v42  ;;  %vm755_vm7 = vweird.f32 %v734_v42 }
  0xe3   : > { %v737_v44 = vsub.f32 1.0, %v736_v43 }
  0xe4   : > { %v762_v59 = vor.u32 1.1754944e-38, %v761_v55  ;;  %vm760_vm9 = vcmp.eq.f32.partialorder %v759_v57, 8.507059e+37 }
  0xe5   : > { %v738_v46 = vmul.f32 %v1138_v41, %v737_v44 }
  0xe7   : > { %v739_v48 = vadd.f32 %v1138_v41, %v738_v46 }
  0xe8   : > { %v1140_v49 = vpop.eup %1139 }
  0xe9   : > { %v743_v51 = vsel %vm742_vm3, %v1138_v41, %v739_v48  ;;  %v751_v52 = vmul.f32 %v1140_v49, %v734_v42  ;;  %vm756_vm6 = vweird.f32 %v1140_v49 }
  0xea   : > { %v748_v53 = vsel %vm745_vm5, %v747_v50, %v743_v51  ;;  %vm757_vm8 = vmor %vm755_vm7, %vm756_vm6 }
  0xeb   : > { %766 = vst.msk [vmem:[%s175_s24] sm:$0xff] %vm765_vm4, %v748_v53  ;;  %v752_v54 = vsub.f32 1.0, %v751_v52 }
  0xed   : > { %v753_v56 = vmul.f32 %v1140_v49, %v752_v54 }
  0xef   : > { %v754_v58 = vadd.f32 %v1140_v49, %v753_v56 }
  0xf1   : > { %v758_v60 = vsel %vm757_vm8, %v1140_v49, %v754_v58 }
  0xf2   : > { %v763_v61 = vsel %vm760_vm9, %v762_v59, %v758_v60 }
  0xf3   : > { %767 = vst.msk [vmem:[%s175_s24 + $0x8] sm:$0xff] %vm765_vm4, %v763_v61 }
  0xf4 PF: > { %s13_s12 = sadd.s32 1, %s1147_s12  }
  0xf5   : > { %p10_p4 = scmp.ge.s32.totalorder %s13_s12, 4  }
  0xf7   :  { %12 = sbr.rel (!%p10_p4) target bundleno = 1 (0x1), region = 62 }

</bundles_post_ra>
